<compile_context>
chip_gen: v7x
topology: tpu7x:2x2x1
jax: 0.10.0
libtpu: 0.0.40
codegen_flags: <defaults>
</compile_context>

<pallas_src>
from functools import partial

import jax
import jax.numpy as jnp
from jax import lax
from jax.experimental import pallas as pl
from jax.experimental.pallas import tpu as pltpu


def attention_kernel(x_ref, wqkv_ref, wproj_ref, bproj_ref, o_ref, q_scratch,
                     *, num_heads, scale, q_tile, compute_dtype):
    Bt, N, C = x_ref.shape
    H = num_heads
    hd = C // H
    nq = N // q_tile
    cdt = compute_dtype

    # ---- fused QKV projection: one lane-dense (Bt*N, C) @ (C, 3C) MXU matmul,
    # ---- operands in the compute dtype, accumulation in f32.
    x2 = x_ref[...].reshape(Bt * N, C).astype(cdt)
    wqkv = wqkv_ref[...].astype(cdt)
    qkv = jnp.dot(x2, wqkv, preferred_element_type=jnp.float32)   # (Bt*N, 3C) f32

    # ---- split into head-major (H*Bt, N, hd) operands (batch index = h*Bt + b).
    # Column ordering of w_qkv matches torch's reshape(B,N,3,H,hd) convention.
    def heads(col, scl=None):
        h = qkv[:, col * C:(col + 1) * C]                 # (Bt*N, C) f32
        if scl is not None:
            h = h * jnp.float32(scl)                      # fold softmax scale into q
        h = h.astype(cdt).reshape(Bt * N, H, hd)
        h = jnp.transpose(h, (1, 0, 2))                   # (H, Bt*N, hd)
        return h.reshape(H * Bt, N, hd)

    q_scratch[...] = heads(0, scale)   # Q in VMEM scratch (dynamic tile reads)
    k = heads(1)
    v = heads(2)

    wproj = wproj_ref[...].astype(cdt)
    bproj = bproj_ref[...].astype(jnp.float32)            # (1, C)

    # ---- query-tile loop: score/prob block bounded to (H*Bt, tq, N).
    def q_tile_step(qi, carry):
        row0 = pl.multiple_of(qi * q_tile, q_tile)
        q_t = q_scratch[:, pl.ds(row0, q_tile), :]        # (H*Bt, tq, hd)

        s = jnp.einsum('bqd,bkd->bqk', q_t, k,
                       preferred_element_type=jnp.float32)   # (H*Bt, tq, N) f32
        m = jnp.max(s, axis=-1, keepdims=True)
        p = jnp.exp(s - m)
        l = jnp.sum(p, axis=-1, keepdims=True)               # (H*Bt, tq, 1) f32

        pv = jnp.einsum('bqk,bkd->bqd', p.astype(cdt), v,
                        preferred_element_type=jnp.float32)   # (H*Bt, tq, hd) f32
        pv = pv / l                                           # exact softmax denom

        # back to a token-major, lane-dense (rows, C) slab for the projection
        attn = jnp.transpose(pv.reshape(H, Bt * q_tile, hd), (1, 0, 2))
        attn = attn.reshape(Bt * q_tile, C).astype(cdt)

        y = jnp.dot(attn, wproj, preferred_element_type=jnp.float32) + bproj
        o_ref[:, pl.ds(row0, q_tile), :] = (
            y.reshape(Bt, q_tile, C).astype(o_ref.dtype))
        return carry

    lax.fori_loop(0, nq, q_tile_step, None)


def _rows_per_step(B, N):
    """Batch rows per grid step so the projections see M = Bt*N >= 256 rows
    (fills the 256x256 / 128x128 MXU) without multiplying the score block
    when N is already large."""
    if N >= 256:
        return 1
    bt = min(B, -(-256 // N))
    while B % bt:
        bt -= 1
    return max(bt, 1)


def _pick_q_tile(N, max_tile=256):
    """Largest query tile <= max_tile that evenly divides N (multiple of 8 when
    actually tiling) so the per-tile score block is (H*Bt, tq, N)."""
    if N <= max_tile:
        return N
    for t in range(max_tile, 7, -1):
        if N % t == 0 and t % 8 == 0:
            return t
    return N


def msa_attention(x, w_qkv, w_proj, b_proj, num_heads, *,
                  compute_dtype=None, q_tile=None, rows_per_step=None):
    B, N, C = x.shape
    assert C % num_heads == 0, "dim must be divisible by num_heads"
    hd = C // num_heads
    scale = hd ** -0.5

    if compute_dtype is None:
        # bf16 MXU operands on all TPU generations; accumulation stays f32.
        compute_dtype = (jnp.bfloat16 if x.dtype in (jnp.float32, jnp.bfloat16)
                         else x.dtype)
    bt = rows_per_step if rows_per_step is not None else _rows_per_step(B, N)
    assert B % bt == 0, "rows_per_step must divide batch"
    tq = q_tile if q_tile is not None else _pick_q_tile(N)
    assert N % tq == 0, "q_tile must divide N"

    in_bytes = jnp.dtype(x.dtype).itemsize
    c_bytes = jnp.dtype(compute_dtype).itemsize
    M = bt * N
    vmem_est = (
        2 * 2 * M * C * in_bytes                       # x + out blocks (double-buffered)
        + 2 * (3 * C * C + C * C + C) * in_bytes       # resident weights (double-buffered)
        + M * 3 * C * 4                                # f32 qkv
        + 3 * M * C * c_bytes                          # q scratch + k + v
        + num_heads * bt * tq * N * (2 * 4 + c_bytes)  # s, p (f32) + p cast
        + M * C * (4 + c_bytes) + M * C * 4            # pv / attn slab / y
    )
    vmem_limit = int(min(128 * 1024 * 1024, max(32 * 1024 * 1024, 2 * vmem_est)))

    flops = (2 * B * N * C * 3 * C                     # qkv projection
             + 4 * B * num_heads * N * N * hd          # q@k^T and p@v
             + 2 * B * N * C * C)                      # output projection
    bytes_accessed = (x.size * x.dtype.itemsize
                      + w_qkv.size * w_qkv.dtype.itemsize
                      + w_proj.size * w_proj.dtype.itemsize
                      + b_proj.size * b_proj.dtype.itemsize
                      + B * N * C * x.dtype.itemsize)
    cost = pl.CostEstimate(flops=flops,
                           transcendentals=B * num_heads * N * N,
                           bytes_accessed=bytes_accessed)

    kernel = partial(attention_kernel, num_heads=num_heads, scale=scale,
                     q_tile=tq, compute_dtype=compute_dtype)
    return pl.pallas_call(
        kernel,
        out_shape=jax.ShapeDtypeStruct((B, N, C), x.dtype),
        grid=(B // bt,),
        in_specs=[
            pl.BlockSpec((bt, N, C), lambda b: (b, 0, 0)),   # x: Bt batch rows
            pl.BlockSpec((C, 3 * C), lambda b: (0, 0)),      # w_qkv (resident)
            pl.BlockSpec((C, C), lambda b: (0, 0)),          # w_proj (resident)
            pl.BlockSpec((1, C), lambda b: (0, 0)),          # b_proj (resident)
        ],
        out_specs=pl.BlockSpec((bt, N, C), lambda b: (b, 0, 0)),
        scratch_shapes=[pltpu.VMEM((num_heads * bt, N, hd), compute_dtype)],
        compiler_params=pltpu.CompilerParams(
            dimension_semantics=("parallel",),   # batch groups split across TCs
            vmem_limit_bytes=vmem_limit),
        cost_estimate=cost,
    )(x, w_qkv, w_proj, b_proj)


def msa_attention_ref(x, w_qkv, w_proj, b_proj, num_heads):
    """Pure-JAX reference matching the PyTorch module semantics."""
    B, N, C = x.shape
    hd = C // num_heads
    scale = hd ** -0.5
    qkv = x @ w_qkv                                          # (B, N, 3C)
    qkv = qkv.reshape(B, N, 3, num_heads, hd).transpose(2, 0, 3, 1, 4)
    q, k, v = qkv[0], qkv[1], qkv[2]                         # (B, H, N, hd)
    attn = (q @ k.transpose(0, 1, 3, 2)) * scale             # (B, H, N, N)
    attn = jax.nn.softmax(attn, axis=-1)
    out = (attn @ v).transpose(0, 2, 1, 3).reshape(B, N, C)
    return out @ w_proj + b_proj[0]


if __name__ == "__main__":
    B, N, C, H = 2, 16, 64, 8   # small demo shapes; N tokens, C=dim, H heads

    key = jax.random.PRNGKey(0)
    kx, kq, kp, kb = jax.random.split(key, 4)

    x = jax.random.normal(kx, (B, N, C), dtype=jnp.float32)
    # deterministic "Linear" parameters (stored transposed: y = x @ W + b)
    w_qkv = jax.random.normal(kq, (C, 3 * C), dtype=jnp.float32) * 0.05
    w_proj = jax.random.normal(kp, (C, C), dtype=jnp.float32) * 0.05
    b_proj = jax.random.normal(kb, (1, C), dtype=jnp.float32) * 0.05

    ref = msa_attention_ref(x, w_qkv, w_proj, b_proj, num_heads=H)

    # 1) default path: bf16 MXU operands / f32 accumulation, whole batch in one
    #    grid step. Tolerance covers the bf16 operand rounding.
    out = jax.block_until_ready(
        msa_attention(x, w_qkv, w_proj, b_proj, num_heads=H))
    assert out.shape == (B, N, C)
    assert jnp.allclose(out, ref, atol=3e-2, rtol=3e-2), "bf16-compute mismatch"

    # 2) f32 MXU operands: tight check of the kernel math itself.
    out_f32 = jax.block_until_ready(
        msa_attention(x, w_qkv, w_proj, b_proj, num_heads=H,
                      compute_dtype=jnp.float32))
    assert jnp.allclose(out_f32, ref, atol=2e-4, rtol=2e-4), "f32-compute mismatch"

    # 3) force two query tiles (tq=8) to exercise the bounded-score tile loop.
    out_tiled = jax.block_until_ready(
        msa_attention(x, w_qkv, w_proj, b_proj, num_heads=H,
                      compute_dtype=jnp.float32, q_tile=8))
    assert jnp.allclose(out_tiled, ref, atol=2e-4, rtol=2e-4), "tiled-path mismatch"

    # 4) bf16 inputs end to end.
    out_bf16 = jax.block_until_ready(
        msa_attention(x.astype(jnp.bfloat16), w_qkv.astype(jnp.bfloat16),
                      w_proj.astype(jnp.bfloat16), b_proj.astype(jnp.bfloat16),
                      num_heads=H))
    assert out_bf16.shape == (B, N, C)
    assert bool(jnp.all(jnp.isfinite(out_bf16.astype(jnp.float32))))
    assert jnp.allclose(out_bf16.astype(jnp.float32), ref, atol=5e-2, rtol=5e-2)

    print("KERNEL_OK")
</pallas_src>

<mosaic_0001>
module attributes {stable_mosaic.version = 11 : i64} {
  func.func @attention_kernel(%arg0: i32, %arg1: memref<2x16x64xf32, #tpu.memory_space<vmem>>, %arg2: memref<64x192xf32, #tpu.memory_space<vmem>>, %arg3: memref<64x64xf32, #tpu.memory_space<vmem>>, %arg4: memref<1x64xf32, #tpu.memory_space<vmem>>, %arg5: memref<2x16x64xf32, #tpu.memory_space<vmem>>, %arg6: memref<16x16x8xbf16, #tpu.memory_space<vmem>>) attributes {dimension_semantics = [#tpu.dimension_semantics<parallel>], iteration_bounds = array<i64: 1>, scalar_prefetch = 0 : i64, scratch_operands = 1 : i64, tpu.core_type = #tpu.core_type<tc>, window_params = [{transform_indices = @transform_0, window_bounds = array<i64: 2, 16, 64>}, {pipeline_mode = #tpu.pipeline_mode<synchronous>, transform_indices = @transform_1, window_bounds = array<i64: 64, 192>}, {pipeline_mode = #tpu.pipeline_mode<synchronous>, transform_indices = @transform_2, window_bounds = array<i64: 64, 64>}, {pipeline_mode = #tpu.pipeline_mode<synchronous>, transform_indices = @transform_3, window_bounds = array<i64: 1, 64>}, {transform_indices = @transform_4, window_bounds = array<i64: 2, 16, 64>}]} {
    %c0 = arith.constant 0 : index
    %c0_0 = arith.constant 0 : index
    %c0_1 = arith.constant 0 : index
    %0 = vector.load %arg1[%c0, %c0_0, %c0_1] : memref<2x16x64xf32, #tpu.memory_space<vmem>>, vector<2x16x64xf32>
    %1 = vector.shape_cast %0 : vector<2x16x64xf32> to vector<32x64xf32>
    %2 = arith.truncf %1 : vector<32x64xf32> to vector<32x64xbf16>
    %c0_2 = arith.constant 0 : index
    %c0_3 = arith.constant 0 : index
    %3 = vector.load %arg2[%c0_2, %c0_3] : memref<64x192xf32, #tpu.memory_space<vmem>>, vector<64x192xf32>
    %4 = arith.truncf %3 : vector<64x192xf32> to vector<64x192xbf16>
    %cst = arith.constant dense<0.000000e+00> : vector<32x192xf32>
    %5 = tpu.matmul %2, %4, %cst {dimension_numbers = #tpu.dot_dimension_numbers<[1], [0], [0], [1], [0, 0, 1, 1], [], []>} : vector<32x64xbf16>, vector<64x192xbf16>, vector<32x192xf32> -> vector<32x192xf32>
    %6 = vector.extract_strided_slice %5 {offsets = [0, 0], sizes = [32, 64], strides = [1, 1]} : vector<32x192xf32> to vector<32x64xf32>
    %cst_4 = arith.constant 0.353553385 : f32
    %7 = vector.broadcast %cst_4 : f32 to vector<32x64xf32>
    %8 = arith.mulf %6, %7 : vector<32x64xf32>
    %9 = arith.truncf %8 : vector<32x64xf32> to vector<32x64xbf16>
    %10 = vector.shape_cast %9 : vector<32x64xbf16> to vector<32x8x8xbf16>
    %11 = tpu.transpose %10, [1, 0, 2] : vector<32x8x8xbf16> -> vector<8x32x8xbf16>
    %12 = vector.shape_cast %11 : vector<8x32x8xbf16> to vector<16x16x8xbf16>
    %c0_5 = arith.constant 0 : index
    %c0_6 = arith.constant 0 : index
    %c0_7 = arith.constant 0 : index
    %13 = vector.load %arg6[%c0_5, %c0_6, %c0_7] : memref<16x16x8xbf16, #tpu.memory_space<vmem>>, vector<16x16x8xbf16>
    tpu.vector_store %arg6[%c0_5, %c0_6, %c0_7], %12 {strides = array<i32>} : memref<16x16x8xbf16, #tpu.memory_space<vmem>>, vector<16x16x8xbf16>,
    %14 = vector.extract_strided_slice %5 {offsets = [0, 64], sizes = [32, 64], strides = [1, 1]} : vector<32x192xf32> to vector<32x64xf32>
    %15 = arith.truncf %14 : vector<32x64xf32> to vector<32x64xbf16>
    %16 = vector.shape_cast %15 : vector<32x64xbf16> to vector<32x8x8xbf16>
    %17 = tpu.transpose %16, [1, 0, 2] : vector<32x8x8xbf16> -> vector<8x32x8xbf16>
    %18 = vector.shape_cast %17 : vector<8x32x8xbf16> to vector<16x16x8xbf16>
    %19 = vector.extract_strided_slice %5 {offsets = [0, 128], sizes = [32, 64], strides = [1, 1]} : vector<32x192xf32> to vector<32x64xf32>
    %20 = arith.truncf %19 : vector<32x64xf32> to vector<32x64xbf16>
    %21 = vector.shape_cast %20 : vector<32x64xbf16> to vector<32x8x8xbf16>
    %22 = tpu.transpose %21, [1, 0, 2] : vector<32x8x8xbf16> -> vector<8x32x8xbf16>
    %23 = vector.shape_cast %22 : vector<8x32x8xbf16> to vector<16x16x8xbf16>
    %c0_8 = arith.constant 0 : index
    %c0_9 = arith.constant 0 : index
    %24 = vector.load %arg3[%c0_8, %c0_9] : memref<64x64xf32, #tpu.memory_space<vmem>>, vector<64x64xf32>
    %25 = arith.truncf %24 : vector<64x64xf32> to vector<64x64xbf16>
    %c0_10 = arith.constant 0 : index
    %c0_11 = arith.constant 0 : index
    %26 = vector.load %arg4[%c0_10, %c0_11] : memref<1x64xf32, #tpu.memory_space<vmem>>, vector<1x64xf32>
    %c0_i32 = arith.constant 0 : i32
    %c16_i32 = arith.constant 16 : i32
    %27 = arith.muli %c0_i32, %c16_i32 : i32
    %28 = tpu.assume_multiple %27, 16 : i32
    %c0_12 = arith.constant 0 : index
    %29 = arith.index_cast %28 : i32 to index
    %c0_13 = arith.constant 0 : index
    %30 = vector.load %arg6[%c0_12, %29, %c0_13] : memref<16x16x8xbf16, #tpu.memory_space<vmem>>, vector<16x16x8xbf16>
    "tpu.trace_start"() <{level = 10 : i32, message = "bqd,bkd->bqk"}> : () -> ()
    %cst_14 = arith.constant dense<0.000000e+00> : vector<16x16x16xf32>
    %31 = tpu.matmul %30, %18, %cst_14 {dimension_numbers = #tpu.dot_dimension_numbers<[2], [2], [1], [1], [0, 0, 0, 1, 1, 1], [0], [0]>} : vector<16x16x8xbf16>, vector<16x16x8xbf16>, vector<16x16x16xf32> -> vector<16x16x16xf32>
    "tpu.trace_stop"() : () -> ()
    %cst_15 = arith.constant dense<0xFF800000> : vector<16x16xf32>
    %32 = vector.multi_reduction <maximumf>, %31, %cst_15 [2] : vector<16x16x16xf32> to vector<16x16xf32>
    %33 = vector.shape_cast %32 : vector<16x16xf32> to vector<16x16x1xf32>
    %34 = vector.broadcast %33 : vector<16x16x1xf32> to vector<16x16x16xf32>
    %35 = arith.subf %31, %34 : vector<16x16x16xf32>
    %36 = math.exp %35 : vector<16x16x16xf32>
    %cst_16 = arith.constant dense<0.000000e+00> : vector<16x16xf32>
    %37 = vector.multi_reduction <add>, %36, %cst_16 [2] : vector<16x16x16xf32> to vector<16x16xf32>
    %38 = vector.shape_cast %37 : vector<16x16xf32> to vector<16x16x1xf32>
    %39 = arith.truncf %36 : vector<16x16x16xf32> to vector<16x16x16xbf16>
    "tpu.trace_start"() <{level = 10 : i32, message = "bqk,bkd->bqd"}> : () -> ()
    %cst_17 = arith.constant dense<0.000000e+00> : vector<16x16x8xf32>
    %40 = tpu.matmul %39, %23, %cst_17 {dimension_numbers = #tpu.dot_dimension_numbers<[2], [1], [1], [2], [0, 0, 0, 1, 1, 2], [0], [0]>} : vector<16x16x16xbf16>, vector<16x16x8xbf16>, vector<16x16x8xf32> -> vector<16x16x8xf32>
    "tpu.trace_stop"() : () -> ()
    %41 = vector.broadcast %38 : vector<16x16x1xf32> to vector<16x16x8xf32>
    %42 = arith.divf %40, %41 : vector<16x16x8xf32>
    %43 = vector.shape_cast %42 : vector<16x16x8xf32> to vector<8x32x8xf32>
    %44 = tpu.transpose %43, [1, 0, 2] : vector<8x32x8xf32> -> vector<32x8x8xf32>
    %45 = vector.shape_cast %44 : vector<32x8x8xf32> to vector<32x64xf32>
    %46 = arith.truncf %45 : vector<32x64xf32> to vector<32x64xbf16>
    %cst_18 = arith.constant dense<0.000000e+00> : vector<32x64xf32>
    %47 = tpu.matmul %46, %25, %cst_18 {dimension_numbers = #tpu.dot_dimension_numbers<[1], [0], [0], [1], [0, 0, 1, 1], [], []>} : vector<32x64xbf16>, vector<64x64xbf16>, vector<32x64xf32> -> vector<32x64xf32>
    %48 = vector.broadcast %26 : vector<1x64xf32> to vector<32x64xf32>
    %49 = arith.addf %47, %48 : vector<32x64xf32>
    %50 = vector.shape_cast %49 : vector<32x64xf32> to vector<2x16x64xf32>
    %c0_19 = arith.constant 0 : index
    %51 = arith.index_cast %28 : i32 to index
    %c0_20 = arith.constant 0 : index
    %52 = vector.load %arg5[%c0_19, %51, %c0_20] : memref<2x16x64xf32, #tpu.memory_space<vmem>>, vector<2x16x64xf32>
    tpu.vector_store %arg5[%c0_19, %51, %c0_20], %50 {strides = array<i32>} : memref<2x16x64xf32, #tpu.memory_space<vmem>>, vector<2x16x64xf32>,
    %c1_i32 = arith.constant 1 : i32
    return
  }
  func.func @transform_0(%arg0: i32) -> (i32, i32, i32) {
    %c0_i32 = arith.constant 0 : i32
    %c0_i32_0 = arith.constant 0 : i32
    %c0_i32_1 = arith.constant 0 : i32
    return %arg0, %c0_i32, %c0_i32_0 : i32, i32, i32
  }
  func.func @transform_1(%arg0: i32) -> (i32, i32) {
    %c0_i32 = arith.constant 0 : i32
    %c0_i32_0 = arith.constant 0 : i32
    %c0_i32_1 = arith.constant 0 : i32
    return %c0_i32, %c0_i32_0 : i32, i32
  }
  func.func @transform_2(%arg0: i32) -> (i32, i32) {
    %c0_i32 = arith.constant 0 : i32
    %c0_i32_0 = arith.constant 0 : i32
    %c0_i32_1 = arith.constant 0 : i32
    return %c0_i32, %c0_i32_0 : i32, i32
  }
  func.func @transform_3(%arg0: i32) -> (i32, i32) {
    %c0_i32 = arith.constant 0 : i32
    %c0_i32_0 = arith.constant 0 : i32
    %c0_i32_1 = arith.constant 0 : i32
    return %c0_i32, %c0_i32_0 : i32, i32
  }
  func.func @transform_4(%arg0: i32) -> (i32, i32, i32) {
    %c0_i32 = arith.constant 0 : i32
    %c0_i32_0 = arith.constant 0 : i32
    %c0_i32_1 = arith.constant 0 : i32
    return %arg0, %c0_i32, %c0_i32_0 : i32, i32, i32
  }
}

</mosaic_0001>

<bundles_post_ra>
// kernel: tpu_custom_call.1
= control target key start
LH: loop header
LB: loop body
LE: loop exit
PB: predicated region body
PF: predicated region fallthrough
CT: control target
= control target key end

     0   :  { %9 = vsyncpa [#allocation4], 0  ;;  %s7787_s0 = inlined_call_operand.hbm [shape: f32[2,16,64], index: 0, kind: input, shape index: {}]   ;;  %s7788_s1 = inlined_call_operand.hbm [shape: f32[64,192], index: 1, kind: input, shape index: {}]   ;;  %s7789_s2 = inlined_call_operand.hbm [shape: f32[64,64], index: 2, kind: input, shape index: {}]   ;;  %s7790_s3 = inlined_call_operand.vmem [shape: f32[1,64], index: 3, kind: input, shape index: {}]   ;;  %s7791_s4 = inlined_call_operand.hbm [shape: f32[2,16,64], index: 4, kind: output, shape index: {}]  }
   0x1   :  { %10 = vsyncpa [#allocation7], 0 }
   0x2   :  { %11 = vsyncpa [#allocation5], 0  ;;  %s6156_s15 = smov [#allocation6]   ;;  %s6062_s19 = scalar_lea.hbm %s7788_s1, 2048 }
   0x3   :  { %s29_s16 = sshll.u32 %s6156_s15, 4  ;;  %p6063_p0 = scmp.ne.s32.totalorder %s7788_s1, %s6062_s19  ;;  %s30_s16 = int_to_ptr.vmem [resolvable:$true] %s29_s16 }
   0x4   :  { %p6066_p1 = scmp.lt.u32.totalorder %s6062_s19, %s7788_s1 }
   0x6   :  { %p6068_p2 = pnand %p6066_p1, %p6063_p0 }
   0x8   :  { %6071 = shalt.err (!%p6068_p2)
}
   0x9   :  { %s6072_s24 = scalar_lea.vmem %s30_s16, 2048  ;;  %p6077_p4 = scmp.lt.s32.totalorder %s30_s16, %s30_s16 }
   0xa   :  { %p6073_p3 = scmp.ne.s32.totalorder %s30_s16, %s6072_s24  ;;  %p6078_p5 = scmp.lt.s32.totalorder %s6072_s24, %s6072_s24 }
   0xc   :  { %p6079_p6 = por %p6078_p5, %p6077_p4 }
   0xe   :  { %p6080_p7 = pnand %p6079_p6, %p6073_p3 }
  0x10   :  { %6083 = shalt.err (!%p6080_p7)
}
  0x11   :  { %s6157_s25 = smov 256   ;;  %s6158_s26 = smov 16  }
  0x12   :  { %35 = dma.hbm_to_vmem [thread:$0]  %s7788_s1, 2048, %s30_s16, [#allocation7], %s6157_s25, %s6157_s25, %s6158_s26  }
  0x13   :  { %s6159_s29 = smov [#allocation3]   ;;  %s6084_s7 = scalar_lea.hbm %s7787_s0, 512 }
  0x14   :  { %s17_s30 = sshll.u32 %s6159_s29, 4  ;;  %p6085_p8 = scmp.ne.s32.totalorder %s7787_s0, %s6084_s7  ;;  %s18_s30 = int_to_ptr.vmem [resolvable:$true] %s17_s30 }
  0x15   :  { %p6088_p9 = scmp.lt.u32.totalorder %s6084_s7, %s7787_s0 }
  0x17   :  { %p6090_p10 = pnand %p6088_p9, %p6085_p8 }
  0x19   :  { %6093 = shalt.err (!%p6090_p10)
}
  0x1a   :  { %s6094_s12 = scalar_lea.vmem %s18_s30, 512  ;;  %p6099_p12 = scmp.lt.s32.totalorder %s18_s30, %s18_s30 }
  0x1b   :  { %p6095_p11 = scmp.ne.s32.totalorder %s18_s30, %s6094_s12  ;;  %p6100_p13 = scmp.lt.s32.totalorder %s6094_s12, %s6094_s12 }
  0x1d   :  { %p6101_p0 = por %p6100_p13, %p6099_p12 }
  0x1f   :  { %p6102_p1 = pnand %p6101_p0, %p6095_p11 }
  0x21   :  { %6105 = shalt.err (!%p6102_p1)
}
  0x22   :  { %s6160_s1 = smov 128   ;;  %s6161_s13 = smov 8  }
  0x23   :  { %23 = dma.hbm_to_vmem [thread:$0]  %s7787_s0, 512, %s18_s30, [#allocation4], %s6160_s1, %s6160_s1, %s6161_s13  }
  0x24   :  { %s6162_s16 = smov [#allocation8]   ;;  %s6106_s20 = scalar_lea.hbm %s7789_s2, 1024 }
  0x25   :  { %s41_s17 = sshll.u32 %s6162_s16, 4  ;;  %p6107_p2 = scmp.ne.s32.totalorder %s7789_s2, %s6106_s20  ;;  %s42_s17 = int_to_ptr.vmem [resolvable:$true] %s41_s17 }
  0x26   :  { %p6110_p3 = scmp.lt.u32.totalorder %s6106_s20, %s7789_s2 }
  0x28   :  { %p6112_p4 = pnand %p6110_p3, %p6107_p2 }
  0x2a   :  { %6115 = shalt.err (!%p6112_p4)
}
  0x2b   :  { %s6116_s25 = scalar_lea.vmem %s42_s17, 1024  ;;  %p6121_p6 = scmp.lt.s32.totalorder %s42_s17, %s42_s17 }
  0x2c   :  { %p6117_p5 = scmp.ne.s32.totalorder %s42_s17, %s6116_s25  ;;  %p6122_p7 = scmp.lt.s32.totalorder %s6116_s25, %s6116_s25 }
  0x2e   :  { %p6123_p8 = por %p6122_p7, %p6121_p6 }
  0x30   :  { %p6124_p9 = pnand %p6123_p8, %p6117_p5 }
  0x32   :  { %6127 = shalt.err (!%p6124_p9)
}
  0x33   :  { %47 = dma.hbm_to_vmem [thread:$0]  %s7789_s2, 1024, %s42_s17, [#allocation7], %s6160_s1, %s6160_s1, %s6161_s13  }
  0x34   :  { %6150 = dma.done.wait [#allocation4], 512  }
  0x35   :  { %6151 = vsyncadd [#allocation4], 4294966784 }
  0x36   :  { %6152 = dma.done.wait [#allocation7], 3072  }
  0x37   :  { %6153 = vsyncadd [#allocation7], 4294964224  ;;  %v6163_v0 = vmov 0   ;;  %v67_v1 = vld [vmem:[#allocation6 + $0x8] sm:$0xff]  ;;  %v69_v2 = vld [vmem:[#allocation6 + $0x18] sm:$0xff]  ;;  %vm90_vm0 = vcmask 523264  }
  0x38   :  { %129 = vmatprep.mubr.bf16.mxu0 %v6163_v0  ;;  %v66_v3 = vld [vmem:[#allocation6] sm:$0xff]  ;;  %v83_v4 = vpack.c.bf16 %v69_v2, %v67_v1  ;;  %v68_v5 = vld [vmem:[#allocation6 + $0x10] sm:$0xff]  ;;  %v71_v6 = vld [vmem:[#allocation6 + $0x28] sm:$0xff]  ;;  %s6164_s2 = smov 104   ;;  %s6165_s28 = smov 120   ;;  %v7792_v1 = vmov 0.0  }
  0x39   :  { %v73_v7 = vld [vmem:[#allocation6 + $0x38] sm:$0xff]  ;;  %v82_v8 = vpack.c.bf16 %v68_v5, %v66_v3  ;;  %v70_v10 = vld [vmem:[#allocation6 + $0x20] sm:$0xff]  ;;  %v72_v11 = vld [vmem:[#allocation6 + $0x30] sm:$0xff]  ;;  %s6166_s29 = smov 96   ;;  %s6167_s30 = smov 112   ;;  %5634 = vmatprep.subr.bf16.mxu1 %v7792_v1  ;;  %vm6175_vm1 = vmmov 0  }
  0x3a   :  { %v85_v9 = vpack.c.bf16 %v73_v7, %v71_v6  ;;  %v75_v12 = vld [vmem:[#allocation6 + $0x48] sm:$0xff]  ;;  %97 = vmatprep.subr.bf16.mxu0 %v83_v4  ;;  %v77_v13 = vld [vmem:[#allocation6 + $0x58] sm:$0xff]  ;;  %v84_v14 = vpack.c.bf16 %v72_v11, %v70_v10  ;;  %v74_v16 = vld [vmem:[#allocation6 + $0x40] sm:$0xff]  ;;  %s6168_s5 = smov 80   ;;  %s6169_s6 = smov 88   ;;  %v255_v6 = vlaneseq  ;;  %5636 = vmatprep.mubr.msk.bf16.mxu1 %vm6175_vm1, %v7792_v1  ;;  %vm858_vm2 = vcmask 64512  }
  0x3b   :  { %98 = vmatpush1.bf16.msra.mxu0 %v82_v8  ;;  %v87_v15 = vpack.c.bf16 %v77_v13, %v75_v12  ;;  %v76_v17 = vld [vmem:[#allocation6 + $0x50] sm:$0xff]  ;;  %v79_v18 = vld [vmem:[#allocation6 + $0x68] sm:$0xff]  ;;  %v81_v19 = vld [vmem:[#allocation6 + $0x78] sm:$0xff]  ;;  %s6170_s7 = smov 72   ;;  %s6171_s8 = smov 64   ;;  %vm3080_vm3 = vcmask 130048  }
  0x3c   :  { %99 = vmatprep.subr.bf16.mxu0 %v85_v9  ;;  %v86_v20 = vpack.c.bf16 %v76_v17, %v74_v16  ;;  %v89_v21 = vpack.c.bf16 %v81_v19, %v79_v18  ;;  %v78_v22 = vld [vmem:[#allocation6 + $0x60] sm:$0xff]  ;;  %v80_v23 = vld [vmem:[#allocation6 + $0x70] sm:$0xff]  ;;  %v61_v26 = vld [vmem:[#allocation3 + $0x8] sm:$0xff]  ;;  %v6173_v4 = vmov 1983009808   ;;  %v256_v8 = vshrl.u32 %v255_v6, 7 }
  0x3d   :  { %v88_v24 = vpack.c.bf16 %v80_v23, %v78_v22  ;;  %v60_v25 = vld [vmem:[#allocation3] sm:$0xff]  ;;  %v62_v28 = vld [vmem:[#allocation3 + $0x10] sm:$0xff]  ;;  %v63_v29 = vld [vmem:[#allocation3 + $0x18] sm:$0xff]  ;;  %v253_v5 = vunpack.c.l.s4 %v6173_v4  ;;  %v6174_v11 = vmov 1934713408   ;;  %s6176_s9 = smov 24  }
  0x3e   :  { %v64_v27 = vpack.c.bf16 %v61_v26, %v60_v25  ;;  %v65_v30 = vpack.c.bf16 %v63_v29, %v62_v28  ;;  %v285_v12 = vunpack.c.l.s4 %v6174_v11  ;;  %s6178_s10 = smov 40   ;;  %s6179_s11 = smov 48   ;;  %vm5361_vm4 = vcmask 195584  }
  0x3f   :  { %100 = vmatpush1.bf16.msra.mxu0 %v84_v14  ;;  %v254_v7 = vunpack.c.0.s8 %v253_v5  ;;  %s6180_s12 = smov 56   ;;  %vm5366_vm5 = vcmask 261120   ;;  %vm5371_vm6 = vcmask 326656   ;;  %vm5376_vm7 = vcmask 392192   ;;  %s6181_s16 = smov [#allocation9]  }
  0x40   :  { %101 = vmatprep.subr.bf16.mxu0 %v87_v15  ;;  %v286_v22 = vunpack.c.0.s8 %v285_v12  ;;  %vm5381_vm8 = vcmask 457728   ;;  %s5458_s17 = sshll.u32 %s6181_s16, 4  ;;  %s5459_s17 = int_to_ptr.vmem [resolvable:$true] %s5458_s17 }
  0x41   :  { %p6133_p11 = scmp.lt.s32.totalorder %s5459_s17, %s5459_s17 }
  0x43   :  { %102 = vmatpush1.bf16.msra.mxu0 %v86_v20 }
  0x44   :  { %103 = vmatprep.subr.bf16.mxu0 %v89_v21  ;;  %v6332_v21 = vsub.s32 %v254_v7, %v256_v8 }
  0x47   :  { %104 = vmatpush1.bf16.msra.mxu0 %v88_v24 }
  0x48   :  { %5652 = vmatprep.subr.bf16.mxu0 %v7792_v1 }
  0x4a   :  { %5471 = vmatmul.mubr.msk.bf16.vlgmr.msra.gmra.mrb[0].mxu0 %vm90_vm0, %v64_v27 }
  0x4b   :  { %139 = vmatprep.mubr.bf16.mxu0 %v6163_v0 }
  0x52   :  { %5472 = vmatmul.mubr.msk.bf16.gmra.mrb[4].mxu0 %vm90_vm0, %v65_v30 }
  0x53   :  { %5654 = vmatprep.mubr.msk.bf16.mxu0 %vm6175_vm1, %v7792_v1 }
 0x11d   :  { %v131_v31 = vpop.f32.mrb[0].mxu0 }
 0x11e   :  { %v133_v32 = vpop.f32.mrb[1].mxu0  ;;  %v150_v34 = vmul.f32 0.35355338, %v131_v31 }
 0x11f   :  { %v135_v33 = vpop.f32.mrb[2].mxu0 }
 0x120   :  { %v151_v35 = vmul.f32 0.35355338, %v135_v33  ;;  %v875_v36 = vpack.c.bf16 %v135_v33, %v131_v31  ;;  %v137_v37 = vpop.f32.mrb[3].mxu0 }
 0x121   :  { %v6252_v38 = vpack.c.bf16 %v137_v37, %v133_v32 }
 0x122   :  { %v6254_v39 = vpack.c.bf16 %v151_v35, %v150_v34  ;;  %887 = vrot.lane.b32.xlu1 %v875_v36, %s6164_s2  ;;  %879 = vrot.lane.b32.xlu0 %v875_v36, %s6165_s28 }
 0x124   :  { %v190_v17 = vshrl.u32 %v6254_v39, 16 }
 0x125   :  { %v141_v40 = vpop.f32.mrb[4].mxu0 }
 0x126   :  { %891 = vrot.lane.b32.xlu1 %v875_v36, %s6166_s29  ;;  %883 = vrot.lane.b32.xlu0 %v875_v36, %s6167_s30  ;;  %v152_v41 = vmul.f32 0.35355338, %v141_v40  ;;  %v143_v42 = vpop.f32.mrb[5].mxu0 }
 0x127   :  { %v145_v43 = vpop.f32.mrb[6].mxu0 }
 0x128   :  { %v153_v44 = vmul.f32 0.35355338, %v145_v43  ;;  %v876_v45 = vpack.c.bf16 %v145_v43, %v141_v40  ;;  %v147_v46 = vpop.f32.mrb[7].mxu0 }
 0x129   :  { %v6260_v47 = vpack.c.bf16 %v147_v46, %v143_v42  ;;  %v6346_v42 = vsub.s32 %v286_v22, %v256_v8 }
 0x12a   :  { %899 = vrot.lane.b32.xlu1 %v875_v36, %s6168_s5  ;;  %895 = vrot.lane.b32.xlu0 %v875_v36, %s6169_s6  ;;  %v6264_v48 = vpack.c.bf16 %v153_v44, %v152_v41 }
 0x12e   :  { %903 = vrot.lane.b32.xlu0 %v875_v36, %s6170_s7  ;;  %881 = vrot.lane.b32.xlu1 %v876_v45, %s6165_s28 }
 0x132   :  { %885 = vrot.lane.b32.xlu0 %v876_v45, %s6167_s30  ;;  %889 = vrot.lane.b32.xlu1 %v876_v45, %s6164_s2 }
 0x136   :  { %893 = vrot.lane.b32.xlu0 %v876_v45, %s6166_s29  ;;  %897 = vrot.lane.b32.xlu1 %v876_v45, %s6169_s6 }
 0x13a   :  { %901 = vrot.lane.b32.xlu0 %v876_v45, %s6168_s5  ;;  %905 = vrot.lane.b32.xlu1 %v876_v45, %s6170_s7 }
 0x13e   :  { %158 = vrot.lane.b32.xlu0 %v6254_v39, %s6165_s28  ;;  %162 = vrot.lane.b32.xlu1 %v6254_v39, %s6167_s30 }
 0x142   :  { %166 = vrot.lane.b32.xlu0 %v6254_v39, %s6164_s2  ;;  %170 = vrot.lane.b32.xlu1 %v6254_v39, %s6166_s29 }
 0x146   :  { %174 = vrot.lane.b32.xlu0 %v6254_v39, %s6169_s6  ;;  %178 = vrot.lane.b32.xlu1 %v6254_v39, %s6168_s5 }
 0x14a   :  { %182 = vrot.lane.b32.xlu0 %v6254_v39, %s6170_s7  ;;  %907 = vrot.lane.b32.xlu1 %v875_v36, %s6171_s8 }
 0x14e   :  { %909 = vrot.lane.b32.xlu0 %v876_v45, %s6171_s8  ;;  %160 = vrot.lane.b32.xlu1 %v6264_v48, %s6165_s28 }
 0x152   :  { %164 = vrot.lane.b32.xlu0 %v6264_v48, %s6167_s30  ;;  %168 = vrot.lane.b32.xlu1 %v6264_v48, %s6164_s2 }
 0x156   :  { %172 = vrot.lane.b32.xlu0 %v6264_v48, %s6166_s29  ;;  %176 = vrot.lane.b32.xlu1 %v6264_v48, %s6169_s6 }
 0x15a   :  { %180 = vrot.lane.b32.xlu0 %v6264_v48, %s6168_s5  ;;  %184 = vrot.lane.b32.xlu1 %v6264_v48, %s6170_s7 }
 0x194   :  { %v888_v49 = vpop.permute.xlu1 %887  ;;  %v880_v50 = vpop.permute.xlu0 %879 }
 0x195   :  { %911 = vrot.lane.b32.xlu0 %v880_v50, %s6171_s8 }
 0x198   :  { %v892_v51 = vpop.permute.xlu1 %891  ;;  %v884_v52 = vpop.permute.xlu0 %883 }
 0x199   :  { %919 = vrot.lane.b32.xlu0 %v888_v49, %s6171_s8  ;;  %915 = vrot.lane.b32.xlu1 %v884_v52, %s6171_s8 }
 0x19c   :  { %v900_v53 = vpop.permute.xlu1 %899  ;;  %v896_v54 = vpop.permute.xlu0 %895 }
 0x19d   :  { %927 = vrot.lane.b32.xlu0 %v896_v54, %s6171_s8  ;;  %923 = vrot.lane.b32.xlu1 %v892_v51, %s6171_s8  ;;  %v222_v51 = vshrl.u32 %v6264_v48, 16 }
 0x1a0   :  { %v904_v55 = vpop.permute.xlu0 %903  ;;  %v882_v56 = vpop.permute.xlu1 %881 }
 0x1a1   :  { %935 = vrot.lane.b32.xlu0 %v904_v55, %s6171_s8  ;;  %931 = vrot.lane.b32.xlu1 %v900_v53, %s6171_s8 }
 0x1a4   :  { %v886_v57 = vpop.permute.xlu0 %885  ;;  %v890_v58 = vpop.permute.xlu1 %889 }
 0x1a5   :  { %917 = vrot.lane.b32.xlu0 %v886_v57, %s6171_s8  ;;  %913 = vrot.lane.b32.xlu1 %v882_v56, %s6171_s8 }
 0x1a8   :  { %v894_v59 = vpop.permute.xlu0 %893  ;;  %v898_v60 = vpop.permute.xlu1 %897 }
 0x1a9   :  { %925 = vrot.lane.b32.xlu0 %v894_v59, %s6171_s8  ;;  %921 = vrot.lane.b32.xlu1 %v890_v58, %s6171_s8 }
 0x1ac   :  { %v902_v61 = vpop.permute.xlu0 %901  ;;  %v906_v62 = vpop.permute.xlu1 %905 }
 0x1ad   :  { %933 = vrot.lane.b32.xlu0 %v902_v61, %s6171_s8  ;;  %929 = vrot.lane.b32.xlu1 %v898_v60, %s6171_s8 }
 0x1b0   :  { %v159_v63 = vpop.permute.xlu0 %158  ;;  %v163_v0 = vpop.permute.xlu1 %162 }
 0x1b1   :  { %1603 = vrot.lane.b32.xlu0 %v6252_v38, %s6167_s30  ;;  %937 = vrot.lane.b32.xlu1 %v906_v62, %s6171_s8  ;;  %v191_v13 = vshrl.u32 %v159_v63, 16  ;;  %v188_v18 = vpack.i.b16 %v159_v63, %v6254_v39  ;;  %v198_v26 = vshrl.u32 %v163_v0, 16 }
 0x1b3   :  { %v192_v25 = vpack.i.b16 %v191_v13, %v190_v17 }
 0x1b4   :  { %v167_v2 = vpop.permute.xlu0 %166  ;;  %v171_v3 = vpop.permute.xlu1 %170 }
 0x1b5   :  { %1615 = vrot.lane.b32.xlu0 %v6252_v38, %s6169_s6  ;;  %1599 = vrot.lane.b32.xlu1 %v6252_v38, %s6165_s28  ;;  %v206_v14 = vshrl.u32 %v171_v3, 16  ;;  %v199_v19 = vshrl.u32 %v167_v2, 16  ;;  %v196_v29 = vpack.i.b16 %v167_v2, %v163_v0 }
 0x1b7   :  { %v200_v33 = vpack.i.b16 %v199_v19, %v198_v26 }
 0x1b8   :  { %v175_v9 = vpop.permute.xlu0 %174  ;;  %v179_v10 = vpop.permute.xlu1 %178 }
 0x1b9   :  { %v204_v15 = vpack.i.b16 %v175_v9, %v171_v3  ;;  %v207_v16 = vshrl.u32 %v175_v9, 16  ;;  %1623 = vrot.lane.b32.xlu0 %v6252_v38, %s6170_s7  ;;  %1607 = vrot.lane.b32.xlu1 %v6252_v38, %s6164_s2  ;;  %v214_v30 = vshrl.u32 %v179_v10, 16 }
 0x1bb   :  { %v208_v20 = vpack.i.b16 %v207_v16, %v206_v14  ;;  %v250_v27 = vcombine.low %v188_v18, %v204_v15  ;;  %v251_v28 = vcombine.high %v188_v18, %v204_v15 }
 0x1bc   :  { %v183_v23 = vpop.permute.xlu0 %182  ;;  %v6334_v24 = vpop.permute.xlu1 %907 }
 0x1bd   :  { %1611 = vrot.lane.b32.xlu1 %v6252_v38, %s6166_s29  ;;  %v212_v31 = vpack.i.b16 %v183_v23, %v179_v10  ;;  %v215_v32 = vshrl.u32 %v183_v23, 16  ;;  %1605 = vrot.lane.b32.xlu0 %v6260_v47, %s6167_s30  ;;  %v318_v34 = vcombine.low %v192_v25, %v208_v20  ;;  %v258_v39 = vrot.slane %v250_v27, %v6332_v21 }
 0x1be   :  { %v265_v40 = vrot.slane %v251_v28, %v6332_v21  ;;  %v319_v41 = vcombine.high %v192_v25, %v208_v20 }
 0x1bf   :  { %v216_v35 = vpack.i.b16 %v215_v32, %v214_v30  ;;  %v266_v36 = vcombine.low %v196_v29, %v212_v31  ;;  %v267_v37 = vcombine.high %v196_v29, %v212_v31  ;;  %v326_v50 = vrot.slane %v318_v34, %v6332_v21 }
 0x1c0   :  { %v6352_v49 = vpop.permute.xlu1 %160  ;;  %v6358_v56 = vpop.permute.xlu0 %909  ;;  %v333_v57 = vrot.slane %v319_v41, %v6332_v21 }
 0x1c1   :  { %1619 = vrot.lane.b32.xlu1 %v6252_v38, %s6168_s5  ;;  %v274_v43 = vrot.slane %v266_v36, %v6332_v21  ;;  %v281_v44 = vrot.slane %v267_v37, %v6332_v21  ;;  %v334_v45 = vcombine.low %v200_v33, %v216_v35  ;;  %v335_v46 = vcombine.high %v200_v33, %v216_v35 }
 0x1c2   :  { %1613 = vrot.lane.b32.xlu0 %v6260_v47, %s6166_s29  ;;  %v6365_v60 = vpack.i.b16 %v6352_v49, %v6264_v48 }
 0x1c3   :  { %v282_v52 = vcombine.low %v258_v39, %v274_v43  ;;  %v283_v53 = vcombine.high %v258_v39, %v274_v43  ;;  %v298_v54 = vcombine.low %v265_v40, %v281_v44  ;;  %v299_v55 = vcombine.high %v265_v40, %v281_v44 }
 0x1c4   :  { %v342_v58 = vrot.slane %v334_v45, %v6332_v21  ;;  %v349_v59 = vrot.slane %v335_v46, %v6332_v21  ;;  %v6385_v18 = vpop.permute.xlu0 %164  ;;  %v6387_v19 = vpop.permute.xlu1 %168 }
 0x1c5   :  { %1601 = vrot.lane.b32.xlu1 %v6260_v47, %s6165_s28  ;;  %v290_v61 = vrot.slane %v282_v52, %v6346_v42  ;;  %v297_v62 = vrot.slane %v283_v53, %v6346_v42  ;;  %v306_v63 = vrot.slane %v298_v54, %v6346_v42  ;;  %v313_v0 = vrot.slane %v299_v55, %v6346_v42 }
 0x1c6   :  { %1621 = vrot.lane.b32.xlu0 %v6260_v47, %s6168_s5  ;;  %v350_v2 = vcombine.low %v326_v50, %v342_v58  ;;  %v351_v3 = vcombine.high %v326_v50, %v342_v58  ;;  %v366_v4 = vcombine.low %v333_v57, %v349_v59  ;;  %v367_v5 = vcombine.high %v333_v57, %v349_v59 }
 0x1c7   :  { %v522_v6 = vcombine.low %v290_v61, %v297_v62  ;;  %v5473_v7 = vcombine.high %v290_v61, %v297_v62  ;;  %v538_v8 = vcombine.low %v306_v63, %v313_v0  ;;  %v5474_v9 = vcombine.high %v306_v63, %v313_v0 }
 0x1c8   :  { %v358_v10 = vrot.slane %v350_v2, %v6346_v42  ;;  %v365_v11 = vrot.slane %v351_v3, %v6346_v42  ;;  %v374_v12 = vrot.slane %v366_v4, %v6346_v42  ;;  %v381_v13 = vrot.slane %v367_v5, %v6346_v42  ;;  %v173_v52 = vpop.permute.xlu0 %172  ;;  %v177_v53 = vpop.permute.xlu1 %176 }
 0x1c9   :  { %1609 = vrot.lane.b32.xlu1 %v6260_v47, %s6164_s2  ;;  %v529_v14 = vrot.slane %v522_v6, %v6332_v21  ;;  %v537_v15 = vrot.slane %v5473_v7, %v6332_v21  ;;  %v545_v16 = vrot.slane %v538_v8, %v6332_v21  ;;  %v553_v17 = vrot.slane %v5474_v9, %v6332_v21 }
 0x1ca   :  { %v590_v20 = vcombine.low %v358_v10, %v365_v11  ;;  %v5475_v22 = vcombine.high %v358_v10, %v365_v11  ;;  %v606_v23 = vcombine.low %v374_v12, %v381_v13  ;;  %v5476_v25 = vcombine.high %v374_v12, %v381_v13 }
 0x1cb   :  { %v554_v26 = vcombine.low %v529_v14, %v537_v15  ;;  %v555_v27 = vcombine.high %v529_v14, %v537_v15  ;;  %v570_v28 = vcombine.low %v545_v16, %v553_v17  ;;  %v571_v29 = vcombine.high %v545_v16, %v553_v17 }
 0x1cc   :  { %v597_v30 = vrot.slane %v590_v20, %v6332_v21  ;;  %v605_v31 = vrot.slane %v5475_v22, %v6332_v21  ;;  %v613_v32 = vrot.slane %v606_v23, %v6332_v21  ;;  %v621_v33 = vrot.slane %v5476_v25, %v6332_v21  ;;  %v181_v17 = vpop.permute.xlu0 %180  ;;  %v185_v20 = vpop.permute.xlu1 %184 }
 0x1cd   :  { %1617 = vrot.lane.b32.xlu1 %v6260_v47, %s6169_s6  ;;  %v562_v34 = vrot.slane %v554_v26, %v6346_v42  ;;  %v569_v35 = vrot.slane %v555_v27, %v6346_v42  ;;  %v578_v36 = vrot.slane %v570_v28, %v6346_v42  ;;  %v585_v37 = vrot.slane %v571_v29, %v6346_v42 }
 0x1ce   :  { %v622_v39 = vcombine.low %v597_v30, %v605_v31  ;;  %v623_v40 = vcombine.high %v597_v30, %v605_v31  ;;  %v638_v41 = vcombine.low %v613_v32, %v621_v33  ;;  %v639_v43 = vcombine.high %v613_v32, %v621_v33 }
 0x1cf   :  { %v586_v44 = vcombine.low %v562_v34, %v578_v36  ;;  %v587_v45 = vcombine.high %v562_v34, %v578_v36  ;;  %v588_v46 = vcombine.low %v569_v35, %v585_v37  ;;  %v589_v50 = vcombine.high %v569_v35, %v585_v37 }
 0x1d0   :  { %v630_v54 = vrot.slane %v622_v39, %v6346_v42  ;;  %v637_v55 = vrot.slane %v623_v40, %v6346_v42  ;;  %v646_v57 = vrot.slane %v638_v41, %v6346_v42  ;;  %v653_v58 = vrot.slane %v639_v43, %v6346_v42 }
 0x1d1   :  { %v798_v59 = vshrl.u32 %v586_v44, 16  ;;  %v806_v61 = vshrl.u32 %v587_v45, 16  ;;  %v814_v62 = vshrl.u32 %v588_v46, 16  ;;  %v223_v63 = vshrl.u32 %v6352_v49, 16 }
 0x1d2   :  { %v654_v0 = vcombine.low %v630_v54, %v646_v57  ;;  %v655_v2 = vcombine.high %v630_v54, %v646_v57  ;;  %v656_v3 = vcombine.low %v637_v55, %v653_v58  ;;  %v657_v4 = vcombine.high %v637_v55, %v653_v58 }
 0x1d3   :  { %v822_v5 = vshrl.u32 %v589_v50, 16  ;;  %v238_v6 = vshrl.u32 %v173_v52, 16  ;;  %v236_v7 = vpack.i.b16 %v177_v53, %v173_v52  ;;  %v239_v8 = vshrl.u32 %v177_v53, 16 }
 0x1d4   :  { %v796_v9 = vpack.i.b16 %v654_v0, %v586_v44  ;;  %v799_v10 = vshrl.u32 %v654_v0, 16  ;;  %v804_v11 = vpack.i.b16 %v655_v2, %v587_v45  ;;  %v807_v12 = vshrl.u32 %v655_v2, 16 }
 0x1d5   :  { %v812_v13 = vpack.i.b16 %v656_v3, %v588_v46  ;;  %v815_v14 = vshrl.u32 %v656_v3, 16  ;;  %v820_v15 = vpack.i.b16 %v657_v4, %v589_v50  ;;  %v823_v16 = vshrl.u32 %v657_v4, 16 }
 0x1d6   :  { %v800_v22 = vpack.i.b16 %v799_v10, %v798_v59  ;;  %v808_v49 = vpack.i.b16 %v807_v12, %v806_v61  ;;  %859 = vst.msk [vmem:[#allocation2] sm:$0xff] %vm858_vm2, %v796_v9  ;;  %863 = vst.msk [vmem:[#allocation2 + $0x20] sm:$0xff] %vm858_vm2, %v804_v11  ;;  %v230_v23 = vshrl.u32 %v6385_v18, 16  ;;  %v228_v25 = vpack.i.b16 %v6387_v19, %v6385_v18 }
 0x1d7   :  { %v816_v26 = vpack.i.b16 %v815_v14, %v814_v62  ;;  %v824_v27 = vpack.i.b16 %v823_v16, %v822_v5  ;;  %867 = vst.msk [vmem:[#allocation2 + $0x40] sm:$0xff] %vm858_vm2, %v812_v13  ;;  %871 = vst.msk [vmem:[#allocation2 + $0x60] sm:$0xff] %vm858_vm2, %v820_v15  ;;  %v231_v28 = vshrl.u32 %v6387_v19, 16  ;;  %v240_v29 = vpack.i.b16 %v239_v8, %v238_v6 }
 0x1d8   :  { %861 = vst.msk [vmem:[#allocation2 + $0x10] sm:$0xff] %vm858_vm2, %v800_v22  ;;  %865 = vst.msk [vmem:[#allocation2 + $0x30] sm:$0xff] %vm858_vm2, %v808_v49  ;;  %v386_v30 = vcombine.low %v6365_v60, %v236_v7  ;;  %v387_v31 = vcombine.high %v6365_v60, %v236_v7  ;;  %v246_v32 = vshrl.u32 %v181_v17, 16  ;;  %v244_v33 = vpack.i.b16 %v185_v20, %v181_v17 }
 0x1d9   :  { %869 = vst.msk [vmem:[#allocation2 + $0x50] sm:$0xff] %vm858_vm2, %v816_v26  ;;  %873 = vst.msk [vmem:[#allocation2 + $0x70] sm:$0xff] %vm858_vm2, %v824_v27  ;;  %v224_v18 = vpack.i.b16 %v223_v63, %v222_v51  ;;  %v247_v34 = vshrl.u32 %v185_v20, 16  ;;  %v232_v36 = vpack.i.b16 %v231_v28, %v230_v23 }
 0x1da   :  { %v402_v19 = vcombine.low %v228_v25, %v244_v33  ;;  %v403_v35 = vcombine.high %v228_v25, %v244_v33  ;;  %v394_v41 = vrot.slane %v386_v30, %v6332_v21  ;;  %v401_v60 = vrot.slane %v387_v31, %v6332_v21 }
 0x1db   :  { %v454_v37 = vcombine.low %v224_v18, %v240_v29  ;;  %v455_v39 = vcombine.high %v224_v18, %v240_v29  ;;  %v248_v40 = vpack.i.b16 %v247_v34, %v246_v32 }
 0x1dc   :  { %v410_v43 = vrot.slane %v402_v19, %v6332_v21  ;;  %v417_v44 = vrot.slane %v403_v35, %v6332_v21 }
 0x1dd   :  { %v470_v45 = vcombine.low %v232_v36, %v248_v40  ;;  %v471_v46 = vcombine.high %v232_v36, %v248_v40  ;;  %v462_v53 = vrot.slane %v454_v37, %v6332_v21  ;;  %v469_v54 = vrot.slane %v455_v39, %v6332_v21 }
 0x1de   :  { %v418_v50 = vcombine.low %v394_v41, %v410_v43  ;;  %v419_v48 = vcombine.high %v394_v41, %v410_v43  ;;  %v434_v51 = vcombine.low %v401_v60, %v417_v44  ;;  %v435_v52 = vcombine.high %v401_v60, %v417_v44 }
 0x1df   :  { %v478_v55 = vrot.slane %v470_v45, %v6332_v21  ;;  %v485_v57 = vrot.slane %v471_v46, %v6332_v21 }
 0x1e0   :  { %v426_v58 = vrot.slane %v418_v50, %v6346_v42  ;;  %v433_v59 = vrot.slane %v419_v48, %v6346_v42  ;;  %v442_v61 = vrot.slane %v434_v51, %v6346_v42  ;;  %v449_v62 = vrot.slane %v435_v52, %v6346_v42 }
 0x1e1   :  { %v486_v63 = vcombine.low %v462_v53, %v478_v55  ;;  %v487_v0 = vcombine.high %v462_v53, %v478_v55  ;;  %v502_v2 = vcombine.low %v469_v54, %v485_v57  ;;  %v503_v3 = vcombine.high %v469_v54, %v485_v57 }
 0x1e2   :  { %v658_v4 = vcombine.low %v426_v58, %v433_v59  ;;  %v5477_v5 = vcombine.high %v426_v58, %v433_v59  ;;  %v674_v6 = vcombine.low %v442_v61, %v449_v62  ;;  %v5478_v7 = vcombine.high %v442_v61, %v449_v62 }
 0x1e3   :  { %v494_v8 = vrot.slane %v486_v63, %v6346_v42  ;;  %v501_v9 = vrot.slane %v487_v0, %v6346_v42  ;;  %v510_v10 = vrot.slane %v502_v2, %v6346_v42  ;;  %v517_v11 = vrot.slane %v503_v3, %v6346_v42 }
 0x1e4   :  { %v665_v12 = vrot.slane %v658_v4, %v6332_v21  ;;  %v673_v13 = vrot.slane %v5477_v5, %v6332_v21  ;;  %v681_v14 = vrot.slane %v674_v6, %v6332_v21  ;;  %v689_v15 = vrot.slane %v5478_v7, %v6332_v21 }
 0x1e5   :  { %v726_v16 = vcombine.low %v494_v8, %v501_v9  ;;  %v5479_v17 = vcombine.high %v494_v8, %v501_v9  ;;  %v742_v20 = vcombine.low %v510_v10, %v517_v11  ;;  %v5480_v22 = vcombine.high %v510_v10, %v517_v11 }
 0x1e6   :  { %v690_v49 = vcombine.low %v665_v12, %v673_v13  ;;  %v691_v23 = vcombine.high %v665_v12, %v673_v13  ;;  %v706_v25 = vcombine.low %v681_v14, %v689_v15  ;;  %v707_v26 = vcombine.high %v681_v14, %v689_v15 }
 0x1e7   :  { %v733_v27 = vrot.slane %v726_v16, %v6332_v21  ;;  %v741_v28 = vrot.slane %v5479_v17, %v6332_v21  ;;  %v749_v29 = vrot.slane %v742_v20, %v6332_v21  ;;  %v757_v30 = vrot.slane %v5480_v22, %v6332_v21 }
 0x1e8   :  { %v698_v31 = vrot.slane %v690_v49, %v6346_v42  ;;  %v705_v32 = vrot.slane %v691_v23, %v6346_v42  ;;  %v714_v33 = vrot.slane %v706_v25, %v6346_v42  ;;  %v721_v18 = vrot.slane %v707_v26, %v6346_v42 }
 0x1e9   :  { %v758_v34 = vcombine.low %v733_v27, %v741_v28  ;;  %v759_v19 = vcombine.high %v733_v27, %v741_v28  ;;  %v774_v35 = vcombine.low %v749_v29, %v757_v30  ;;  %v775_v36 = vcombine.high %v749_v29, %v757_v30 }
 0x1ea   :  { %v722_v37 = vcombine.low %v698_v31, %v714_v33  ;;  %v723_v39 = vcombine.high %v698_v31, %v714_v33  ;;  %v724_v40 = vcombine.low %v705_v32, %v721_v18  ;;  %v725_v41 = vcombine.high %v705_v32, %v721_v18 }
 0x1eb   :  { %v766_v60 = vrot.slane %v758_v34, %v6346_v42  ;;  %v773_v43 = vrot.slane %v759_v19, %v6346_v42  ;;  %v782_v44 = vrot.slane %v774_v35, %v6346_v42  ;;  %v789_v45 = vrot.slane %v775_v36, %v6346_v42 }
 0x1ec   :  { %v830_v52 = vshrl.u32 %v722_v37, 16  ;;  %v838_v53 = vshrl.u32 %v723_v39, 16  ;;  %v846_v54 = vshrl.u32 %v724_v40, 16  ;;  %v854_v55 = vshrl.u32 %v725_v41, 16 }
 0x1ed   :  { %v790_v46 = vcombine.low %v766_v60, %v782_v44  ;;  %v791_v50 = vcombine.high %v766_v60, %v782_v44  ;;  %v792_v48 = vcombine.low %v773_v43, %v789_v45  ;;  %v793_v51 = vcombine.high %v773_v43, %v789_v45 }
 0x1ee   :  { %v943_v33 = vshrl.u32 %v6334_v24, 16 }
 0x1ef   :  { %v828_v57 = vpack.i.b16 %v790_v46, %v722_v37  ;;  %v831_v58 = vshrl.u32 %v790_v46, 16  ;;  %v836_v59 = vpack.i.b16 %v791_v50, %v723_v39  ;;  %v839_v61 = vshrl.u32 %v791_v50, 16 }
 0x1f0   :  { %v844_v62 = vpack.i.b16 %v792_v48, %v724_v40  ;;  %v847_v63 = vshrl.u32 %v792_v48, 16  ;;  %v852_v0 = vpack.i.b16 %v793_v51, %v725_v41  ;;  %v855_v2 = vshrl.u32 %v793_v51, 16 }
 0x1f1   :  { %v832_v3 = vpack.i.b16 %v831_v58, %v830_v52  ;;  %v840_v4 = vpack.i.b16 %v839_v61, %v838_v53  ;;  %860 = vst.msk [vmem:[#allocation2 + $0x8] sm:$0xff] %vm858_vm2, %v828_v57  ;;  %864 = vst.msk [vmem:[#allocation2 + $0x28] sm:$0xff] %vm858_vm2, %v836_v59 }
 0x1f2   :  { %v848_v5 = vpack.i.b16 %v847_v63, %v846_v54  ;;  %v856_v6 = vpack.i.b16 %v855_v2, %v854_v55  ;;  %868 = vst.msk [vmem:[#allocation2 + $0x48] sm:$0xff] %vm858_vm2, %v844_v62  ;;  %872 = vst.msk [vmem:[#allocation2 + $0x68] sm:$0xff] %vm858_vm2, %v852_v0 }
 0x1f3   :  { %862 = vst.msk [vmem:[#allocation2 + $0x18] sm:$0xff] %vm858_vm2, %v832_v3  ;;  %866 = vst.msk [vmem:[#allocation2 + $0x38] sm:$0xff] %vm858_vm2, %v840_v4 }
 0x1f4   :  { %870 = vst.msk [vmem:[#allocation2 + $0x58] sm:$0xff] %vm858_vm2, %v848_v5  ;;  %874 = vst.msk [vmem:[#allocation2 + $0x78] sm:$0xff] %vm858_vm2, %v856_v6 }
 0x207   :  { %v912_v7 = vpop.permute.xlu0 %911 }
 0x208   :  { %v941_v26 = vpack.i.b16 %v912_v7, %v6334_v24  ;;  %v944_v29 = vshrl.u32 %v912_v7, 16 }
 0x20a   :  { %v945_v37 = vpack.i.b16 %v944_v29, %v943_v33 }
 0x20b   :  { %v920_v8 = vpop.permute.xlu0 %919  ;;  %v916_v9 = vpop.permute.xlu1 %915 }
 0x20c   :  { %v949_v14 = vpack.i.b16 %v920_v8, %v916_v9  ;;  %v952_v22 = vshrl.u32 %v920_v8, 16  ;;  %v951_v49 = vshrl.u32 %v916_v9, 16 }
 0x20e   :  { %v953_v18 = vpack.i.b16 %v952_v22, %v951_v49 }
 0x20f   :  { %v928_v10 = vpop.permute.xlu0 %927  ;;  %v924_v11 = vpop.permute.xlu1 %923 }
 0x210   :  { %v957_v15 = vpack.i.b16 %v928_v10, %v924_v11  ;;  %v960_v23 = vshrl.u32 %v928_v10, 16  ;;  %v959_v25 = vshrl.u32 %v924_v11, 16 }
 0x212   :  { %v1003_v32 = vcombine.low %v941_v26, %v957_v15  ;;  %v961_v34 = vpack.i.b16 %v960_v23, %v959_v25  ;;  %v1004_v19 = vcombine.high %v941_v26, %v957_v15 }
 0x213   :  { %v936_v12 = vpop.permute.xlu0 %935  ;;  %v932_v13 = vpop.permute.xlu1 %931 }
 0x214   :  { %v968_v16 = vshrl.u32 %v936_v12, 16  ;;  %v965_v17 = vpack.i.b16 %v936_v12, %v932_v13  ;;  %v967_v20 = vshrl.u32 %v932_v13, 16  ;;  %v1011_v60 = vrot.slane %v1003_v32, %v6332_v21 }
 0x215   :  { %v1018_v43 = vrot.slane %v1004_v19, %v6332_v21  ;;  %v1071_v44 = vcombine.low %v945_v37, %v961_v34  ;;  %v1072_v52 = vcombine.high %v945_v37, %v961_v34 }
 0x216   :  { %v1019_v27 = vcombine.low %v949_v14, %v965_v17  ;;  %v969_v30 = vpack.i.b16 %v968_v16, %v967_v20  ;;  %v1020_v31 = vcombine.high %v949_v14, %v965_v17 }
 0x217   :  { %v6461_v28 = vpop.permute.xlu1 %913  ;;  %v918_v41 = vpop.permute.xlu0 %917  ;;  %v1079_v53 = vrot.slane %v1071_v44, %v6332_v21  ;;  %v1086_v2 = vrot.slane %v1072_v52, %v6332_v21 }
 0x218   :  { %v1027_v35 = vrot.slane %v1019_v27, %v6332_v21  ;;  %v1034_v39 = vrot.slane %v1020_v31, %v6332_v21  ;;  %v1087_v40 = vcombine.low %v953_v18, %v969_v30  ;;  %v1088_v54 = vcombine.high %v953_v18, %v969_v30 }
 0x219   :  { %v983_v4 = vshrl.u32 %v918_v41, 16  ;;  %v973_v49 = vpack.i.b16 %v6461_v28, %v6358_v56  ;;  %v976_v23 = vshrl.u32 %v6461_v28, 16 }
 0x21a   :  { %v1035_v45 = vcombine.low %v1011_v60, %v1027_v35  ;;  %v1036_v46 = vcombine.high %v1011_v60, %v1027_v35  ;;  %v1051_v24 = vcombine.low %v1018_v43, %v1034_v39  ;;  %v1052_v48 = vcombine.high %v1018_v43, %v1034_v39 }
 0x21b   :  { %v922_v36 = vpop.permute.xlu1 %921  ;;  %v1095_v51 = vrot.slane %v1087_v40, %v6332_v21  ;;  %v926_v55 = vpop.permute.xlu0 %925  ;;  %v1102_v3 = vrot.slane %v1088_v54, %v6332_v21  ;;  %v975_v35 = vshrl.u32 %v6358_v56, 16 }
 0x21c   :  { %v1043_v57 = vrot.slane %v1035_v45, %v6346_v42  ;;  %v1050_v58 = vrot.slane %v1036_v46, %v6346_v42  ;;  %v1059_v61 = vrot.slane %v1051_v24, %v6346_v42  ;;  %v1066_v62 = vrot.slane %v1052_v48, %v6346_v42 }
 0x21d   :  { %v1103_v63 = vcombine.low %v1079_v53, %v1095_v51  ;;  %v1104_v0 = vcombine.high %v1079_v53, %v1095_v51  ;;  %v981_v5 = vpack.i.b16 %v922_v36, %v918_v41  ;;  %v984_v6 = vshrl.u32 %v922_v36, 16 }
 0x21e   :  { %v1275_v8 = vcombine.low %v1043_v57, %v1050_v58  ;;  %v5481_v12 = vcombine.high %v1043_v57, %v1050_v58  ;;  %v1291_v13 = vcombine.low %v1059_v61, %v1066_v62  ;;  %v5482_v17 = vcombine.high %v1059_v61, %v1066_v62 }
 0x21f   :  { %v930_v50 = vpop.permute.xlu1 %929  ;;  %v1111_v9 = vrot.slane %v1103_v63, %v6346_v42  ;;  %v1118_v10 = vrot.slane %v1104_v0, %v6346_v42  ;;  %v934_v11 = vpop.permute.xlu0 %933  ;;  %v1119_v20 = vcombine.low %v1086_v2, %v1102_v3  ;;  %v1120_v22 = vcombine.high %v1086_v2, %v1102_v3 }
 0x220   :  { %v999_v14 = vshrl.u32 %v934_v11, 16  ;;  %v991_v25 = vshrl.u32 %v926_v55, 16  ;;  %v989_v26 = vpack.i.b16 %v930_v50, %v926_v55  ;;  %v992_v27 = vshrl.u32 %v930_v50, 16 }
 0x221   :  { %v985_v29 = vpack.i.b16 %v984_v6, %v983_v4  ;;  %v6484_v30 = vrot.slane %v1275_v8, %v6332_v21  ;;  %v6487_v31 = vrot.slane %v5481_v12, %v6332_v21  ;;  %v6490_v32 = vrot.slane %v1291_v13, %v6332_v21 }
 0x222   :  { %v6495_v19 = vrot.slane %v5482_v17, %v6332_v21  ;;  %v1343_v28 = vcombine.low %v1111_v9, %v1118_v10  ;;  %v1127_v36 = vrot.slane %v1119_v20, %v6346_v42  ;;  %v1134_v37 = vrot.slane %v1120_v22, %v6346_v42 }
 0x223   :  { %v938_v59 = vpop.permute.xlu1 %937  ;;  %v993_v39 = vpack.i.b16 %v992_v27, %v991_v25  ;;  %v1139_v40 = vcombine.low %v973_v49, %v989_v26  ;;  %v1140_v41 = vcombine.high %v973_v49, %v989_v26  ;;  %v6500_v60 = vpop.permute.xlu0 %1603  ;;  %v977_v43 = vpack.i.b16 %v976_v23, %v975_v35 }
 0x224   :  { %v997_v15 = vpack.i.b16 %v938_v59, %v934_v11  ;;  %v1000_v16 = vshrl.u32 %v938_v59, 16  ;;  %v1307_v45 = vcombine.low %v6484_v30, %v6487_v31  ;;  %v1323_v56 = vcombine.low %v6490_v32, %v6495_v19 }
 0x225   :  { %v6508_v24 = vrot.slane %v1343_v28, %v6332_v21  ;;  %v5483_v51 = vcombine.high %v1111_v9, %v1118_v10  ;;  %v1359_v52 = vcombine.low %v1127_v36, %v1134_v37  ;;  %v5484_v53 = vcombine.high %v1127_v36, %v1134_v37 }
 0x226   :  { %v1001_v33 = vpack.i.b16 %v1000_v16, %v999_v14  ;;  %v1155_v18 = vcombine.low %v981_v5, %v997_v15  ;;  %v1156_v44 = vcombine.high %v981_v5, %v997_v15  ;;  %v1147_v54 = vrot.slane %v1139_v40, %v6332_v21 }
 0x227   :  { %v6476_v7 = vpop.permute.xlu1 %1599  ;;  %v1154_v55 = vrot.slane %v1140_v41, %v6332_v21  ;;  %v1207_v57 = vcombine.low %v977_v43, %v993_v39  ;;  %v1208_v58 = vcombine.high %v977_v43, %v993_v39  ;;  %v6516_v62 = vrot.slane %v5483_v51, %v6332_v21  ;;  %v1616_v5 = vpop.permute.xlu0 %1615 }
 0x228   :  { %v1163_v46 = vrot.slane %v1155_v18, %v6332_v21  ;;  %v1223_v50 = vcombine.low %v985_v29, %v1001_v33  ;;  %v1224_v48 = vcombine.high %v985_v29, %v1001_v33  ;;  %v1170_v61 = vrot.slane %v1156_v44, %v6332_v21 }
 0x229   :  { %v6519_v63 = vrot.slane %v1359_v52, %v6332_v21  ;;  %v6522_v0 = vrot.slane %v5484_v53, %v6332_v21  ;;  %v6526_v6 = vrot.slane %v1307_v45, %v6346_v42  ;;  %v6530_v9 = vrot.slane %v1323_v56, %v6346_v42 }
 0x22a   :  { %v1171_v2 = vcombine.low %v1147_v54, %v1163_v46  ;;  %v1172_v3 = vcombine.high %v1147_v54, %v1163_v46  ;;  %v1231_v4 = vrot.slane %v1223_v50, %v6332_v21  ;;  %v1238_v8 = vrot.slane %v1224_v48, %v6332_v21 }
 0x22b   :  { %v6492_v34 = vpop.permute.xlu1 %1607  ;;  %v1375_v10 = vcombine.low %v6508_v24, %v6516_v62  ;;  %v1391_v11 = vcombine.low %v6519_v63, %v6522_v0  ;;  %v1215_v12 = vrot.slane %v1207_v57, %v6332_v21  ;;  %v1222_v13 = vrot.slane %v1208_v58, %v6332_v21  ;;  %v1624_v37 = vpop.permute.xlu0 %1623 }
 0x22c   :  { %v1631_v14 = vshrl.u32 %v6252_v38, 16  ;;  %v1187_v15 = vcombine.low %v1154_v55, %v1170_v61  ;;  %v1188_v16 = vcombine.high %v1154_v55, %v1170_v61  ;;  %v1179_v22 = vrot.slane %v1171_v2, %v6346_v42 }
 0x22d   :  { %v6540_v17 = vrot.slane %v1375_v10, %v6346_v42  ;;  %v6543_v20 = vrot.slane %v1391_v11, %v6346_v42  ;;  %v1186_v49 = vrot.slane %v1172_v3, %v6346_v42  ;;  %v1239_v23 = vcombine.low %v1215_v12, %v1231_v4 }
 0x22e   :  { %v1240_v25 = vcombine.high %v1215_v12, %v1231_v4  ;;  %v1255_v27 = vcombine.low %v1222_v13, %v1238_v8  ;;  %v1256_v29 = vcombine.high %v1222_v13, %v1238_v8  ;;  %v6549_v33 = vcombine.low %v6526_v6, %v6530_v9 }
 0x22f   :  { %v6512_v59 = vpop.permute.xlu1 %1611  ;;  %v6553_v18 = vcombine.low %v6540_v17, %v6543_v20  ;;  %v1639_v28 = vshrl.u32 %v6500_v60, 16  ;;  %v1648_v35 = vshrl.u32 %v1616_v5, 16  ;;  %v1629_v36 = vpack.i.b16 %v6476_v7, %v6252_v38 }
 0x230   :  { %v1645_v39 = vpack.i.b16 %v1616_v5, %v6512_v59  ;;  %v1195_v40 = vrot.slane %v1187_v15, %v6346_v42  ;;  %v1202_v41 = vrot.slane %v1188_v16, %v6346_v42  ;;  %v1247_v45 = vrot.slane %v1239_v23, %v6346_v42 }
 0x231   :  { %v1549_v43 = vpack.i.b16 %v6553_v18, %v6549_v33  ;;  %v1254_v46 = vrot.slane %v1240_v25, %v6346_v42  ;;  %v1411_v50 = vcombine.low %v1179_v22, %v1186_v49  ;;  %v1632_v56 = vshrl.u32 %v6476_v7, 16  ;;  %v2312_v25 = vld [vmem:[#allocation2] sm:$0xff] }
 0x232   :  { %v1263_v38 = vrot.slane %v1255_v27, %v6346_v42  ;;  %v1270_v48 = vrot.slane %v1256_v29, %v6346_v42  ;;  %v1637_v51 = vpack.i.b16 %v6492_v34, %v6500_v60  ;;  %v1640_v53 = vshrl.u32 %v6492_v34, 16 }
 0x233   :  { %v1620_v26 = vpop.permute.xlu1 %1619  ;;  %v2332_v52 = vsel %vm858_vm2, %v1549_v43, 0  ;;  %v1647_v54 = vshrl.u32 %v6512_v59, 16  ;;  %v1691_v55 = vcombine.low %v1629_v36, %v1645_v39  ;;  %v5485_v58 = vcombine.high %v1179_v22, %v1186_v49 }
 0x234   :  { %v1653_v44 = vpack.i.b16 %v1624_v37, %v1620_v26  ;;  %5635 = vmatpush3.bf16.xpose.msra.mxu1 %v2332_v52  ;;  %v1655_v57 = vshrl.u32 %v1620_v26, 16  ;;  %v1427_v61 = vcombine.low %v1195_v40, %v1202_v41  ;;  %v5486_v3 = vcombine.high %v1195_v40, %v1202_v41 }
 0x235   :  { %5640 = vmatprep.subr.bf16.mxu1 %v7792_v1  ;;  %v1479_v4 = vcombine.low %v1247_v45, %v1254_v46  ;;  %v5487_v5 = vcombine.high %v1247_v45, %v1254_v46  ;;  %v1656_v8 = vshrl.u32 %v1624_v37, 16  ;;  %v1495_v60 = vcombine.low %v1263_v38, %v1270_v48 }
 0x236   :  { %v1707_v2 = vcombine.low %v1637_v51, %v1653_v44  ;;  %v1708_v7 = vcombine.high %v1637_v51, %v1653_v44  ;;  %v5488_v10 = vcombine.high %v1263_v38, %v1270_v48  ;;  %v1633_v11 = vpack.i.b16 %v1632_v56, %v1631_v14 }
 0x237   :  { %v1692_v12 = vcombine.high %v1629_v36, %v1645_v39  ;;  %v1641_v34 = vpack.i.b16 %v1640_v53, %v1639_v28  ;;  %v1649_v13 = vpack.i.b16 %v1648_v35, %v1647_v54  ;;  %v1699_v59 = vrot.slane %v1691_v55, %v6332_v21 }
 0x238   :  { %v1657_v15 = vpack.i.b16 %v1656_v8, %v1655_v57  ;;  %v1715_v16 = vrot.slane %v1707_v2, %v6332_v21  ;;  %v1722_v22 = vrot.slane %v1708_v7, %v6332_v21  ;;  %v6578_v49 = vrot.slane %v1411_v50, %v6332_v21 }
 0x239   :  { %v6581_v23 = vrot.slane %v5485_v58, %v6332_v21  ;;  %v6584_v26 = vrot.slane %v1427_v61, %v6332_v21  ;;  %v6587_v14 = vrot.slane %v5486_v3, %v6332_v21  ;;  %v6590_v27 = vrot.slane %v1479_v4, %v6332_v21 }
 0x23a   :  { %v6593_v29 = vrot.slane %v5487_v5, %v6332_v21  ;;  %v1706_v28 = vrot.slane %v1692_v12, %v6332_v21  ;;  %v6600_v36 = vrot.slane %v1495_v60, %v6332_v21  ;;  %v6603_v37 = vrot.slane %v5488_v10, %v6332_v21 }
 0x23b   :  { %5637 = vmatmul.mubr.msk.bf16.vlgmr.msra.gmra.mrb[0].mxu1 %vm858_vm2, %v2312_v25  ;;  %v1443_v35 = vcombine.low %v6578_v49, %v6581_v23  ;;  %v1759_v39 = vcombine.low %v1633_v11, %v1649_v13  ;;  %v1775_v40 = vcombine.low %v1641_v34, %v1657_v15  ;;  %v1459_v41 = vcombine.low %v6584_v26, %v6587_v14 }
 0x23c   :  { %v1511_v43 = vcombine.low %v6590_v27, %v6593_v29  ;;  %5642 = vmatprep.mubr.msk.bf16.mxu1 %vm6175_vm1, %v7792_v1  ;;  %v1723_v44 = vcombine.low %v1699_v59, %v1715_v16  ;;  %v1724_v45 = vcombine.high %v1699_v59, %v1715_v16  ;;  %v1527_v50 = vcombine.low %v6600_v36, %v6603_v37 }
 0x23d   :  { %v1451_v46 = vrot.slane %v1443_v35, %v6346_v42  ;;  %v1739_v56 = vcombine.low %v1706_v28, %v1722_v22  ;;  %v1776_v38 = vcombine.high %v1641_v34, %v1657_v15  ;;  %v1467_v48 = vrot.slane %v1459_v41, %v6346_v42 }
 0x23e   :  { %v1519_v51 = vrot.slane %v1511_v43, %v6346_v42  ;;  %v1740_v52 = vcombine.high %v1706_v28, %v1722_v22  ;;  %v1535_v53 = vrot.slane %v1527_v50, %v6346_v42  ;;  %v1760_v54 = vcombine.high %v1633_v11, %v1649_v13 }
 0x23f   :  { %v1783_v55 = vrot.slane %v1775_v40, %v6332_v21  ;;  %v1475_v57 = vcombine.low %v1451_v46, %v1467_v48  ;;  %v1731_v58 = vrot.slane %v1723_v44, %v6346_v42  ;;  %v1738_v61 = vrot.slane %v1724_v45, %v6346_v42 }
 0x240   :  { %v1543_v2 = vcombine.low %v1519_v51, %v1535_v53  ;;  %v1767_v7 = vrot.slane %v1759_v39, %v6332_v21  ;;  %v1747_v3 = vrot.slane %v1739_v56, %v6346_v42  ;;  %v1790_v4 = vrot.slane %v1776_v38, %v6332_v21 }
 0x241   :  { %v1754_v5 = vrot.slane %v1740_v52, %v6346_v42  ;;  %v1574_v60 = vshrl.u32 %v1475_v57, 16  ;;  %v1551_v11 = vshrl.u32 %v6553_v18, 16  ;;  %v1774_v12 = vrot.slane %v1760_v54, %v6332_v21 }
 0x242   :  { %v1573_v8 = vpack.i.b16 %v1543_v2, %v1475_v57  ;;  %v1575_v10 = vshrl.u32 %v1543_v2, 16  ;;  %v1791_v34 = vcombine.low %v1767_v7, %v1783_v55  ;;  %v1792_v13 = vcombine.high %v1767_v7, %v1783_v55 }
 0x243   :  { %v1963_v59 = vcombine.low %v1731_v58, %v1738_v61  ;;  %v5489_v15 = vcombine.high %v1731_v58, %v1738_v61  ;;  %v1807_v25 = vcombine.low %v1774_v12, %v1790_v4  ;;  %v1808_v28 = vcombine.high %v1774_v12, %v1790_v4 }
 0x244   :  { %v2379_v16 = vsel %vm858_vm2, %v1573_v8, 0  ;;  %v1576_v22 = vpack.i.b16 %v1575_v10, %v1574_v60  ;;  %v1550_v35 = vshrl.u32 %v6549_v33, 16  ;;  %v1979_v39 = vcombine.low %v1747_v3, %v1754_v5 }
 0x245   :  { %5641 = vmatpush3.bf16.xpose.msra.mxu1 %v2379_v16  ;;  %v1544_v18 = vcombine.high %v1519_v51, %v1535_v53  ;;  %v1799_v41 = vrot.slane %v1791_v34, %v6346_v42  ;;  %v1806_v43 = vrot.slane %v1792_v13, %v6346_v42  ;;  %v5490_v44 = vcombine.high %v1747_v3, %v1754_v5 }
 0x246   :  { %v2473_v40 = vsel %vm858_vm2, %v1576_v22, 0  ;;  %5646 = vmatprep.subr.bf16.mxu1 %v7792_v1  ;;  %v1408_v45 = vcombine.high %v6540_v17, %v6543_v20  ;;  %v6635_v50 = vrot.slane %v1963_v59, %v6332_v21  ;;  %v6638_v33 = vrot.slane %v5489_v15, %v6332_v21  ;;  %v2314_v22 = vld [vmem:[#allocation2 + $0x10] sm:$0xff] }
 0x247   :  { %5653 = vmatpush3.bf16.xpose.msra.mxu0 %v2473_v40  ;;  %v1552_v56 = vpack.i.b16 %v1551_v11, %v1550_v35  ;;  %v1476_v38 = vcombine.high %v1451_v46, %v1467_v48  ;;  %v1815_v51 = vrot.slane %v1807_v25, %v6346_v42  ;;  %v1822_v52 = vrot.slane %v1808_v28, %v6346_v42  ;;  %v2313_v48 = vld [vmem:[#allocation2 + $0x8] sm:$0xff] }
 0x248   :  { %5664 = vmatprep.subr.bf16.mxu0 %v7792_v1  ;;  %v1340_v53 = vcombine.high %v6526_v6, %v6530_v9  ;;  %v6646_v54 = vrot.slane %v1979_v39, %v6332_v21  ;;  %v1444_v20 = vcombine.high %v6578_v49, %v6581_v23  ;;  %v1460_v55 = vcombine.high %v6584_v26, %v6587_v14  ;;  %v2315_v14 = vld [vmem:[#allocation2 + $0x18] sm:$0xff] }
 0x249   :  { %v1579_v17 = vpack.i.b16 %v1544_v18, %v1476_v38  ;;  %v6653_v57 = vrot.slane %v5490_v44, %v6332_v21  ;;  %v2031_v46 = vcombine.low %v1799_v41, %v1806_v43  ;;  %v1512_v61 = vcombine.high %v6590_v27, %v6593_v29 }
 0x24a   :  { %v1555_v58 = vpack.i.b16 %v1408_v45, %v1340_v53  ;;  %v5491_v6 = vcombine.high %v1799_v41, %v1806_v43  ;;  %v2426_v9 = vsel %vm858_vm2, %v1552_v56, 0  ;;  %v1528_v49 = vcombine.high %v6600_v36, %v6603_v37 }
 0x24b   :  { %v1995_v23 = vcombine.low %v6635_v50, %v6638_v33  ;;  %v2047_v26 = vcombine.low %v1815_v51, %v1822_v52  ;;  %v1581_v2 = vshrl.u32 %v1544_v18, 16  ;;  %v1557_v7 = vshrl.u32 %v1408_v45, 16 }
 0x24c   :  { %5643 = vmatmul.mubr.msk.bf16.vlgmr.msra.gmra.mrb[4].mxu1 %vm858_vm2, %v2313_v48  ;;  %v1308_v27 = vcombine.high %v6484_v30, %v6487_v31  ;;  %v5492_v29 = vcombine.high %v1815_v51, %v1822_v52  ;;  %v2567_v3 = vsel %vm858_vm2, %v1579_v17, 0  ;;  %v6671_v36 = vrot.slane %v1444_v20, %v6346_v42 }
 0x24d   :  { %5647 = vmatpush3.bf16.xpose.msra.mxu1 %v2426_v9  ;;  %5648 = vmatprep.mubr.msk.bf16.mxu1 %vm6175_vm1, %v7792_v1  ;;  %v6674_v37 = vrot.slane %v1460_v55, %v6346_v42  ;;  %v2520_v4 = vsel %vm858_vm2, %v1555_v58, 0  ;;  %v1580_v30 = vshrl.u32 %v1476_v38, 16  ;;  %v1556_v31 = vshrl.u32 %v1340_v53, 16 }
 0x24e   :  { %5655 = vmatmul.mubr.msk.bf16.vlgmr.msra.gmra.mrb[8].mxu0 %vm858_vm2, %v2315_v14  ;;  %5658 = vmatprep.subr.bf16.mxu1 %v7792_v1  ;;  %v6680_v5 = vrot.slane %v1512_v61, %v6346_v42  ;;  %v6684_v8 = vrot.slane %v1528_v49, %v6346_v42  ;;  %v1324_v60 = vcombine.high %v6490_v32, %v6495_v19  ;;  %v2316_v49 = vld [vmem:[#allocation2 + $0x20] sm:$0xff] }
 0x24f   :  { %5665 = vmatpush3.bf16.xpose.msra.mxu0 %v2567_v3  ;;  %5666 = vmatprep.mubr.msk.bf16.mxu0 %vm6175_vm1, %v7792_v1  ;;  %v2003_v10 = vrot.slane %v1995_v23, %v6346_v42  ;;  %v2011_v11 = vcombine.low %v6646_v54, %v6653_v57  ;;  %v1582_v12 = vpack.i.b16 %v1581_v2, %v1580_v30 }
 0x250   :  { %5676 = vmatprep.subr.bf16.mxu0 %v7792_v1  ;;  %v1558_v34 = vpack.i.b16 %v1557_v7, %v1556_v31  ;;  %v6692_v13 = vrot.slane %v1308_v27, %v6346_v42  ;;  %v1376_v59 = vcombine.high %v6508_v24, %v6516_v62  ;;  %v6698_v15 = vcombine.low %v6671_v36, %v6674_v37 }
 0x251   :  { %v2019_v16 = vrot.slane %v2011_v11, %v6346_v42  ;;  %v2038_v32 = vrot.slane %v2031_v46, %v6332_v21  ;;  %v2046_v19 = vrot.slane %v5491_v6, %v6332_v21  ;;  %v1392_v25 = vcombine.high %v6519_v63, %v6522_v0  ;;  %v2317_v63 = vld [vmem:[#allocation2 + $0x28] sm:$0xff] }
 0x252   :  { %v2054_v28 = vrot.slane %v2047_v26, %v6332_v21  ;;  %v2062_v35 = vrot.slane %v5492_v29, %v6332_v21  ;;  %v1996_v24 = vcombine.high %v6635_v50, %v6638_v33  ;;  %v6712_v62 = vcombine.low %v6680_v5, %v6684_v8 }
 0x253   :  { %v6715_v39 = vrot.slane %v1324_v60, %v6346_v42  ;;  %v2063_v40 = vcombine.low %v2038_v32, %v2046_v19  ;;  %v6717_v18 = vcombine.high %v2003_v10, %v2019_v16  ;;  %v2012_v43 = vcombine.high %v6646_v54, %v6653_v57 }
 0x254   :  { %5649 = vmatmul.mubr.msk.bf16.vlgmr.msra.gmra.mrb[8].mxu1 %vm858_vm2, %v2314_v22  ;;  %v2079_v0 = vcombine.low %v2054_v28, %v2062_v35  ;;  %v2010_v41 = vrot.slane %v1996_v24, %v6346_v42  ;;  %v2661_v44 = vsel %vm858_vm2, %v1582_v12, 0  ;;  %v6727_v45 = vcombine.low %v2003_v10, %v2019_v16 }
 0x255   :  { %5659 = vmatpush3.bf16.xpose.msra.mxu1 %v2520_v4  ;;  %5660 = vmatprep.mubr.msk.bf16.mxu1 %vm6175_vm1, %v7792_v1  ;;  %v2071_v50 = vrot.slane %v2063_v40, %v6346_v42  ;;  %v2064_v33 = vcombine.high %v2038_v32, %v2046_v19  ;;  %v2614_v56 = vsel %vm858_vm2, %v1558_v34, 0  ;;  %v2026_v51 = vrot.slane %v2012_v43, %v6346_v42  ;;  %v2319_v4 = vld [vmem:[#allocation2 + $0x38] sm:$0xff] }
 0x256   :  { %5667 = vmatmul.mubr.msk.bf16.vlgmr.msra.gmra.mrb[12].mxu0 %vm858_vm2, %v2317_v63  ;;  %5670 = vmatprep.subr.bf16.mxu1 %v7792_v1  ;;  %v2087_v38 = vrot.slane %v2079_v0, %v6346_v42  ;;  %v2080_v52 = vcombine.high %v2054_v28, %v2062_v35  ;;  %v1585_v53 = vpack.i.b16 %v6712_v62, %v6698_v15  ;;  %v1587_v61 = vshrl.u32 %v6712_v62, 16  ;;  %v2318_v28 = vld [vmem:[#allocation2 + $0x30] sm:$0xff]  ;;  %v2321_v62 = vld [vmem:[#allocation2 + $0x48] sm:$0xff] }
 0x257   :  { %5677 = vmatpush3.bf16.xpose.msra.mxu0 %v2661_v44  ;;  %5678 = vmatprep.mubr.msk.bf16.mxu0 %vm6175_vm1, %v7792_v1  ;;  %v6739_v54 = vrot.slane %v1376_v59, %v6346_v42  ;;  %v1406_v17 = vrot.slane %v1392_v25, %v6346_v42  ;;  %v2078_v20 = vrot.slane %v2064_v33, %v6346_v42  ;;  %v2239_v6 = vshrl.u32 %v6727_v45, 16  ;;  %v2320_v44 = vld [vmem:[#allocation2 + $0x40] sm:$0xff] }
 0x258   :  { %5688 = vmatprep.subr.bf16.mxu0 %v7792_v1  ;;  %v6743_v55 = vcombine.low %v2071_v50, %v2087_v38  ;;  %v6745_v57 = vcombine.high %v2071_v50, %v2087_v38  ;;  %v6747_v46 = vcombine.low %v2010_v41, %v2026_v51  ;;  %v2094_v48 = vrot.slane %v2080_v52, %v6346_v42  ;;  %v2322_v52 = vld [vmem:[#allocation2 + $0x50] sm:$0xff] }
 0x259   :  { %v1341_v58 = vcombine.low %v6692_v13, %v6715_v39  ;;  %v6754_v9 = vcombine.high %v2010_v41, %v2026_v51  ;;  %v2247_v14 = vshrl.u32 %v6717_v18, 16  ;;  %v2755_v7 = vsel %vm858_vm2, %v1585_v53, 0 }
 0x25a   :  { %v2240_v23 = vshrl.u32 %v6743_v55, 16  ;;  %v2248_v2 = vshrl.u32 %v6745_v57, 16  ;;  %v1409_v27 = vcombine.low %v6739_v54, %v1406_v17  ;;  %v6764_v29 = vcombine.low %v2078_v20, %v2094_v48 }
 0x25b   :  { %7800 = vst [vmem:[#allocation13_spill] sm:$0xff] %v6754_v9  ;;  %v6766_v3 = vcombine.high %v2078_v20, %v2094_v48  ;;  %v2255_v60 = vshrl.u32 %v6747_v46, 16  ;;  %v2263_v10 = vshrl.u32 %v6754_v9, 16  ;;  %v1586_v32 = vshrl.u32 %v6698_v15, 16  ;;  %v2324_v48 = vld [vmem:[#allocation2 + $0x60] sm:$0xff] }
 0x25c   :  { %5661 = vmatmul.mubr.msk.bf16.vlgmr.msra.gmra.mrb[12].mxu1 %vm858_vm2, %v2316_v49  ;;  %v6770_v30 = vpack.i.b16 %v2240_v23, %v2239_v6  ;;  %v6772_v31 = vpack.i.b16 %v2248_v2, %v2247_v14  ;;  %v2256_v12 = vshrl.u32 %v6764_v29, 16  ;;  %v1561_v16 = vpack.i.b16 %v1409_v27, %v1341_v58  ;;  %v2326_v6 = vld [vmem:[#allocation2 + $0x70] sm:$0xff] }
 0x25d   :  { %7801 = vst [vmem:[#allocation14_spill] sm:$0xff] %v6766_v3  ;;  %5671 = vmatpush3.bf16.xpose.msra.mxu1 %v2614_v56  ;;  %5672 = vmatprep.mubr.msk.bf16.mxu1 %vm6175_vm1, %v7792_v1  ;;  %v2264_v59 = vshrl.u32 %v6766_v3, 16  ;;  %v1588_v25 = vpack.i.b16 %v1587_v61, %v1586_v32  ;;  %v1563_v24 = vshrl.u32 %v1409_v27, 16  ;;  %v1562_v40 = vshrl.u32 %v1341_v58, 16  ;;  %v2327_v61 = vld [vmem:[#allocation2 + $0x78] sm:$0xff] }
 0x25e   :  { %5679 = vmatmul.mubr.msk.bf16.vlgmr.msra.gmra.mrb[16].mxu0 %vm858_vm2, %v2319_v4  ;;  %5682 = vmatprep.subr.bf16.mxu1 %v7792_v1  ;;  %v6788_v19 = vpack.i.b16 %v2256_v12, %v2255_v60  ;;  %v2708_v35 = vsel %vm858_vm2, %v1561_v16, 0  ;;  %v1546_v63 = vcombine.high %v6680_v5, %v6684_v8  ;;  %v1478_v41 = vcombine.high %v6671_v36, %v6674_v37  ;;  %v2323_v5 = vld [vmem:[#allocation2 + $0x58] sm:$0xff] }
 0x25f   :  { %5689 = vmatpush3.bf16.xpose.msra.mxu0 %v2755_v7  ;;  %5690 = vmatprep.mubr.msk.bf16.mxu0 %vm6175_vm1, %v7792_v1  ;;  %v6790_v22 = vpack.i.b16 %v2264_v59, %v2263_v10  ;;  %v2849_v15 = vsel %vm858_vm2, %v1588_v25, 0  ;;  %v1564_v0 = vpack.i.b16 %v1563_v24, %v1562_v40  ;;  %v1410_v33 = vcombine.high %v6739_v54, %v1406_v17  ;;  %v2325_v17 = vld [vmem:[#allocation2 + $0x68] sm:$0xff] }
 0x260   :  { %5700 = vmatprep.subr.bf16.mxu0 %v7792_v1  ;;  %7802 = vst [vmem:[#allocation15_spill] sm:$0xff] %v6788_v19  ;;  %v1591_v43 = vpack.i.b16 %v1546_v63, %v1478_v41  ;;  %v1342_v36 = vcombine.high %v6692_v13, %v6715_v39  ;;  %v1593_v37 = vshrl.u32 %v1546_v63, 16  ;;  %v1592_v38 = vshrl.u32 %v1478_v41, 16 }
 0x261   :  { %7803 = vst [vmem:[#allocation16_spill] sm:$0xff] %v6790_v22  ;;  %v2802_v50 = vsel %vm858_vm2, %v1564_v0, 0  ;;  %v1569_v54 = vshrl.u32 %v1410_v33, 16  ;;  %v2237_v49 = vpack.i.b16 %v6743_v55, %v6727_v45  ;;  %v1663_v26 = vshrl.u32 %v6260_v47, 16 }
 0x262   :  { %v2943_v8 = vsel %vm858_vm2, %v1591_v43, 0  ;;  %v1567_v56 = vpack.i.b16 %v1410_v33, %v1342_v36  ;;  %v1594_v51 = vpack.i.b16 %v1593_v37, %v1592_v38  ;;  %v1568_v39 = vshrl.u32 %v1342_v36, 16 }
 0x264   :  { %5673 = vmatmul.mubr.msk.bf16.vlgmr.msra.gmra.mrb[16].mxu1 %vm858_vm2, %v2318_v28  ;;  %v2896_v53 = vsel %vm858_vm2, %v1567_v56, 0  ;;  %v3037_v13 = vsel %vm858_vm2, %v1594_v51, 0  ;;  %v1570_v20 = vpack.i.b16 %v1569_v54, %v1568_v39 }
 0x265   :  { %5683 = vmatpush3.bf16.xpose.msra.mxu1 %v2708_v35  ;;  %5684 = vmatprep.mubr.msk.bf16.mxu1 %vm6175_vm1, %v7792_v1 }
 0x266   :  { %5691 = vmatmul.mubr.msk.bf16.vlgmr.msra.gmra.mrb[20].mxu0 %vm858_vm2, %v2321_v62  ;;  %5694 = vmatprep.subr.bf16.mxu1 %v7792_v1  ;;  %v2990_v58 = vsel %vm858_vm2, %v1570_v20, 0 }
 0x267   :  { %5701 = vmatpush3.bf16.xpose.msra.mxu0 %v2849_v15  ;;  %5702 = vmatprep.mubr.msk.bf16.mxu0 %vm6175_vm1, %v7792_v1 }
 0x268   :  { %5712 = vmatprep.subr.bf16.mxu0 %v7792_v1 }
 0x26c   :  { %5685 = vmatmul.mubr.msk.bf16.vlgmr.msra.gmra.mrb[20].mxu1 %vm858_vm2, %v2320_v44 }
 0x26d   :  { %5695 = vmatpush3.bf16.xpose.msra.mxu1 %v2802_v50  ;;  %5696 = vmatprep.mubr.msk.bf16.mxu1 %vm6175_vm1, %v7792_v1 }
 0x26e   :  { %5703 = vmatmul.mubr.msk.bf16.vlgmr.msra.gmra.mrb[24].mxu0 %vm858_vm2, %v2323_v5  ;;  %5706 = vmatprep.subr.bf16.mxu1 %v7792_v1 }
 0x26f   :  { %5713 = vmatpush3.bf16.xpose.msra.mxu0 %v2943_v8  ;;  %5714 = vmatprep.mubr.msk.bf16.mxu0 %vm6175_vm1, %v7792_v1 }
 0x270   :  { %5724 = vmatprep.subr.bf16.mxu0 %v7792_v1 }
 0x274   :  { %5697 = vmatmul.mubr.msk.bf16.vlgmr.msra.gmra.mrb[24].mxu1 %vm858_vm2, %v2322_v52 }
 0x275   :  { %5707 = vmatpush3.bf16.xpose.msra.mxu1 %v2896_v53  ;;  %5708 = vmatprep.mubr.msk.bf16.mxu1 %vm6175_vm1, %v7792_v1 }
 0x276   :  { %5715 = vmatmul.mubr.msk.bf16.vlgmr.msra.gmra.mrb[28].mxu0 %vm858_vm2, %v2325_v17  ;;  %5718 = vmatprep.subr.bf16.mxu1 %v7792_v1 }
 0x277   :  { %5725 = vmatpush3.bf16.xpose.msra.mxu0 %v3037_v13  ;;  %5726 = vmatprep.mubr.msk.bf16.mxu0 %vm6175_vm1, %v7792_v1 }
 0x278   :  { %5736 = vmatprep.subr.bf16.mxu0 %v7792_v1 }
 0x27c   :  { %5709 = vmatmul.mubr.msk.bf16.vlgmr.msra.gmra.mrb[28].mxu1 %vm858_vm2, %v2324_v48 }
 0x27d   :  { %5719 = vmatpush3.bf16.xpose.msra.mxu1 %v2990_v58  ;;  %5720 = vmatprep.mubr.msk.bf16.mxu1 %vm6175_vm1, %v7792_v1 }
 0x27e   :  { %5727 = vmatmul.mubr.msk.bf16.vlgmr.msra.gmra.mrb[32].mxu0 %vm858_vm2, %v2327_v61  ;;  %5730 = vmatprep.subr.bf16.mxu1 %v7792_v1 }
 0x27f   :  { %5738 = vmatprep.mubr.msk.bf16.mxu0 %vm6175_vm1, %v7792_v1 }
 0x284   :  { %5721 = vmatmul.mubr.msk.bf16.vlgmr.msra.gmra.mrb[32].mxu1 %vm858_vm2, %v2326_v6 }
 0x285   :  { %5731 = vmatpush3.bf16.msra.mxu1 %v2237_v49  ;;  %5732 = vmatprep.mubr.msk.bf16.mxu1 %vm6175_vm1, %v7792_v1 }
 0x286   :  { %5742 = vmatprep.subr.bf16.mxu1 %v7792_v1 }
 0x30e   :  { %v6843_v23 = vpop.f32.mrb[0].mxu1 }
 0x30f   :  { %v5638_v14 = vpop.f32.mrb[1].mxu1  ;;  %v3081_v2 = vsel %vm3080_vm3, %v6843_v23, -inf }
 0x310   :  { %v6847_v7 = vpop.f32.mrb[2].mxu1  ;;  %3082 = vmax.xlane.f32.xlu0 %v3081_v2 }
 0x311   :  { %v5639_v27 = vpop.f32.mrb[3].mxu1  ;;  %v3084_v45 = vsel %vm3080_vm3, %v6847_v7, -inf }
 0x312   :  { %3085 = vmax.xlane.f32.xlu1 %v3084_v45 }
 0x31f   :  { %v6851_v55 = vpop.f32.mrb[4].mxu1 }
 0x320   :  { %v5644_v4 = vpop.f32.mrb[5].mxu1  ;;  %v3087_v60 = vsel %vm3080_vm3, %v6851_v55, -inf }
 0x321   :  { %v6855_v10 = vpop.f32.mrb[6].mxu1  ;;  %v6857_v12 = vpop.f32.mrb[8].mxu0  ;;  %3088 = vmax.xlane.f32.xlu0 %v3087_v60 }
 0x322   :  { %v5645_v59 = vpop.f32.mrb[7].mxu1  ;;  %v5656_v16 = vpop.f32.mrb[9].mxu0  ;;  %v3090_v28 = vsel %vm3080_vm3, %v6855_v10, -inf  ;;  %v3099_v44 = vsel %vm3080_vm3, %v6857_v12, -inf }
 0x323   :  { %1625 = vrot.lane.b32.xlu1 %v6260_v47, %s6170_s7  ;;  %v6861_v32 = vpop.f32.mrb[10].mxu0 }
 0x324   :  { %v5657_v25 = vpop.f32.mrb[11].mxu0  ;;  %v3102_v5 = vsel %vm3080_vm3, %v6861_v32, -inf }
 0x325   :  { %3091 = vmax.xlane.f32.xlu0 %v3090_v28 }
 0x327   :  { %v6865_v35 = vpop.f32.mrb[8].mxu1 }
 0x328   :  { %v5650_v24 = vpop.f32.mrb[9].mxu1  ;;  %v3093_v62 = vsel %vm3080_vm3, %v6865_v35, -inf }
 0x329   :  { %v6869_v15 = vpop.f32.mrb[10].mxu1  ;;  %v6871_v40 = vpop.f32.mrb[12].mxu0  ;;  %3094 = vmax.xlane.f32.xlu0 %v3093_v62 }
 0x32a   :  { %v5651_v63 = vpop.f32.mrb[11].mxu1  ;;  %v5668_v0 = vpop.f32.mrb[13].mxu0  ;;  %v3096_v28 = vsel %vm3080_vm3, %v6869_v15, -inf }
 0x32b   :  { %v6873_v41 = vpop.f32.mrb[14].mxu0 }
 0x32c   :  { %v5669_v43 = vpop.f32.mrb[15].mxu0  ;;  %v3114_v17 = vsel %vm3080_vm3, %v6873_v41, -inf }
 0x32d   :  { %3100 = vmax.xlane.f32.xlu0 %v3099_v44 }
 0x32f   :  { %v6877_v50 = vpop.f32.mrb[12].mxu1 }
 0x330   :  { %v5662_v33 = vpop.f32.mrb[13].mxu1  ;;  %v3105_v44 = vsel %vm3080_vm3, %v6877_v50, -inf }
 0x331   :  { %v6881_v8 = vpop.f32.mrb[14].mxu1  ;;  %v6883_v36 = vpop.f32.mrb[16].mxu0  ;;  %3103 = vmax.xlane.f32.xlu0 %v3102_v5 }
 0x332   :  { %v5663_v37 = vpop.f32.mrb[15].mxu1  ;;  %v5680_v56 = vpop.f32.mrb[17].mxu0  ;;  %v3108_v52 = vsel %vm3080_vm3, %v6881_v8, -inf }
 0x333   :  { %v6885_v38 = vpop.f32.mrb[18].mxu0 }
 0x334   :  { %v5681_v51 = vpop.f32.mrb[19].mxu0  ;;  %v3126_v2 = vsel %vm3080_vm3, %v6885_v38, -inf }
 0x335   :  { %3109 = vmax.xlane.f32.xlu0 %v3108_v52  ;;  %v3111_v52 = vsel %vm3080_vm3, %v6871_v40, -inf }
 0x337   :  { %v6889_v53 = vpop.f32.mrb[16].mxu1 }
 0x338   :  { %v5674_v54 = vpop.f32.mrb[17].mxu1 }
 0x339   :  { %v6893_v13 = vpop.f32.mrb[18].mxu1  ;;  %v6895_v39 = vpop.f32.mrb[20].mxu0  ;;  %3115 = vmax.xlane.f32.xlu0 %v3114_v17 }
 0x33a   :  { %v5675_v20 = vpop.f32.mrb[19].mxu1  ;;  %v5692_v48 = vpop.f32.mrb[21].mxu0  ;;  %v3120_v6 = vsel %vm3080_vm3, %v6893_v13, -inf }
 0x33b   :  { %v6897_v58 = vpop.f32.mrb[22].mxu0 }
 0x33c   :  { %v5693_v61 = vpop.f32.mrb[23].mxu0  ;;  %v3138_v63 = vsel %vm3080_vm3, %v6897_v58, -inf }
 0x33d   :  { %3121 = vmax.xlane.f32.xlu0 %v3120_v6  ;;  %v3117_v6 = vsel %vm3080_vm3, %v6889_v53, -inf }
 0x33f   :  { %v6901_v49 = vpop.f32.mrb[20].mxu1 }
 0x340   :  { %v5686_v14 = vpop.f32.mrb[21].mxu1 }
 0x341   :  { %v6905_v27 = vpop.f32.mrb[22].mxu1  ;;  %v6907_v45 = vpop.f32.mrb[24].mxu0  ;;  %3127 = vmax.xlane.f32.xlu0 %v3126_v2 }
 0x342   :  { %v5687_v4 = vpop.f32.mrb[23].mxu1  ;;  %v5704_v60 = vpop.f32.mrb[25].mxu0  ;;  %v3132_v25 = vsel %vm3080_vm3, %v6905_v27, -inf }
 0x343   :  { %v6909_v59 = vpop.f32.mrb[26].mxu0 }
 0x344   :  { %v5705_v16 = vpop.f32.mrb[27].mxu0  ;;  %v3150_v20 = vsel %vm3080_vm3, %v6909_v59, -inf }
 0x345   :  { %3133 = vmax.xlane.f32.xlu0 %v3132_v25  ;;  %v3123_v25 = vsel %vm3080_vm3, %v6883_v36, -inf }
 0x347   :  { %3097 = vmax.xlane.f32.xlu1 %v3096_v28  ;;  %v6915_v24 = vpop.f32.mrb[24].mxu1 }
 0x348   :  { %v5698_v62 = vpop.f32.mrb[25].mxu1 }
 0x349   :  { %v6919_v0 = vpop.f32.mrb[26].mxu1  ;;  %v6921_v43 = vpop.f32.mrb[28].mxu0  ;;  %3139 = vmax.xlane.f32.xlu0 %v3138_v63 }
 0x34a   :  { %7804 = vst [vmem:[#allocation17_spill] sm:$0xff] %v6921_v43  ;;  %v5699_v33 = vpop.f32.mrb[27].mxu1  ;;  %v5716_v5 = vpop.f32.mrb[29].mxu0  ;;  %v3144_v51 = vsel %vm3080_vm3, %v6919_v0, -inf }
 0x34b   :  { %3106 = vmax.xlane.f32.xlu1 %v3105_v44  ;;  %v6925_v37 = vpop.f32.mrb[30].mxu0  ;;  %v3129_v33 = vsel %vm3080_vm3, %v6901_v49, -inf }
 0x34c   :  { %v5717_v56 = vpop.f32.mrb[31].mxu0  ;;  %v3162_v63 = vsel %vm3080_vm3, %v6925_v37, -inf }
 0x34d   :  { %3145 = vmax.xlane.f32.xlu0 %v3144_v51  ;;  %v3135_v51 = vsel %vm3080_vm3, %v6895_v39, -inf }
 0x34f   :  { %3112 = vmax.xlane.f32.xlu1 %v3111_v52  ;;  %v6931_v54 = vpop.f32.mrb[28].mxu1 }
 0x350   :  { %v5710_v17 = vpop.f32.mrb[29].mxu1 }
 0x351   :  { %v6935_v48 = vpop.f32.mrb[30].mxu1  ;;  %v6937_v61 = vpop.f32.mrb[32].mxu0  ;;  %3151 = vmax.xlane.f32.xlu0 %v3150_v20  ;;  %v3141_v17 = vsel %vm3080_vm3, %v6915_v24, -inf  ;;  %v3147_v20 = vsel %vm3080_vm3, %v6907_v45, -inf }
 0x352   :  { %7805 = vst [vmem:[#allocation18_spill] sm:$0xff] %v6937_v61  ;;  %v5711_v14 = vpop.f32.mrb[31].mxu1  ;;  %v5728_v2 = vpop.f32.mrb[33].mxu0  ;;  %v3156_v16 = vsel %vm3080_vm3, %v6935_v48, -inf }
 0x353   :  { %3118 = vmax.xlane.f32.xlu1 %v3117_v6  ;;  %v6941_v4 = vpop.f32.mrb[34].mxu0  ;;  %v3153_v6 = vsel %vm3080_vm3, %v6931_v54, -inf  ;;  %v3159_v14 = vsel %vm3080_vm3, %v6921_v43, -inf }
 0x354   :  { %7806 = vst [vmem:[#allocation19_spill] sm:$0xff] %v6941_v4  ;;  %v5729_v60 = vpop.f32.mrb[35].mxu0  ;;  %v3174_v52 = vsel %vm3080_vm3, %v6941_v4, -inf }
 0x355   :  { %3157 = vmax.xlane.f32.xlu0 %v3156_v16  ;;  %v3171_v60 = vsel %vm3080_vm3, %v6937_v61, -inf  ;;  %v1606_v16 = vpop.permute.xlu0 %1605 }
 0x357   :  { %3124 = vmax.xlane.f32.xlu1 %v3123_v25  ;;  %v6947_v28 = vpop.f32.mrb[32].mxu1  ;;  %v1602_v25 = vpop.permute.xlu1 %1601 }
 0x358   :  { %7807 = vst [vmem:[#allocation20_spill] sm:$0xff] %v6947_v28  ;;  %v5722_v62 = vpop.f32.mrb[33].mxu1  ;;  %v3165_v2 = vsel %vm3080_vm3, %v6947_v28, -inf  ;;  %v1661_v34 = vpack.i.b16 %v1602_v25, %v6260_v47  ;;  %v1664_v11 = vshrl.u32 %v1602_v25, 16 }
 0x359   :  { %v6951_v44 = vpop.f32.mrb[34].mxu1  ;;  %3163 = vmax.xlane.f32.xlu0 %v3162_v63  ;;  %v1614_v62 = vpop.permute.xlu0 %1613 }
 0x35a   :  { %v5723_v5 = vpop.f32.mrb[35].mxu1  ;;  %v3168_v56 = vsel %vm3080_vm3, %v6951_v44, -inf  ;;  %v1665_v19 = vpack.i.b16 %v1664_v11, %v1663_v26 }
 0x35b   :  { %3130 = vmax.xlane.f32.xlu1 %v3129_v33  ;;  %v1610_v63 = vpop.permute.xlu1 %1609 }
 0x35c   :  { %v1672_v1 = vshrl.u32 %v1610_v63, 16 }
 0x35d   :  { %3169 = vmax.xlane.f32.xlu0 %v3168_v56  ;;  %v1622_v33 = vpop.permute.xlu0 %1621 }
 0x35e   :  { %v1687_v9 = vshrl.u32 %v1622_v33, 16 }
 0x35f   :  { %3136 = vmax.xlane.f32.xlu1 %v3135_v51  ;;  %v1618_v5 = vpop.permute.xlu1 %1617 }
 0x361   :  { %3175 = vmax.xlane.f32.xlu0 %v3174_v52  ;;  %v1677_v52 = vpack.i.b16 %v1618_v5, %v1614_v62 }
 0x363   :  { %3142 = vmax.xlane.f32.xlu1 %v3141_v17  ;;  %v1680_v17 = vshrl.u32 %v1618_v5, 16  ;;  %v1827_v61 = vcombine.low %v1661_v34, %v1677_v52  ;;  %v1828_v28 = vcombine.high %v1661_v34, %v1677_v52 }
 0x365   :  { %v1835_v4 = vrot.slane %v1827_v61, %v6332_v21  ;;  %v1842_v47 = vrot.slane %v1828_v28, %v6332_v21 }
 0x367   :  { %3148 = vmax.xlane.f32.xlu1 %v3147_v20 }
 0x36b   :  { %3154 = vmax.xlane.f32.xlu1 %v3153_v6 }
 0x36f   :  { %3160 = vmax.xlane.f32.xlu1 %v3159_v14 }
 0x373   :  { %3166 = vmax.xlane.f32.xlu1 %v3165_v2  ;;  %v1679_v2 = vshrl.u32 %v1614_v62, 16 }
 0x375   :  { %v1681_v3 = vpack.i.b16 %v1680_v17, %v1679_v2 }
 0x377   :  { %3172 = vmax.xlane.f32.xlu1 %v3171_v60  ;;  %v1671_v60 = vshrl.u32 %v1606_v16, 16  ;;  %v1896_v43 = vcombine.high %v1665_v19, %v1681_v3 }
 0x39d   :  { %v3083_v56 = vpop.xlane.xlu0 %3082 }
 0x39e   :  { %v3177_v51 = vsub.f32 %v6843_v23, %v3083_v56  ;;  %v1669_v56 = vpack.i.b16 %v1610_v63, %v1606_v16 }
 0x39f   :  { %v3086_v20 = vpop.xlane.xlu1 %3085 }
 0x3a0   :  { %v3209_v6 = vmul.f32 1.442695, %v3177_v51  ;;  %v3178_v14 = vsub.f32 %v6847_v7, %v3086_v20  ;;  %v1673_v7 = vpack.i.b16 %v1672_v1, %v1671_v60 }
 0x3a2   :  { %v3211_v22 = vmul.f32 1.442695, %v3178_v14  ;;  %5934 = vpow2.f32 %v3209_v6  ;;  %v1895_v14 = vcombine.low %v1665_v19, %v1681_v3 }
 0x3a3   :  { %v1626_v23 = vpop.permute.xlu1 %1625 }
 0x3a4   :  { %v1685_v5 = vpack.i.b16 %v1626_v23, %v1622_v33  ;;  %v1688_v51 = vshrl.u32 %v1626_v23, 16  ;;  %5936 = vpow2.f32 %v3211_v22  ;;  %v1903_v1 = vrot.slane %v1895_v14, %v6332_v21 }
 0x3a6   :  { %v1689_v62 = vpack.i.b16 %v1688_v51, %v1687_v9  ;;  %v1843_v20 = vcombine.low %v1669_v56, %v1685_v5  ;;  %v1844_v25 = vcombine.high %v1669_v56, %v1685_v5  ;;  %v1910_v9 = vrot.slane %v1896_v43, %v6332_v21 }
 0x3a8   :  { %v1851_v17 = vrot.slane %v1843_v20, %v6332_v21  ;;  %v1858_v34 = vrot.slane %v1844_v25, %v6332_v21  ;;  %v1911_v16 = vcombine.low %v1673_v7, %v1689_v62  ;;  %v1912_v63 = vcombine.high %v1673_v7, %v1689_v62 }
 0x3aa   :  { %v1859_v33 = vcombine.low %v1835_v4, %v1851_v17  ;;  %v1860_v52 = vcombine.high %v1835_v4, %v1851_v17  ;;  %v1875_v26 = vcombine.low %v1842_v47, %v1858_v34  ;;  %v1876_v11 = vcombine.high %v1842_v47, %v1858_v34 }
 0x3ab   :  { %v1919_v22 = vrot.slane %v1911_v16, %v6332_v21  ;;  %v1926_v61 = vrot.slane %v1912_v63, %v6332_v21 }
 0x3ac   :  { %v1867_v3 = vrot.slane %v1859_v33, %v6346_v42  ;;  %v1874_v19 = vrot.slane %v1860_v52, %v6346_v42  ;;  %v1883_v28 = vrot.slane %v1875_v26, %v6346_v42  ;;  %v1890_v6 = vrot.slane %v1876_v11, %v6346_v42  ;;  %v5935_v56 = vpop.eup %5934 }
 0x3ad   :  { %v1927_v2 = vcombine.low %v1903_v1, %v1919_v22  ;;  %v1928_v4 = vcombine.high %v1903_v1, %v1919_v22  ;;  %v1943_v60 = vcombine.low %v1910_v9, %v1926_v61  ;;  %v1944_v23 = vcombine.high %v1910_v9, %v1926_v61 }
 0x3ae   :  { %v2099_v5 = vcombine.low %v1867_v3, %v1874_v19  ;;  %v5493_v51 = vcombine.high %v1867_v3, %v1874_v19  ;;  %v2115_v43 = vcombine.low %v1883_v28, %v1890_v6  ;;  %v5494_v7 = vcombine.high %v1883_v28, %v1890_v6  ;;  %v5937_v62 = vpop.eup %5936  ;;  %v3089_v17 = vpop.xlane.xlu0 %3088 }
 0x3af   :  { %v1935_v20 = vrot.slane %v1927_v2, %v6346_v42  ;;  %v1942_v25 = vrot.slane %v1928_v4, %v6346_v42  ;;  %v1951_v47 = vrot.slane %v1943_v60, %v6346_v42  ;;  %v1958_v14 = vrot.slane %v1944_v23, %v6346_v42 }
 0x3b0   :  { %v6994_v34 = vrot.slane %v2099_v5, %v6332_v21  ;;  %v6997_v16 = vrot.slane %v5493_v51, %v6332_v21  ;;  %v7000_v63 = vrot.slane %v2115_v43, %v6332_v21  ;;  %v7003_v33 = vrot.slane %v5494_v7, %v6332_v21 }
 0x3b1   :  { %v2167_v52 = vcombine.low %v1935_v20, %v1942_v25  ;;  %v5495_v26 = vcombine.high %v1935_v20, %v1942_v25  ;;  %v2183_v11 = vcombine.low %v1951_v47, %v1958_v14  ;;  %v5496_v1 = vcombine.high %v1951_v47, %v1958_v14 }
 0x3b2   :  { %v3179_v9 = vsub.f32 %v6851_v55, %v3089_v17  ;;  %v3273_v22 = vsel %vm3080_vm3, %v5935_v56, 0.0  ;;  %v3276_v61 = vsel %vm3080_vm3, %v5937_v62, 0.0  ;;  %v3369_v3 = vpack.c.bf16 %v5937_v62, %v5935_v56  ;;  %v3092_v19 = vpop.xlane.xlu0 %3091 }
 0x3b3   :  { %3274 = vadd.xlane.f32.xlu1 %v3273_v22  ;;  %3277 = vadd.xlane.f32.xlu0 %v3276_v61  ;;  %v2131_v28 = vcombine.low %v6994_v34, %v6997_v16  ;;  %v2147_v6 = vcombine.low %v7000_v63, %v7003_v33  ;;  %v7013_v2 = vrot.slane %v2167_v52, %v6332_v21  ;;  %v7808_v5 = vmov 0.0  }
 0x3b4   :  { %v3213_v4 = vmul.f32 1.442695, %v3179_v9  ;;  %v3180_v55 = vsub.f32 %v6855_v10, %v3092_v19  ;;  %5733 = vmatmul.mubr.msk.bf16.vlgmr.msra.gmra.mrb[36].mxu1 %vm3080_vm3, %v3369_v3  ;;  %v7018_v60 = vrot.slane %v5495_v26, %v6332_v21  ;;  %v7021_v23 = vrot.slane %v2183_v11, %v6332_v21 }
 0x3b5   :  { %5743 = vmatpush3.bf16.msra.mxu1 %v6770_v30  ;;  %v7025_v56 = vrot.slane %v5496_v1, %v6332_v21  ;;  %5744 = vmatprep.mubr.msk.bf16.mxu1 %vm6175_vm1, %v7808_v5  ;;  %v2139_v7 = vrot.slane %v2131_v28, %v6346_v42  ;;  %v2155_v62 = vrot.slane %v2147_v6, %v6346_v42 }
 0x3b6   :  { %5938 = vpow2.f32 %v3213_v4  ;;  %v3215_v51 = vmul.f32 1.442695, %v3180_v55  ;;  %v2199_v10 = vcombine.low %v7013_v2, %v7018_v60  ;;  %5754 = vmatprep.subr.bf16.mxu1 %v7808_v5  ;;  %v3095_v43 = vpop.xlane.xlu0 %3094 }
 0x3b7   :  { %v2215_v30 = vcombine.low %v7021_v23, %v7025_v56  ;;  %v3181_v47 = vsub.f32 %v6865_v35, %v3095_v43  ;;  %v2163_v17 = vcombine.low %v2139_v7, %v2155_v62 }
 0x3b8   :  { %5940 = vpow2.f32 %v3215_v51  ;;  %v2207_v20 = vrot.slane %v2199_v10, %v6346_v42 }
 0x3b9   :  { %v2223_v25 = vrot.slane %v2215_v30, %v6346_v42  ;;  %v3217_v1 = vmul.f32 1.442695, %v3181_v47  ;;  %v2271_v4 = vshrl.u32 %v2163_v17, 16 }
 0x3ba   :  { %v3101_v14 = vpop.xlane.xlu0 %3100 }
 0x3bb   :  { %v2231_v52 = vcombine.low %v2207_v20, %v2223_v25  ;;  %v3183_v26 = vsub.f32 %v6857_v12, %v3101_v14 }
 0x3bd   :  { %v2269_v11 = vpack.i.b16 %v2231_v52, %v2163_v17  ;;  %v3221_v9 = vmul.f32 1.442695, %v3183_v26  ;;  %v2272_v19 = vshrl.u32 %v2231_v52, 16  ;;  %v7049_v17 = vcombine.high %v2207_v20, %v2223_v25 }
 0x3be   :  { %v3104_v22 = vpop.xlane.xlu0 %3103  ;;  %v7051_v26 = vcombine.high %v2139_v7, %v2155_v62 }
 0x3bf   :  { %5737 = vmatpush3.bf16.msra.mxu0 %v2269_v11  ;;  %5942 = vpow2.f32 %v3221_v9  ;;  %v3184_v3 = vsub.f32 %v6861_v32, %v3104_v22  ;;  %v2273_v10 = vpack.i.b16 %v2272_v19, %v2271_v4 }
 0x3c0   :  { %v5939_v61 = vpop.eup %5938  ;;  %5748 = vmatprep.subr.bf16.mxu0 %v7808_v5  ;;  %5944 = vpow2.f32 %v3217_v1 }
 0x3c1   :  { %v3279_v28 = vsel %vm3080_vm3, %v5939_v61, 0.0  ;;  %v3223_v6 = vmul.f32 1.442695, %v3184_v3 }
 0x3c2   :  { %v5941_v35 = vpop.eup %5940  ;;  %3280 = vadd.xlane.f32.xlu1 %v3279_v28  ;;  %v3110_v12 = vpop.xlane.xlu0 %3109 }
 0x3c3   :  { %v3282_v55 = vsel %vm3080_vm3, %v5941_v35, 0.0  ;;  %v3370_v51 = vpack.c.bf16 %v5941_v35, %v5939_v61  ;;  %5946 = vpow2.f32 %v3223_v6  ;;  %v2277_v61 = vpack.i.b16 %v7049_v17, %v7051_v26 }
 0x3c4   :  { %3283 = vadd.xlane.f32.xlu0 %v3282_v55  ;;  %v3186_v20 = vsub.f32 %v6881_v8, %v3110_v12 }
 0x3c5   :  { %5739 = vmatmul.mubr.msk.bf16.vlgmr.msra.gmra.mrb[36].mxu0 %vm3080_vm3, %v3370_v51 }
 0x3c6   :  { %5749 = vmatpush3.bf16.msra.mxu0 %v2273_v10  ;;  %5750 = vmatprep.mubr.msk.bf16.mxu0 %vm6175_vm1, %v7808_v5  ;;  %v3116_v32 = vpop.xlane.xlu0 %3115  ;;  %v3227_v35 = vmul.f32 1.442695, %v3186_v20 }
 0x3c7   :  { %5760 = vmatprep.subr.bf16.mxu0 %v7808_v5  ;;  %v3188_v7 = vsub.f32 %v6873_v41, %v3116_v32 }
 0x3c9   :  { %v5943_v43 = vpop.eup %5942  ;;  %v3231_v19 = vmul.f32 1.442695, %v3188_v7 }
 0x3ca   :  { %v3122_v30 = vpop.xlane.xlu0 %3121  ;;  %v3291_v47 = vsel %vm3080_vm3, %v5943_v43, 0.0  ;;  %v5945_v14 = vpop.eup %5944 }
 0x3cb   :  { %3292 = vadd.xlane.f32.xlu1 %v3291_v47  ;;  %v3285_v1 = vsel %vm3080_vm3, %v5945_v14, 0.0  ;;  %v3190_v10 = vsub.f32 %v6893_v13, %v3122_v30 }
 0x3cd   :  { %v5947_v52 = vpop.eup %5946  ;;  %v3235_v47 = vmul.f32 1.442695, %v3190_v10 }
 0x3ce   :  { %v3128_v11 = vpop.xlane.xlu0 %3127  ;;  %v3294_v9 = vsel %vm3080_vm3, %v5947_v52, 0.0  ;;  %v3372_v22 = vpack.c.bf16 %v5947_v52, %v5943_v43 }
 0x3cf   :  { %3286 = vadd.xlane.f32.xlu1 %v3285_v1  ;;  %3295 = vadd.xlane.f32.xlu0 %v3294_v9  ;;  %v3192_v51 = vsub.f32 %v6885_v38, %v3128_v11 }
 0x3d0   :  { %5751 = vmatmul.mubr.msk.bf16.vlgmr.msra.gmra.mrb[40].mxu0 %vm3080_vm3, %v3372_v22 }
 0x3d1   :  { %5761 = vmatpush3.bf16.msra.mxu0 %v2277_v61  ;;  %5762 = vmatprep.mubr.msk.bf16.mxu0 %vm6175_vm1, %v7808_v5  ;;  %v3239_v12 = vmul.f32 1.442695, %v3192_v51 }
 0x3d2   :  { %v3134_v62 = vpop.xlane.xlu0 %3133  ;;  %5772 = vmatprep.subr.bf16.mxu0 %v7808_v5 }
 0x3d3   :  { %v3194_v13 = vsub.f32 %v6905_v27, %v3134_v62  ;;  %v7809_v27 = vpack.i.b16 %v6745_v57, %v6717_v18  ;;  %v2216_v18 = vcombine.high %v7021_v23, %v7025_v56 }
 0x3d4   :  { %v3098_v25 = vpop.xlane.xlu1 %3097 }
 0x3d5   :  { %v3182_v3 = vsub.f32 %v6869_v15, %v3098_v25 }
 0x3d6   :  { %v3140_v6 = vpop.xlane.xlu0 %3139 }
 0x3d7   :  { %v3219_v28 = vmul.f32 1.442695, %v3182_v3  ;;  %v3196_v38 = vsub.f32 %v6897_v58, %v3140_v6  ;;  %v2148_v6 = vcombine.high %v7000_v63, %v7003_v33 }
 0x3d8   :  { %v3107_v4 = vpop.xlane.xlu1 %3106 }
 0x3d9   :  { %5948 = vpow2.f32 %v3219_v28  ;;  %v3185_v55 = vsub.f32 %v6877_v50, %v3107_v4  ;;  %v3247_v25 = vmul.f32 1.442695, %v3196_v38  ;;  %v2279_v28 = vshrl.u32 %v7051_v26, 16 }
 0x3da   :  { %5950 = vpow2.f32 %v3231_v19  ;;  %v7068_v15 = vpop.xlane.xlu0 %3145  ;;  %v7114_v10 = vrot.slane %v2148_v6, %v6346_v42 }
 0x3db   :  { %v3225_v41 = vmul.f32 1.442695, %v3185_v55  ;;  %5952 = vpow2.f32 %v3227_v35  ;;  %v2132_v35 = vcombine.high %v6994_v34, %v6997_v16  ;;  %v3198_v56 = vsub.f32 %v6919_v0, %v7068_v15 }
 0x3dc   :  { %v3113_v32 = vpop.xlane.xlu1 %3112 }
 0x3dd   :  { %5954 = vpow2.f32 %v3225_v41  ;;  %v3187_v8 = vsub.f32 %v6871_v40, %v3113_v32  ;;  %v7111_v0 = vrot.slane %v2132_v35, %v6346_v42  ;;  %v3251_v15 = vmul.f32 1.442695, %v3198_v56 }
 0x3de   :  { %v3152_v30 = vpop.xlane.xlu0 %3151 }
 0x3df   :  { %v3229_v43 = vmul.f32 1.442695, %v3187_v8  ;;  %v2165_v38 = vcombine.low %v7111_v0, %v7114_v10 }
 0x3e0   :  { %v3119_v52 = vpop.xlane.xlu1 %3118 }
 0x3e1   :  { %5956 = vpow2.f32 %v3229_v43  ;;  %v3189_v50 = vsub.f32 %v6889_v53, %v3119_v52  ;;  %v2200_v53 = vcombine.high %v7013_v2, %v7018_v60  ;;  %v2280_v60 = vshrl.u32 %v7049_v17, 16 }
 0x3e2   :  { %5958 = vpow2.f32 %v3239_v12  ;;  %v7089_v57 = vpop.xlane.xlu0 %3157  ;;  %v3200_v17 = vsub.f32 %v6909_v59, %v3152_v30  ;;  %v7106_v59 = vrot.slane %v2216_v18, %v6346_v42 }
 0x3e3   :  { %v5949_v1 = vpop.eup %5948  ;;  %v3233_v11 = vmul.f32 1.442695, %v3189_v50  ;;  %5960 = vpow2.f32 %v3235_v47  ;;  %v7097_v4 = vrot.slane %v2200_v53, %v6346_v42  ;;  %v2281_v33 = vpack.i.b16 %v2280_v60, %v2279_v28 }
 0x3e4   :  { %v3125_v9 = vpop.xlane.xlu1 %3124  ;;  %v3288_v40 = vsel %vm3080_vm3, %v5949_v1, 0.0  ;;  %v3371_v22 = vpack.c.bf16 %v5949_v1, %v5945_v14  ;;  %v5951_v61 = vpop.eup %5950  ;;  %v3243_v14 = vmul.f32 1.442695, %v3194_v13  ;;  %v3255_v8 = vmul.f32 1.442695, %v3200_v17 }
 0x3e5   :  { %5962 = vpow2.f32 %v3233_v11  ;;  %v3191_v7 = vsub.f32 %v6883_v36, %v3125_v9  ;;  %3289 = vadd.xlane.f32.xlu0 %v3288_v40  ;;  %v5953_v20 = vpop.eup %5952  ;;  %v3306_v36 = vsel %vm3080_vm3, %v5951_v61, 0.0  ;;  %v3202_v9 = vsub.f32 %v6935_v48, %v7089_v57 }
 0x3e6   :  { %5745 = vmatmul.mubr.msk.bf16.vlgmr.msra.gmra.mrb[40].mxu1 %vm3080_vm3, %v3371_v22  ;;  %v3300_v23 = vsel %vm3080_vm3, %v5953_v20, 0.0  ;;  %v3164_v12 = vpop.xlane.xlu0 %3163  ;;  %v2287_v57 = vshrl.u32 %v2165_v38, 16 }
 0x3e7   :  { %v5955_v58 = vpop.eup %5954  ;;  %v3237_v3 = vmul.f32 1.442695, %v3191_v7  ;;  %5755 = vmatpush3.bf16.msra.mxu1 %v7809_v27  ;;  %5756 = vmatprep.mubr.msk.bf16.mxu1 %vm6175_vm1, %v7808_v5  ;;  %v3204_v13 = vsub.f32 %v6925_v37, %v3164_v12  ;;  %v7810_v27 = vpack.i.b16 %v6764_v29, %v6747_v46 }
 0x3e8   :  { %v3131_v62 = vpop.xlane.xlu1 %3130  ;;  %5766 = vmatprep.subr.bf16.mxu1 %v7808_v5  ;;  %v3373_v19 = vpack.c.bf16 %v5953_v20, %v5955_v58  ;;  %v3297_v52 = vsel %vm3080_vm3, %v5955_v58, 0.0 }
 0x3e9   :  { %5964 = vpow2.f32 %v3237_v3  ;;  %v3193_v2 = vsub.f32 %v6901_v49, %v3131_v62  ;;  %3307 = vadd.xlane.f32.xlu0 %v3306_v36  ;;  %v3263_v3 = vmul.f32 1.442695, %v3204_v13 }
 0x3ea   :  { %5966 = vpow2.f32 %v3247_v25  ;;  %v3170_v37 = vpop.xlane.xlu0 %3169 }
 0x3eb   :  { %v5957_v49 = vpop.eup %5956  ;;  %v3241_v55 = vmul.f32 1.442695, %v3193_v2  ;;  %5968 = vpow2.f32 %v3243_v14  ;;  %v3259_v14 = vmul.f32 1.442695, %v3202_v9  ;;  %v3206_v60 = vsub.f32 %v6951_v44, %v3170_v37 }
 0x3ec   :  { %v3137_v26 = vpop.xlane.xlu1 %3136  ;;  %v3303_v34 = vsel %vm3080_vm3, %v5957_v49, 0.0  ;;  %v3374_v16 = vpack.c.bf16 %v5951_v61, %v5957_v49  ;;  %v5959_v51 = vpop.eup %5958 }
 0x3ed   :  { %5970 = vpow2.f32 %v3241_v55  ;;  %v3195_v63 = vsub.f32 %v6895_v39, %v3137_v26  ;;  %3301 = vadd.xlane.f32.xlu0 %v3300_v23  ;;  %3304 = vadd.xlane.f32.xlu1 %v3303_v34  ;;  %v5961_v41 = vpop.eup %5960  ;;  %v3318_v47 = vsel %vm3080_vm3, %v5959_v51, 0.0  ;;  %v7811_v55 = vld [vmem:[#allocation17_spill] sm:$0xff]  ;;  %v3267_v34 = vmul.f32 1.442695, %v3206_v60 }
 0x3ee   :  { %5757 = vmatmul.mubr.msk.bf16.vlgmr.msra.gmra.mrb[44].mxu1 %vm3080_vm3, %v3373_v19  ;;  %5763 = vmatmul.mubr.msk.bf16.vlgmr.msra.gmra.mrb[44].mxu0 %vm3080_vm3, %v3374_v16  ;;  %v3176_v28 = vpop.xlane.xlu0 %3175  ;;  %v7812_v16 = vld [vmem:[#allocation19_spill] sm:$0xff] }
 0x3ef   :  { %v5963_v32 = vpop.eup %5962  ;;  %v3245_v39 = vmul.f32 1.442695, %v3195_v63  ;;  %5767 = vmatpush3.bf16.msra.mxu1 %v6772_v31  ;;  %5773 = vmatpush3.bf16.msra.mxu0 %v2281_v33  ;;  %v2233_v31 = vcombine.low %v7097_v4, %v7106_v59  ;;  %v7813_v33 = vld [vmem:[#allocation15_spill] sm:$0xff] }
 0x3f0   :  { %v3143_v43 = vpop.xlane.xlu1 %3142  ;;  %5768 = vmatprep.mubr.msk.bf16.mxu1 %vm6175_vm1, %v7808_v5  ;;  %5778 = vmatprep.subr.bf16.mxu1 %v7808_v5  ;;  %v3375_v50 = vpack.c.bf16 %v5961_v41, %v5963_v32  ;;  %v3309_v36 = vsel %vm3080_vm3, %v5963_v32, 0.0 }
 0x3f1   :  { %5972 = vpow2.f32 %v3245_v39  ;;  %v3197_v1 = vsub.f32 %v6915_v24, %v3143_v43  ;;  %3319 = vadd.xlane.f32.xlu0 %v3318_v47  ;;  %3298 = vadd.xlane.f32.xlu1 %v3297_v52  ;;  %v3312_v24 = vsel %vm3080_vm3, %v5961_v41, 0.0  ;;  %v2285_v53 = vpack.i.b16 %v2233_v31, %v2165_v38 }
 0x3f2   :  { %5774 = vmatprep.mubr.msk.bf16.mxu0 %vm6175_vm1, %v7808_v5  ;;  %5784 = vmatprep.subr.bf16.mxu0 %v7808_v5  ;;  %5974 = vpow2.f32 %v3255_v8  ;;  %v2288_v46 = vshrl.u32 %v2233_v31, 16  ;;  %v2234_v43 = vcombine.high %v7097_v4, %v7106_v59  ;;  %v7815_v4 = vld [vmem:[#allocation18_spill] sm:$0xff] }
 0x3f3   :  { %v5965_v11 = vpop.eup %5964  ;;  %v3249_v30 = vmul.f32 1.442695, %v3197_v1  ;;  %5976 = vpow2.f32 %v3251_v15  ;;  %v7814_v15 = vld [vmem:[#allocation20_spill] sm:$0xff]  ;;  %v2166_v1 = vcombine.high %v7111_v0, %v7114_v10  ;;  %v7816_v10 = vld [vmem:[#allocation14_spill] sm:$0xff] }
 0x3f4   :  { %v3149_v40 = vpop.xlane.xlu1 %3148  ;;  %v3315_v22 = vsel %vm3080_vm3, %v5965_v11, 0.0  ;;  %v3376_v61 = vpack.c.bf16 %v5959_v51, %v5965_v11  ;;  %v5967_v7 = vpop.eup %5966  ;;  %v2289_v56 = vpack.i.b16 %v2288_v46, %v2287_v57  ;;  %v3208_v51 = vsub.f32 %v7812_v16, %v3176_v28 }
 0x3f5   :  { %5978 = vpow2.f32 %v3249_v30  ;;  %v3199_v20 = vsub.f32 %v6907_v45, %v3149_v40  ;;  %3313 = vadd.xlane.f32.xlu0 %v3312_v24  ;;  %3316 = vadd.xlane.f32.xlu1 %v3315_v22  ;;  %v5969_v58 = vpop.eup %5968  ;;  %v3330_v45 = vsel %vm3080_vm3, %v5967_v7, 0.0  ;;  %v2293_v24 = vpack.i.b16 %v2234_v43, %v2166_v1  ;;  %v7817_v22 = vld [vmem:[#allocation13_spill] sm:$0xff] }
 0x3f6   :  { %5769 = vmatmul.mubr.msk.bf16.vlgmr.msra.gmra.mrb[48].mxu1 %vm3080_vm3, %v3375_v50  ;;  %5775 = vmatmul.mubr.msk.bf16.vlgmr.msra.gmra.mrb[48].mxu0 %vm3080_vm3, %v3376_v61  ;;  %v3324_v6 = vsel %vm3080_vm3, %v5969_v58, 0.0  ;;  %v3271_v52 = vmul.f32 1.442695, %v3208_v51  ;;  %v7818_v61 = vpack.i.b16 %v7816_v10, %v7817_v22 }
 0x3f7   :  { %v5971_v25 = vpop.eup %5970  ;;  %v3253_v48 = vmul.f32 1.442695, %v3199_v20  ;;  %5779 = vmatpush3.bf16.msra.mxu1 %v7810_v27  ;;  %5785 = vmatpush3.bf16.msra.mxu0 %v2285_v53 }
 0x3f8   :  { %v3155_v62 = vpop.xlane.xlu1 %3154  ;;  %5780 = vmatprep.mubr.msk.bf16.mxu1 %vm6175_vm1, %v7808_v5  ;;  %5790 = vmatprep.subr.bf16.mxu1 %v7808_v5  ;;  %v3377_v19 = vpack.c.bf16 %v5969_v58, %v5971_v25  ;;  %v3321_v8 = vsel %vm3080_vm3, %v5971_v25, 0.0  ;;  %v2296_v58 = vshrl.u32 %v2234_v43, 16  ;;  %v2295_v25 = vshrl.u32 %v2166_v1, 16 }
 0x3f9   :  { %5980 = vpow2.f32 %v3253_v48  ;;  %v3201_v2 = vsub.f32 %v6931_v54, %v3155_v62  ;;  %3331 = vadd.xlane.f32.xlu0 %v3330_v45  ;;  %3310 = vadd.xlane.f32.xlu1 %v3309_v36  ;;  %v7819_v36 = vld [vmem:[#allocation16_spill] sm:$0xff] }
 0x3fa   :  { %5786 = vmatprep.mubr.msk.bf16.mxu0 %vm6175_vm1, %v7808_v5  ;;  %5796 = vmatprep.subr.bf16.mxu0 %v7808_v5  ;;  %5982 = vpow2.f32 %v3263_v3  ;;  %v2297_v62 = vpack.i.b16 %v2296_v58, %v2295_v25 }
 0x3fb   :  { %v5973_v29 = vpop.eup %5972  ;;  %v3257_v18 = vmul.f32 1.442695, %v3201_v2  ;;  %5984 = vpow2.f32 %v3259_v14 }
 0x3fc   :  { %v3161_v35 = vpop.xlane.xlu1 %3160  ;;  %v3327_v54 = vsel %vm3080_vm3, %v5973_v29, 0.0  ;;  %v3378_v49 = vpack.c.bf16 %v5967_v7, %v5973_v29  ;;  %v5975_v17 = vpop.eup %5974 }
 0x3fd   :  { %5986 = vpow2.f32 %v3257_v18  ;;  %v3203_v23 = vsub.f32 %v7811_v55, %v3161_v35  ;;  %3325 = vadd.xlane.f32.xlu0 %v3324_v6  ;;  %3328 = vadd.xlane.f32.xlu1 %v3327_v54  ;;  %v5977_v26 = vpop.eup %5976  ;;  %v3342_v32 = vsel %vm3080_vm3, %v5975_v17, 0.0 }
 0x3fe   :  { %5781 = vmatmul.mubr.msk.bf16.vlgmr.msra.gmra.mrb[52].mxu1 %vm3080_vm3, %v3377_v19  ;;  %5787 = vmatmul.mubr.msk.bf16.vlgmr.msra.gmra.mrb[52].mxu0 %vm3080_vm3, %v3378_v49  ;;  %v3336_v38 = vsel %vm3080_vm3, %v5977_v26, 0.0 }
 0x3ff   :  { %v5979_v44 = vpop.eup %5978  ;;  %v3261_v63 = vmul.f32 1.442695, %v3203_v23  ;;  %5791 = vmatpush3.bf16.msra.mxu1 %v7813_v33  ;;  %5797 = vmatpush3.bf16.msra.mxu0 %v2289_v56 }
 0x400   :  { %v3167_v41 = vpop.xlane.xlu1 %3166  ;;  %5792 = vmatprep.mubr.msk.bf16.mxu1 %vm6175_vm1, %v7808_v5  ;;  %5802 = vmatprep.subr.bf16.mxu1 %v7808_v5  ;;  %v3379_v39 = vpack.c.bf16 %v5977_v26, %v5979_v44  ;;  %v3333_v20 = vsel %vm3080_vm3, %v5979_v44, 0.0 }
 0x401   :  { %5988 = vpow2.f32 %v3261_v63  ;;  %v3205_v12 = vsub.f32 %v7814_v15, %v3167_v41  ;;  %3343 = vadd.xlane.f32.xlu0 %v3342_v32  ;;  %3322 = vadd.xlane.f32.xlu1 %v3321_v8 }
 0x402   :  { %5798 = vmatprep.mubr.msk.bf16.mxu0 %vm6175_vm1, %v7808_v5  ;;  %5808 = vmatprep.subr.bf16.mxu0 %v7808_v5  ;;  %5990 = vpow2.f32 %v3267_v34 }
 0x403   :  { %v5981_v47 = vpop.eup %5980  ;;  %v3265_v50 = vmul.f32 1.442695, %v3205_v12 }
 0x404   :  { %v3173_v31 = vpop.xlane.xlu1 %3172  ;;  %v3339_v11 = vsel %vm3080_vm3, %v5981_v47, 0.0  ;;  %v3380_v13 = vpack.c.bf16 %v5975_v17, %v5981_v47  ;;  %v5983_v30 = vpop.eup %5982 }
 0x405   :  { %5992 = vpow2.f32 %v3265_v50  ;;  %v3207_v59 = vsub.f32 %v7815_v4, %v3173_v31  ;;  %3337 = vadd.xlane.f32.xlu0 %v3336_v38  ;;  %3340 = vadd.xlane.f32.xlu1 %v3339_v11  ;;  %v5985_v9 = vpop.eup %5984  ;;  %v3354_v7 = vsel %vm3080_vm3, %v5983_v30, 0.0 }
 0x406   :  { %5793 = vmatmul.mubr.msk.bf16.vlgmr.msra.gmra.mrb[56].mxu1 %vm3080_vm3, %v3379_v39  ;;  %5799 = vmatmul.mubr.msk.bf16.vlgmr.msra.gmra.mrb[56].mxu0 %vm3080_vm3, %v3380_v13  ;;  %5994 = vpow2.f32 %v3271_v52  ;;  %v3348_v3 = vsel %vm3080_vm3, %v5985_v9, 0.0 }
 0x407   :  { %v5987_v40 = vpop.eup %5986  ;;  %v3269_v0 = vmul.f32 1.442695, %v3207_v59  ;;  %5803 = vmatpush3.bf16.msra.mxu1 %v7818_v61  ;;  %5809 = vmatpush3.bf16.msra.mxu0 %v2293_v24 }
 0x408   :  { %5804 = vmatprep.mubr.msk.bf16.mxu1 %vm6175_vm1, %v7808_v5  ;;  %5814 = vmatprep.subr.bf16.mxu1 %v7808_v5  ;;  %v3381_v53 = vpack.c.bf16 %v5985_v9, %v5987_v40  ;;  %v3345_v2 = vsel %vm3080_vm3, %v5987_v40, 0.0 }
 0x409   :  { %5996 = vpow2.f32 %v3269_v0  ;;  %3355 = vadd.xlane.f32.xlu0 %v3354_v7  ;;  %3334 = vadd.xlane.f32.xlu1 %v3333_v20 }
 0x40a   :  { %5810 = vmatprep.mubr.msk.bf16.mxu0 %vm6175_vm1, %v7808_v5  ;;  %5820 = vmatprep.subr.bf16.mxu0 %v7808_v5 }
 0x40b   :  { %v5989_v37 = vpop.eup %5988 }
 0x40c   :  { %v3351_v48 = vsel %vm3080_vm3, %v5989_v37, 0.0  ;;  %v3382_v27 = vpack.c.bf16 %v5983_v30, %v5989_v37  ;;  %v5991_v14 = vpop.eup %5990 }
 0x40d   :  { %3349 = vadd.xlane.f32.xlu0 %v3348_v3  ;;  %3352 = vadd.xlane.f32.xlu1 %v3351_v48  ;;  %v3360_v19 = vsel %vm3080_vm3, %v5991_v14, 0.0 }
 0x40e   :  { %5805 = vmatmul.mubr.msk.bf16.vlgmr.msra.gmra.mrb[60].mxu1 %vm3080_vm3, %v3381_v53  ;;  %5811 = vmatmul.mubr.msk.bf16.vlgmr.msra.gmra.mrb[60].mxu0 %vm3080_vm3, %v3382_v27 }
 0x40f   :  { %v5993_v45 = vpop.eup %5992  ;;  %5815 = vmatpush3.bf16.msra.mxu1 %v7819_v36  ;;  %5821 = vmatpush3.bf16.msra.mxu0 %v2297_v62 }
 0x410   :  { %5816 = vmatprep.mubr.msk.bf16.mxu1 %vm6175_vm1, %v7808_v5  ;;  %5822 = vmatprep.mubr.msk.bf16.mxu0 %vm6175_vm1, %v7808_v5  ;;  %v3383_v46 = vpack.c.bf16 %v5991_v14, %v5993_v45  ;;  %v5995_v29 = vpop.eup %5994  ;;  %v3357_v57 = vsel %vm3080_vm3, %v5993_v45, 0.0 }
 0x411   :  { %3361 = vadd.xlane.f32.xlu0 %v3360_v19  ;;  %3346 = vadd.xlane.f32.xlu1 %v3345_v2  ;;  %v3366_v18 = vsel %vm3080_vm3, %v5995_v29, 0.0 }
 0x413   :  { %v5997_v60 = vpop.eup %5996 }
 0x414   :  { %v3384_v28 = vpack.c.bf16 %v5995_v29, %v5997_v60  ;;  %v3363_v35 = vsel %vm3080_vm3, %v5997_v60, 0.0 }
 0x415   :  { %3367 = vadd.xlane.f32.xlu0 %v3366_v18  ;;  %3358 = vadd.xlane.f32.xlu1 %v3357_v57 }
 0x416   :  { %5817 = vmatmul.mubr.msk.bf16.vlgmr.msra.gmra.mrb[64].mxu1 %vm3080_vm3, %v3383_v46  ;;  %5823 = vmatmul.mubr.msk.bf16.vlgmr.msra.gmra.mrb[64].mxu0 %vm3080_vm3, %v3384_v28 }
 0x419   :  { %3364 = vadd.xlane.f32.xlu1 %v3363_v35 }
 0x440   :  { %v3278_v5 = vpop.xlane.xlu0 %3277  ;;  %v3275_v54 = vpop.xlane.xlu1 %3274 }
 0x441   :  { %5998 = vrcp.f32 %v3275_v54 }
 0x442   :  { %6000 = vrcp.f32 %v3278_v5 }
 0x44b   :  { %v5999_v10 = vpop.eup %5998 }
 0x44c   :  { %v6001_v22 = vpop.eup %6000 }
 0x44f   :  { %v3281_v17 = vpop.xlane.xlu1 %3280 }
 0x450   :  { %6002 = vrcp.f32 %v3281_v17 }
 0x451   :  { %v3284_v6 = vpop.xlane.xlu0 %3283 }
 0x452   :  { %6004 = vrcp.f32 %v3284_v6 }
 0x458   :  { %v3293_v23 = vpop.xlane.xlu1 %3292 }
 0x459   :  { %6006 = vrcp.f32 %v3293_v23 }
 0x45a   :  { %v6003_v7 = vpop.eup %6002 }
 0x45c   :  { %v3296_v49 = vpop.xlane.xlu0 %3295  ;;  %v3287_v26 = vpop.xlane.xlu1 %3286 }
 0x45d   :  { %6008 = vrcp.f32 %v3296_v49  ;;  %v6005_v53 = vpop.eup %6004 }
 0x45e   :  { %6010 = vrcp.f32 %v3287_v26 }
 0x463   :  { %v7215_v58 = vpop.eup %6006 }
 0x467   :  { %v7217_v37 = vpop.eup %6008 }
 0x468   :  { %v7219_v25 = vpop.eup %6010 }
 0x472   :  { %v3290_v55 = vpop.xlane.xlu0 %3289 }
 0x473   :  { %6012 = vrcp.f32 %v3290_v55 }
 0x476   :  { %v3308_v56 = vpop.xlane.xlu0 %3307 }
 0x477   :  { %6014 = vrcp.f32 %v3308_v56 }
 0x47a   :  { %v3302_v44 = vpop.xlane.xlu0 %3301  ;;  %v3305_v34 = vpop.xlane.xlu1 %3304 }
 0x47b   :  { %6016 = vrcp.f32 %v3302_v44 }
 0x47c   :  { %6018 = vrcp.f32 %v3305_v34 }
 0x47d   :  { %v7221_v3 = vpop.eup %6012 }
 0x47e   :  { %v3320_v63 = vpop.xlane.xlu0 %3319  ;;  %v3299_v41 = vpop.xlane.xlu1 %3298 }
 0x47f   :  { %6020 = vrcp.f32 %v3320_v63 }
 0x480   :  { %6022 = vrcp.f32 %v3299_v41 }
 0x481   :  { %v6015_v14 = vpop.eup %6014 }
 0x482   :  { %v3314_v8 = vpop.xlane.xlu0 %3313  ;;  %v3317_v39 = vpop.xlane.xlu1 %3316 }
 0x483   :  { %6024 = vrcp.f32 %v3314_v8 }
 0x484   :  { %6026 = vrcp.f32 %v3317_v39 }
 0x485   :  { %v6017_v36 = vpop.eup %6016 }
 0x486   :  { %v3332_v15 = vpop.xlane.xlu0 %3331  ;;  %v3311_v12 = vpop.xlane.xlu1 %3310 }
 0x487   :  { %v7203_v16 = vpop.f32.mrb[36].mxu1  ;;  %6028 = vrcp.f32 %v3332_v15  ;;  %v6019_v2 = vpop.eup %6018 }
 0x488   :  { %v5734_v51 = vpop.f32.mrb[37].mxu1  ;;  %6030 = vrcp.f32 %v3311_v12  ;;  %v4090_v6 = vmul.f32 %v5999_v10, %v7203_v16 }
 0x489   :  { %v7205_v33 = vpop.f32.mrb[38].mxu1  ;;  %v7225_v29 = vpop.eup %6020 }
 0x48a   :  { %v5735_v32 = vpop.f32.mrb[39].mxu1  ;;  %v3326_v50 = vpop.xlane.xlu0 %3325  ;;  %v4092_v51 = vmul.f32 %v6001_v22, %v7205_v33 }
 0x48b   :  { %v3329_v31 = vpop.xlane.xlu1 %3328  ;;  %6032 = vrcp.f32 %v3326_v50  ;;  %v6023_v60 = vpop.eup %6022 }
 0x48c   :  { %6034 = vrcp.f32 %v3329_v31 }
 0x48d   :  { %v7227_v18 = vpop.eup %6024 }
 0x48e   :  { %v3344_v38 = vpop.xlane.xlu0 %3343  ;;  %v6027_v57 = vpop.eup %6026 }
 0x48f   :  { %v3323_v11 = vpop.xlane.xlu1 %3322  ;;  %6036 = vrcp.f32 %v3344_v38 }
 0x490   :  { %6038 = vrcp.f32 %v3323_v11 }
 0x491   :  { %v7229_v5 = vpop.eup %6028 }
 0x492   :  { %v3338_v59 = vpop.xlane.xlu0 %3337  ;;  %v6031_v17 = vpop.eup %6030 }
 0x493   :  { %v3341_v9 = vpop.xlane.xlu1 %3340  ;;  %6040 = vrcp.f32 %v3338_v59 }
 0x494   :  { %6042 = vrcp.f32 %v3341_v9 }
 0x495   :  { %v7233_v34 = vpop.eup %6032 }
 0x496   :  { %v3356_v40 = vpop.xlane.xlu0 %3355  ;;  %v7236_v32 = vpop.eup %6034 }
 0x497   :  { %v3335_v0 = vpop.xlane.xlu1 %3334  ;;  %6044 = vrcp.f32 %v3356_v40 }
 0x498   :  { %v7207_v43 = vpop.f32.mrb[36].mxu0  ;;  %6046 = vrcp.f32 %v3335_v0 }
 0x499   :  { %v5740_v47 = vpop.f32.mrb[37].mxu0  ;;  %v4094_v55 = vmul.f32 %v6003_v7, %v7207_v43 }
 0x49a   :  { %v7209_v52 = vpop.f32.mrb[38].mxu0  ;;  %v3350_v61 = vpop.xlane.xlu0 %3349 }
 0x49b   :  { %v5741_v1 = vpop.f32.mrb[39].mxu0  ;;  %v3353_v20 = vpop.xlane.xlu1 %3352  ;;  %6048 = vrcp.f32 %v3350_v61  ;;  %v4096_v50 = vmul.f32 %v6005_v53, %v7209_v52 }
 0x49c   :  { %6050 = vrcp.f32 %v3353_v20  ;;  %v7238_v47 = vpop.eup %6036 }
 0x49d   :  { %v7241_v38 = vpop.eup %6038 }
 0x49e   :  { %v3362_v48 = vpop.xlane.xlu0 %3361  ;;  %v7243_v11 = vpop.eup %6040 }
 0x49f   :  { %v3347_v62 = vpop.xlane.xlu1 %3346  ;;  %6052 = vrcp.f32 %v3362_v48  ;;  %v7245_v40 = vpop.eup %6042 }
 0x4a0   :  { %6054 = vrcp.f32 %v3347_v62 }
 0x4a1   :  { %v7249_v52 = vpop.eup %6044 }
 0x4a2   :  { %v3368_v28 = vpop.xlane.xlu0 %3367  ;;  %v7260_v53 = vpop.eup %6046 }
 0x4a3   :  { %v7211_v13 = vpop.f32.mrb[40].mxu0  ;;  %v3359_v35 = vpop.xlane.xlu1 %3358  ;;  %6056 = vrcp.f32 %v3368_v28 }
 0x4a4   :  { %v5752_v30 = vpop.f32.mrb[41].mxu0  ;;  %6058 = vrcp.f32 %v3359_v35  ;;  %v4102_v0 = vmul.f32 %v7215_v58, %v7211_v13 }
 0x4a5   :  { %v7213_v4 = vpop.f32.mrb[42].mxu0 }
 0x4a6   :  { %v5753_v24 = vpop.f32.mrb[43].mxu0  ;;  %v7253_v10 = vmul.f32 %v7217_v37, %v7213_v4  ;;  %v7264_v37 = vpop.eup %6048 }
 0x4a7   :  { %v3365_v33 = vpop.xlane.xlu1 %3364 }
 0x4a8   :  { %6060 = vrcp.f32 %v3365_v33 }
 0x4b9   :  { %v7223_v27 = vpop.f32.mrb[40].mxu1 }
 0x4ba   :  { %v5746_v45 = vpop.f32.mrb[41].mxu1  ;;  %v4098_v22 = vmul.f32 %v7219_v25, %v7223_v27 }
 0x4bb   :  { %v3513_v19 = vpop.f32.mrb[42].mxu1 }
 0x4bc   :  { %v5747_v46 = vpop.f32.mrb[43].mxu1  ;;  %v7258_v61 = vmul.f32 %v7221_v3, %v3513_v19 }
 0x4c1   :  { %v3598_v54 = vpop.f32.mrb[44].mxu1  ;;  %v3642_v49 = vpop.f32.mrb[44].mxu0 }
 0x4c2   :  { %v4106_v23 = vmul.f32 %v6023_v60, %v3598_v54  ;;  %v4110_v56 = vmul.f32 %v6019_v2, %v3642_v49  ;;  %v5758_v26 = vpop.f32.mrb[45].mxu1  ;;  %v5764_v44 = vpop.f32.mrb[45].mxu0 }
 0x4c3   :  { %v3601_v63 = vpop.f32.mrb[46].mxu1  ;;  %v3645_v41 = vpop.f32.mrb[46].mxu0 }
 0x4c4   :  { %v4153_v16 = vcombine.low %v4090_v6, %v4106_v23  ;;  %v4154_v8 = vcombine.high %v4090_v6, %v4106_v23  ;;  %v4425_v39 = vcombine.low %v4094_v55, %v4110_v56  ;;  %v4426_v15 = vcombine.high %v4094_v55, %v4110_v56  ;;  %v5759_v12 = vpop.f32.mrb[47].mxu1  ;;  %v5765_v43 = vpop.f32.mrb[47].mxu0 }
 0x4c5   :  { %v4108_v1 = vmul.f32 %v6017_v36, %v3601_v63  ;;  %v4112_v31 = vmul.f32 %v6015_v14, %v3645_v41  ;;  %v7274_v2 = vpop.eup %6050 }
 0x4c6   :  { %v4161_v48 = vrot.slane %v4153_v16, %v6332_v21  ;;  %v4168_v13 = vrot.slane %v4154_v8, %v6332_v21  ;;  %v4433_v45 = vrot.slane %v4425_v39, %v6332_v21  ;;  %v4440_v25 = vrot.slane %v4426_v15, %v6332_v21  ;;  %v7276_v54 = vpop.eup %6052 }
 0x4c7   :  { %v4289_v30 = vcombine.low %v4092_v51, %v4108_v1  ;;  %v4290_v59 = vcombine.high %v4092_v51, %v4108_v1  ;;  %v4561_v24 = vcombine.low %v4096_v50, %v4112_v31  ;;  %v4562_v9 = vcombine.high %v4096_v50, %v4112_v31  ;;  %v7290_v63 = vpop.eup %6054 }
 0x4c8   :  { %v7296_v39 = vpop.eup %6056 }
 0x4c9   :  { %v3686_v7 = vpop.f32.mrb[48].mxu1  ;;  %v3730_v20 = vpop.f32.mrb[48].mxu0  ;;  %v7269_v3 = vrot.slane %v4289_v30, %v6332_v21  ;;  %v7272_v27 = vrot.slane %v4290_v59, %v6332_v21  ;;  %v7279_v49 = vrot.slane %v4561_v24, %v6332_v21 }
 0x4ca   :  { %v4114_v58 = vmul.f32 %v6031_v17, %v3686_v7  ;;  %v4118_v14 = vmul.f32 %v6027_v57, %v3730_v20  ;;  %v5770_v62 = vpop.f32.mrb[49].mxu1  ;;  %v5776_v4 = vpop.f32.mrb[49].mxu0  ;;  %v7282_v17 = vrot.slane %v4562_v9, %v6332_v21 }
 0x4cb   :  { %v3689_v36 = vpop.f32.mrb[50].mxu1  ;;  %v3733_v19 = vpop.f32.mrb[50].mxu0 }
 0x4cc   :  { %v4169_v46 = vcombine.low %v4098_v22, %v4114_v58  ;;  %v4170_v60 = vcombine.high %v4098_v22, %v4114_v58  ;;  %v4441_v57 = vcombine.low %v4102_v0, %v4118_v14  ;;  %v4442_v28 = vcombine.high %v4102_v0, %v4118_v14  ;;  %v5771_v35 = vpop.f32.mrb[51].mxu1  ;;  %v5777_v6 = vpop.f32.mrb[51].mxu0 }
 0x4cd   :  { %v4116_v55 = vmul.f32 %v7227_v18, %v3689_v36  ;;  %v4120_v23 = vmul.f32 %v7225_v29, %v3733_v19  ;;  %v7298_v24 = vpop.eup %6058 }
 0x4ce   :  { %v4177_v56 = vrot.slane %v4169_v46, %v6332_v21  ;;  %v4184_v26 = vrot.slane %v4170_v60, %v6332_v21  ;;  %v4449_v44 = vrot.slane %v4441_v57, %v6332_v21  ;;  %v4456_v51 = vrot.slane %v4442_v28, %v6332_v21  ;;  %v7312_v20 = vpop.eup %6060 }
 0x4cf   :  { %v4305_v41 = vcombine.low %v7258_v61, %v4116_v55  ;;  %v4306_v16 = vcombine.high %v7258_v61, %v4116_v55  ;;  %v4577_v8 = vcombine.low %v7253_v10, %v4120_v23  ;;  %v4578_v18 = vcombine.high %v7253_v10, %v4120_v23 }
 0x4d0   :  { %v4217_v29 = vcombine.low %v4161_v48, %v4177_v56  ;;  %v4218_v15 = vcombine.high %v4161_v48, %v4177_v56  ;;  %v4233_v12 = vcombine.low %v4168_v13, %v4184_v26  ;;  %v4234_v43 = vcombine.high %v4168_v13, %v4184_v26 }
 0x4d1   :  { %v4489_v50 = vcombine.low %v4433_v45, %v4449_v44  ;;  %v4490_v1 = vcombine.high %v4433_v45, %v4449_v44  ;;  %v4505_v31 = vcombine.low %v4440_v25, %v4456_v51  ;;  %v4506_v33 = vcombine.high %v4440_v25, %v4456_v51  ;;  %v3774_v30 = vpop.f32.mrb[52].mxu1  ;;  %v3818_v59 = vpop.f32.mrb[52].mxu0 }
 0x4d2   :  { %v7301_v9 = vrot.slane %v4217_v29, %v6346_v42  ;;  %v7304_v0 = vrot.slane %v4218_v15, %v6346_v42  ;;  %v7307_v10 = vrot.slane %v4233_v12, %v6346_v42  ;;  %v7310_v22 = vrot.slane %v4234_v43, %v6346_v42  ;;  %v5782_v61 = vpop.f32.mrb[53].mxu1  ;;  %v5788_v7 = vpop.f32.mrb[53].mxu0 }
 0x4d3   :  { %v7315_v48 = vrot.slane %v4489_v50, %v6346_v42  ;;  %v7318_v13 = vrot.slane %v4490_v1, %v6346_v42  ;;  %v7321_v58 = vrot.slane %v4505_v31, %v6346_v42  ;;  %v7324_v14 = vrot.slane %v4506_v33, %v6346_v42  ;;  %v3777_v62 = vpop.f32.mrb[54].mxu1  ;;  %v3821_v4 = vpop.f32.mrb[54].mxu0 }
 0x4d4   :  { %v5529_v45 = vcombine.low %v7301_v9, %v7304_v0  ;;  %v5531_v25 = vcombine.high %v7301_v9, %v7304_v0  ;;  %v5533_v36 = vcombine.low %v7307_v10, %v7310_v22  ;;  %v5535_v19 = vcombine.high %v7307_v10, %v7310_v22  ;;  %v5783_v46 = vpop.f32.mrb[55].mxu1  ;;  %v5789_v60 = vpop.f32.mrb[55].mxu0 }
 0x4d5   :  { %v5545_v57 = vcombine.low %v7315_v48, %v7318_v13  ;;  %v5547_v28 = vcombine.high %v7315_v48, %v7318_v13  ;;  %v5549_v35 = vcombine.low %v7321_v58, %v7324_v14  ;;  %v5551_v6 = vcombine.high %v7321_v58, %v7324_v14 }
 0x4d6   :  { %v4313_v55 = vrot.slane %v4305_v41, %v6332_v21  ;;  %v4320_v23 = vrot.slane %v4306_v16, %v6332_v21  ;;  %v4585_v56 = vrot.slane %v4577_v8, %v6332_v21  ;;  %v4592_v26 = vrot.slane %v4578_v18, %v6332_v21 }
 0x4d7   :  { %v7347_v44 = vmul.f32 %v7241_v38, %v3774_v30  ;;  %v7350_v51 = vmul.f32 %v7236_v32, %v3818_v59  ;;  %v7353_v29 = vmul.f32 %v7233_v34, %v3777_v62  ;;  %v7356_v15 = vmul.f32 %v7229_v5, %v3821_v4 }
 0x4d8   :  { %v4353_v41 = vcombine.low %v7269_v3, %v4313_v55  ;;  %v4354_v16 = vcombine.high %v7269_v3, %v4313_v55  ;;  %v4369_v8 = vcombine.low %v7272_v27, %v4320_v23  ;;  %v4370_v18 = vcombine.high %v7272_v27, %v4320_v23 }
 0x4d9   :  { %v4625_v38 = vcombine.low %v7279_v49, %v4585_v56  ;;  %v4626_v12 = vcombine.high %v7279_v49, %v4585_v56  ;;  %v4641_v32 = vcombine.low %v7282_v17, %v4592_v26  ;;  %v4642_v34 = vcombine.high %v7282_v17, %v4592_v26  ;;  %v3862_v43 = vpop.f32.mrb[56].mxu1  ;;  %v3906_v50 = vpop.f32.mrb[56].mxu0 }
 0x4da   :  { %v4361_v5 = vrot.slane %v4353_v41, %v6346_v42  ;;  %v4368_v1 = vrot.slane %v4354_v16, %v6346_v42  ;;  %v4377_v3 = vrot.slane %v4369_v8, %v6346_v42  ;;  %v4384_v31 = vrot.slane %v4370_v18, %v6346_v42  ;;  %v5794_v33 = vpop.f32.mrb[57].mxu1  ;;  %v5800_v27 = vpop.f32.mrb[57].mxu0 }
 0x4db   :  { %v7371_v30 = vrot.slane %v4625_v38, %v6346_v42  ;;  %v7374_v49 = vrot.slane %v4626_v12, %v6346_v42  ;;  %v7377_v17 = vrot.slane %v4641_v32, %v6346_v42  ;;  %v7380_v59 = vrot.slane %v4642_v34, %v6346_v42  ;;  %v3865_v9 = vpop.f32.mrb[58].mxu1  ;;  %v3909_v0 = vpop.f32.mrb[58].mxu0 }
 0x4dc   :  { %v5537_v10 = vcombine.low %v4361_v5, %v4368_v1  ;;  %v5539_v22 = vcombine.high %v4361_v5, %v4368_v1  ;;  %v5541_v61 = vcombine.low %v4377_v3, %v4384_v31  ;;  %v5543_v7 = vcombine.high %v4377_v3, %v4384_v31  ;;  %v5795_v48 = vpop.f32.mrb[59].mxu1  ;;  %v5801_v13 = vpop.f32.mrb[59].mxu0 }
 0x4dd   :  { %v5553_v62 = vcombine.low %v7371_v30, %v7374_v49  ;;  %v5555_v4 = vcombine.high %v7371_v30, %v7374_v49  ;;  %v5557_v46 = vcombine.low %v7377_v17, %v7380_v59  ;;  %v5559_v60 = vcombine.high %v7377_v17, %v7380_v59 }
 0x4de   :  { %v7391_v55 = vmul.f32 %v7260_v53, %v3862_v43  ;;  %v7394_v23 = vmul.f32 %v7245_v40, %v3906_v50  ;;  %v7397_v56 = vmul.f32 %v7243_v11, %v3865_v9  ;;  %v7400_v26 = vmul.f32 %v7238_v47, %v3909_v0 }
 0x4df   :  { %v7403_v41 = vrot.slane %v5529_v45, %v6332_v21  ;;  %v7406_v16 = vrot.slane %v5531_v25, %v6332_v21  ;;  %v7409_v8 = vrot.slane %v5533_v36, %v6332_v21  ;;  %v7412_v53 = vrot.slane %v5535_v19, %v6332_v21 }
 0x4e0   :  { %v7415_v40 = vrot.slane %v5537_v10, %v6332_v21  ;;  %v7418_v11 = vrot.slane %v5539_v22, %v6332_v21  ;;  %v7421_v47 = vrot.slane %v5541_v61, %v6332_v21  ;;  %v7424_v45 = vrot.slane %v5543_v7, %v6332_v21 }
 0x4e1   :  { %v3950_v25 = vpop.f32.mrb[60].mxu1  ;;  %v3994_v18 = vpop.f32.mrb[60].mxu0  ;;  %v4761_v36 = vcombine.low %v7403_v41, %v7406_v16  ;;  %v4793_v19 = vcombine.low %v7409_v8, %v7412_v53  ;;  %v7431_v38 = vrot.slane %v5545_v57, %v6332_v21  ;;  %v7434_v12 = vrot.slane %v5547_v28, %v6332_v21 }
 0x4e2   :  { %v4138_v32 = vmul.f32 %v7290_v63, %v3950_v25  ;;  %v4142_v34 = vmul.f32 %v7274_v2, %v3994_v18  ;;  %v5806_v43 = vpop.f32.mrb[61].mxu1  ;;  %v4897_v50 = vcombine.low %v7415_v40, %v7418_v11  ;;  %v4929_v5 = vcombine.low %v7421_v47, %v7424_v45  ;;  %v5812_v1 = vpop.f32.mrb[61].mxu0 }
 0x4e3   :  { %v7443_v3 = vrot.slane %v4761_v36, %v6346_v42  ;;  %v7446_v57 = vrot.slane %v4793_v19, %v6346_v42  ;;  %v7452_v63 = vrot.slane %v5549_v35, %v6332_v21  ;;  %v7458_v2 = vrot.slane %v5551_v6, %v6332_v21  ;;  %v3953_v28 = vpop.f32.mrb[62].mxu1  ;;  %v3997_v31 = vpop.f32.mrb[62].mxu0 }
 0x4e4   :  { %v4185_v33 = vcombine.low %v7347_v44, %v4138_v32  ;;  %v4186_v27 = vcombine.high %v7347_v44, %v4138_v32  ;;  %v4457_v30 = vcombine.low %v7350_v51, %v4142_v34  ;;  %v4458_v49 = vcombine.high %v7350_v51, %v4142_v34  ;;  %v5807_v17 = vpop.f32.mrb[63].mxu1  ;;  %v5813_v59 = vpop.f32.mrb[63].mxu0 }
 0x4e5   :  { %v4826_v35 = vcombine.high %v7443_v3, %v7446_v57  ;;  %v7467_v9 = vrot.slane %v4897_v50, %v6346_v42  ;;  %v7470_v58 = vrot.slane %v4929_v5, %v6346_v42  ;;  %v4825_v14 = vcombine.low %v7443_v3, %v7446_v57 }
 0x4e6   :  { %v7475_v6 = vrot.slane %v4185_v33, %v6332_v21  ;;  %v7478_v44 = vrot.slane %v4186_v27, %v6332_v21  ;;  %v7481_v51 = vrot.slane %v4457_v30, %v6332_v21  ;;  %v7484_v0 = vrot.slane %v4458_v49, %v6332_v21 }
 0x4e7   :  { %v4961_v10 = vcombine.low %v7467_v9, %v7470_v58  ;;  %v4962_v22 = vcombine.high %v7467_v9, %v7470_v58  ;;  %v5033_v61 = vcombine.low %v7431_v38, %v7434_v12  ;;  %v5065_v7 = vcombine.low %v7452_v63, %v7458_v2 }
 0x4e8   :  { %v7495_v48 = vrot.slane %v5553_v62, %v6332_v21  ;;  %v7498_v13 = vrot.slane %v5555_v4, %v6332_v21  ;;  %v7501_v25 = vrot.slane %v5557_v46, %v6332_v21  ;;  %v7504_v18 = vrot.slane %v5559_v60, %v6332_v21 }
 0x4e9   :  { %v5864_v36 = vpack.i.bf16 %v4962_v22, %v4826_v35  ;;  %v7507_v19 = vrot.slane %v5033_v61, %v6346_v42  ;;  %v7510_v32 = vrot.slane %v5065_v7, %v6346_v42  ;;  %v4140_v34 = vmul.f32 %v7264_v37, %v3953_v28  ;;  %v4038_v62 = vpop.f32.mrb[64].mxu1  ;;  %v4082_v43 = vpop.f32.mrb[64].mxu0 }
 0x4ea   :  { %v5169_v4 = vcombine.low %v7495_v48, %v7498_v13  ;;  %v5201_v46 = vcombine.low %v7501_v25, %v7504_v18  ;;  %v4144_v60 = vmul.f32 %v7249_v52, %v3997_v31  ;;  %v4762_v50 = vcombine.high %v7403_v41, %v7406_v16  ;;  %v5818_v5 = vpop.f32.mrb[65].mxu1  ;;  %v5824_v1 = vpop.f32.mrb[65].mxu0 }
 0x4eb   :  { %5865 = vrot.lane.b32.xlu1 %v5864_v36, %s6161_s13  ;;  %v5097_v37 = vcombine.low %v7507_v19, %v7510_v32  ;;  %v5098_v28 = vcombine.high %v7507_v19, %v7510_v32  ;;  %v4321_v33 = vcombine.low %v7353_v29, %v4140_v34  ;;  %v4322_v27 = vcombine.high %v7353_v29, %v4140_v34  ;;  %v7527_v30 = vpop.f32.mrb[66].mxu1  ;;  %v7529_v52 = vpop.f32.mrb[66].mxu0 }
 0x4ec   :  { %v7532_v41 = vrot.slane %v5169_v4, %v6346_v42  ;;  %v7535_v16 = vrot.slane %v5201_v46, %v6346_v42  ;;  %v4593_v31 = vcombine.low %v7356_v15, %v4144_v60  ;;  %v4594_v49 = vcombine.high %v7356_v15, %v4144_v60  ;;  %v5819_v17 = vpop.f32.mrb[67].mxu1  ;;  %v5825_v59 = vpop.f32.mrb[67].mxu0 }
 0x4ed   :  { %v7540_v35 = vrot.slane %v4321_v33, %v6332_v21  ;;  %v7543_v29 = vrot.slane %v4322_v27, %v6332_v21  ;;  %v4776_v22 = vrot.slane %v4762_v50, %v6346_v42  ;;  %v4794_v61 = vcombine.high %v7409_v8, %v7412_v53 }
 0x4ee   :  { %v5234_v7 = vcombine.high %v7532_v41, %v7535_v16  ;;  %v5233_v36 = vcombine.low %v7532_v41, %v7535_v16  ;;  %v7553_v15 = vrot.slane %v4593_v31, %v6332_v21  ;;  %v7556_v34 = vrot.slane %v4594_v49, %v6332_v21 }
 0x4ef   :  { %v4808_v4 = vrot.slane %v4794_v61, %v6346_v42  ;;  %v4898_v46 = vcombine.high %v7415_v40, %v7418_v11  ;;  %v4930_v8 = vcombine.high %v7421_v47, %v7424_v45  ;;  %v4146_v53 = vmul.f32 %v7298_v24, %v4038_v62 }
 0x4f0   :  { %v5869_v60 = vpack.i.bf16 %v5234_v7, %v5098_v28  ;;  %v4150_v50 = vmul.f32 %v7312_v20, %v4082_v43  ;;  %v5034_v5 = vcombine.high %v7431_v38, %v7434_v12  ;;  %v5066_v1 = vcombine.high %v7452_v63, %v7458_v2 }
 0x4f1   :  { %v4827_v33 = vcombine.low %v4776_v22, %v4808_v4  ;;  %v4912_v27 = vrot.slane %v4898_v46, %v6346_v42  ;;  %v4944_v31 = vrot.slane %v4930_v8, %v6346_v42  ;;  %v4828_v40 = vcombine.high %v4776_v22, %v4808_v4 }
 0x4f2   :  { %5870 = vrot.lane.b32.xlu0 %v5869_v60, %s6161_s13  ;;  %v4201_v11 = vcombine.low %v7391_v55, %v4146_v53  ;;  %v4202_v24 = vcombine.high %v7391_v55, %v4146_v53  ;;  %v4473_v20 = vcombine.low %v7394_v23, %v4150_v50  ;;  %v4474_v47 = vcombine.high %v7394_v23, %v4150_v50 }
 0x4f3   :  { %v4963_v45 = vcombine.low %v4912_v27, %v4944_v31  ;;  %v4964_v38 = vcombine.high %v4912_v27, %v4944_v31  ;;  %v7577_v12 = vrot.slane %v5034_v5, %v6346_v42  ;;  %v7580_v63 = vrot.slane %v5066_v1, %v6346_v42 }
 0x4f4   :  { %v4209_v2 = vrot.slane %v4201_v11, %v6332_v21  ;;  %v4216_v62 = vrot.slane %v4202_v24, %v6332_v21  ;;  %v4481_v43 = vrot.slane %v4473_v20, %v6332_v21  ;;  %v4488_v55 = vrot.slane %v4474_v47, %v6332_v21 }
 0x4f5   :  { %v5874_v28 = vpack.i.bf16 %v4963_v45, %v4827_v33  ;;  %v5884_v49 = vpack.i.bf16 %v4964_v38, %v4828_v40  ;;  %v5099_v23 = vcombine.low %v7577_v12, %v7580_v63  ;;  %v5170_v17 = vcombine.high %v7495_v48, %v7498_v13 }
 0x4f6   :  { %v4249_v59 = vcombine.low %v7475_v6, %v4209_v2  ;;  %v4250_v22 = vcombine.high %v7475_v6, %v4209_v2  ;;  %v4265_v61 = vcombine.low %v7478_v44, %v4216_v62  ;;  %v4266_v7 = vcombine.high %v7478_v44, %v4216_v62 }
 0x4f7   :  { %5875 = vrot.lane.b32.xlu1 %v5874_v28, %s6158_s26  ;;  %5885 = vrot.lane.b32.xlu0 %v5884_v49, %s6176_s9  ;;  %v4521_v4 = vcombine.low %v7481_v51, %v4481_v43  ;;  %v4522_v46 = vcombine.high %v7481_v51, %v4481_v43  ;;  %v4537_v8 = vcombine.low %v7484_v0, %v4488_v55 }
 0x4f8   :  { %v4257_v48 = vrot.slane %v4249_v59, %v6346_v42  ;;  %v4264_v13 = vrot.slane %v4250_v22, %v6346_v42  ;;  %v4273_v6 = vrot.slane %v4265_v61, %v6346_v42  ;;  %v4280_v53 = vrot.slane %v4266_v7, %v6346_v42 }
 0x4f9   :  { %v4529_v44 = vrot.slane %v4521_v4, %v6346_v42  ;;  %v4536_v60 = vrot.slane %v4522_v46, %v6346_v42  ;;  %v4538_v50 = vcombine.high %v7484_v0, %v4488_v55  ;;  %v4545_v5 = vrot.slane %v4537_v8, %v6346_v42 }
 0x4fa   :  { %v5530_v1 = vcombine.low %v4257_v48, %v4264_v13  ;;  %v5532_v51 = vcombine.high %v4257_v48, %v4264_v13  ;;  %v5534_v33 = vcombine.low %v4273_v6, %v4280_v53  ;;  %v5536_v27 = vcombine.high %v4273_v6, %v4280_v53 }
 0x4fb   :  { %v4552_v31 = vrot.slane %v4538_v50, %v6346_v42  ;;  %v5546_v40 = vcombine.low %v4529_v44, %v4536_v60  ;;  %v5548_v11 = vcombine.high %v4529_v44, %v4536_v60  ;;  %v5184_v24 = vrot.slane %v5170_v17, %v6346_v42 }
 0x4fc   :  { %v7610_v20 = vrot.slane %v5530_v1, %v6332_v21  ;;  %v7613_v47 = vrot.slane %v5532_v51, %v6332_v21  ;;  %v7616_v0 = vrot.slane %v5534_v33, %v6332_v21  ;;  %v7619_v45 = vrot.slane %v5536_v27, %v6332_v21 }
 0x4fd   :  { %v7622_v38 = vrot.slane %v5546_v40, %v6332_v21  ;;  %v7625_v2 = vrot.slane %v5548_v11, %v6332_v21  ;;  %v5550_v62 = vcombine.low %v4545_v5, %v4552_v31  ;;  %v5552_v43 = vcombine.high %v4545_v5, %v4552_v31 }
 0x4fe   :  { %v5202_v55 = vcombine.high %v7501_v25, %v7504_v18  ;;  %v4148_v28 = vmul.f32 %v7276_v54, %v7527_v30  ;;  %v4152_v49 = vmul.f32 %v7296_v39, %v7529_v52  ;;  %v5100_v17 = vcombine.high %v7577_v12, %v7580_v63 }
 0x4ff   :  { %v7636_v59 = vrot.slane %v5550_v62, %v6332_v21  ;;  %v7639_v22 = vrot.slane %v5552_v43, %v6332_v21  ;;  %v4777_v61 = vcombine.low %v7610_v20, %v7613_v47  ;;  %v4809_v25 = vcombine.low %v7616_v0, %v7619_v45 }
 0x500   :  { %v5216_v54 = vrot.slane %v5202_v55, %v6346_v42  ;;  %v4337_v18 = vcombine.low %v7397_v56, %v4148_v28  ;;  %v4338_v39 = vcombine.high %v7397_v56, %v4148_v28  ;;  %v4609_v30 = vcombine.low %v7400_v26, %v4152_v49 }
 0x501   :  { %v4610_v52 = vcombine.high %v7400_v26, %v4152_v49  ;;  %v7651_v12 = vrot.slane %v4777_v61, %v6346_v42  ;;  %v7654_v63 = vrot.slane %v4809_v25, %v6346_v42  ;;  %v5049_v7 = vcombine.low %v7622_v38, %v7625_v2 }
 0x502   :  { %v5235_v4 = vcombine.low %v5184_v24, %v5216_v54  ;;  %v4345_v46 = vrot.slane %v4337_v18, %v6332_v21  ;;  %v4352_v8 = vrot.slane %v4338_v39, %v6332_v21  ;;  %v4617_v56 = vrot.slane %v4609_v30, %v6332_v21 }
 0x503   :  { %v4624_v48 = vrot.slane %v4610_v52, %v6332_v21  ;;  %v5236_v13 = vcombine.high %v5184_v24, %v5216_v54  ;;  %v4829_v26 = vcombine.low %v7651_v12, %v7654_v63  ;;  %v7665_v6 = vrot.slane %v5049_v7, %v6346_v42 }
 0x504   :  { %v5879_v53 = vpack.i.bf16 %v5235_v4, %v5099_v23  ;;  %v4385_v44 = vcombine.low %v7540_v35, %v4345_v46  ;;  %v4386_v60 = vcombine.high %v7540_v35, %v4345_v46  ;;  %v4401_v50 = vcombine.low %v7543_v29, %v4352_v8 }
 0x505   :  { %v4402_v5 = vcombine.high %v7543_v29, %v4352_v8  ;;  %v4657_v1 = vcombine.low %v7553_v15, %v4617_v56  ;;  %v4658_v51 = vcombine.high %v7553_v15, %v4617_v56  ;;  %v4673_v33 = vcombine.low %v7556_v34, %v4624_v48 }
 0x506   :  { %5880 = vrot.lane.b32.xlu1 %v5879_v53, %s6158_s26  ;;  %v4393_v27 = vrot.slane %v4385_v44, %v6346_v42  ;;  %v4400_v23 = vrot.slane %v4386_v60, %v6346_v42  ;;  %v4409_v31 = vrot.slane %v4401_v50, %v6346_v42  ;;  %v4674_v35 = vcombine.high %v7556_v34, %v4624_v48  ;;  %s6177_s26 = smov 32  }
 0x507   :  { %v4416_v40 = vrot.slane %v4402_v5, %v6346_v42  ;;  %v4665_v29 = vrot.slane %v4657_v1, %v6346_v42  ;;  %v4672_v11 = vrot.slane %v4658_v51, %v6346_v42  ;;  %v4681_v15 = vrot.slane %v4673_v33, %v6346_v42 }
 0x508   :  { %v5538_v24 = vcombine.low %v4393_v27, %v4400_v23  ;;  %v5540_v62 = vcombine.high %v4393_v27, %v4400_v23  ;;  %v4688_v43 = vrot.slane %v4674_v35, %v6346_v42  ;;  %v5889_v55 = vpack.i.bf16 %v5236_v13, %v5100_v17 }
 0x509   :  { %v5542_v28 = vcombine.low %v4409_v31, %v4416_v40  ;;  %v5544_v49 = vcombine.high %v4409_v31, %v4416_v40  ;;  %v5554_v61 = vcombine.low %v4665_v29, %v4672_v11  ;;  %v5556_v25 = vcombine.high %v4665_v29, %v4672_v11 }
 0x50a   :  { %v4848_v54 = vrot.slane %v5538_v24, %v6332_v21  ;;  %v4864_v34 = vrot.slane %v5540_v62, %v6332_v21  ;;  %v5558_v18 = vcombine.low %v4681_v15, %v4688_v43  ;;  %v5560_v39 = vcombine.high %v4681_v15, %v4688_v43  ;;  %5890 = vrot.lane.b32.xlu1 %v5889_v55, %s6176_s9 }
 0x50b   :  { %v4880_v30 = vrot.slane %v5542_v28, %v6332_v21  ;;  %v4896_v52 = vrot.slane %v5544_v49, %v6332_v21  ;;  %v5120_v7 = vrot.slane %v5554_v61, %v6332_v21  ;;  %v5136_v17 = vrot.slane %v5556_v25, %v6332_v21  ;;  %v2299_v28 = vld [vmem:[#allocation8] sm:$0xff]  ;;  %v2300_v49 = vld [vmem:[#allocation8 + $0x8] sm:$0xff] }
 0x50c   :  { %v5152_v4 = vrot.slane %v5558_v18, %v6332_v21  ;;  %v5168_v46 = vrot.slane %v5560_v39, %v6332_v21  ;;  %v4913_v8 = vcombine.low %v4848_v54, %v4864_v34  ;;  %v5081_v56 = vcombine.low %v7636_v59, %v7639_v22  ;;  %v2302_v18 = vld [vmem:[#allocation8 + $0x18] sm:$0xff] }
 0x50d   :  { %v4945_v48 = vcombine.low %v4880_v30, %v4896_v52  ;;  %v5185_v13 = vcombine.low %v5120_v7, %v5136_v17  ;;  %v4830_v53 = vcombine.high %v7651_v12, %v7654_v63  ;;  %v4778_v44 = vcombine.high %v7610_v20, %v7613_v47 }
 0x50e   :  { %v4921_v60 = vrot.slane %v4913_v8, %v6346_v42  ;;  %v5089_v50 = vrot.slane %v5081_v56, %v6346_v42  ;;  %v5217_v5 = vcombine.low %v5152_v4, %v5168_v46  ;;  %v4810_v21 = vcombine.high %v7616_v0, %v7619_v45 }
 0x50f   :  { %v4953_v1 = vrot.slane %v4945_v48, %v6346_v42  ;;  %v5193_v51 = vrot.slane %v5185_v13, %v6346_v42  ;;  %v4792_v33 = vrot.slane %v4778_v44, %v6346_v42  ;;  %v4914_v27 = vcombine.high %v4848_v54, %v4864_v34 }
 0x510   :  { %v5101_v23 = vcombine.low %v7665_v6, %v5089_v50  ;;  %v5225_v31 = vrot.slane %v5217_v5, %v6346_v42  ;;  %v5102_v20 = vcombine.high %v7665_v6, %v5089_v50  ;;  %v4824_v47 = vrot.slane %v4810_v21, %v6346_v42  ;;  %v2305_v50 = vld [vmem:[#allocation8 + $0x30] sm:$0xff]  ;;  %v2306_v5 = vld [vmem:[#allocation8 + $0x38] sm:$0xff] }
 0x511   :  { %v4965_v35 = vcombine.low %v4921_v60, %v4953_v1  ;;  %v4966_v40 = vcombine.high %v4921_v60, %v4953_v1  ;;  %v4928_v29 = vrot.slane %v4914_v27, %v6346_v42  ;;  %v4946_v0 = vcombine.high %v4880_v30, %v4896_v52 }
 0x512   :  { %v5237_v45 = vcombine.low %v5193_v51, %v5225_v31  ;;  %v5238_v11 = vcombine.high %v5193_v51, %v5225_v31  ;;  %v4831_v15 = vcombine.low %v4792_v33, %v4824_v47  ;;  %v5050_v24 = vcombine.high %v7622_v38, %v7625_v2 }
 0x513   :  { %v5894_v62 = vpack.i.bf16 %v4965_v35, %v4829_v26  ;;  %v5904_v43 = vpack.i.bf16 %v4966_v40, %v4830_v53  ;;  %v4960_v6 = vrot.slane %v4946_v0, %v6346_v42  ;;  %v5082_v55 = vcombine.high %v7636_v59, %v7639_v22  ;;  %v2301_v26 = vld [vmem:[#allocation8 + $0x10] sm:$0xff] }
 0x514   :  { %v5899_v61 = vpack.i.bf16 %v5237_v45, %v5101_v23  ;;  %v5909_v25 = vpack.i.bf16 %v5238_v11, %v5102_v20  ;;  %v5064_v54 = vrot.slane %v5050_v24, %v6346_v42  ;;  %v5186_v34 = vcombine.high %v5120_v7, %v5136_v17  ;;  %v2303_v7 = vld [vmem:[#allocation8 + $0x20] sm:$0xff]  ;;  %v2304_v17 = vld [vmem:[#allocation8 + $0x28] sm:$0xff] }
 0x515   :  { %5895 = vrot.lane.b32.xlu0 %v5894_v62, %s6177_s26  ;;  %v4967_v38 = vcombine.low %v4928_v29, %v4960_v6  ;;  %v5096_v2 = vrot.slane %v5082_v55, %v6346_v42  ;;  %v5218_v12 = vcombine.high %v5152_v4, %v5168_v46  ;;  %v4832_v63 = vcombine.high %v4792_v33, %v4824_v47 }
 0x516   :  { %5900 = vrot.lane.b32.xlu1 %v5899_v61, %s6177_s26  ;;  %v5200_v39 = vrot.slane %v5186_v34, %v6346_v42  ;;  %v4968_v59 = vcombine.high %v4928_v29, %v4960_v6  ;;  %v2307_v22 = vpack.c.bf16 %v2300_v49, %v2299_v28  ;;  %v2308_v13 = vpack.c.bf16 %v2302_v18, %v2301_v26 }
 0x517   :  { %v5914_v30 = vpack.i.bf16 %v4967_v38, %v4831_v15  ;;  %v5103_v52 = vcombine.low %v5064_v54, %v5096_v2  ;;  %v5232_v8 = vrot.slane %v5218_v12, %v6346_v42  ;;  %v5104_v56 = vcombine.high %v5064_v54, %v5096_v2 }
 0x518   :  { %v5924_v48 = vpack.i.bf16 %v4968_v59, %v4832_v63  ;;  %5826 = vmatprep.subr.bf16.mxu1 %v2307_v22  ;;  %v2309_v53 = vpack.c.bf16 %v2304_v17, %v2303_v7  ;;  %v2310_v42 = vpack.c.bf16 %v2306_v5, %v2305_v50 }
 0x519   :  { %5905 = vrot.lane.b32.xlu0 %v5904_v43, %s6178_s10  ;;  %v5239_v4 = vcombine.low %v5200_v39, %v5232_v8  ;;  %v5240_v46 = vcombine.high %v5200_v39, %v5232_v8  ;;  %5827 = vmatpush3.bf16.msra.mxu1 %v2307_v22 }
 0x51a   :  { %5910 = vrot.lane.b32.xlu1 %v5909_v25, %s6178_s10  ;;  %5828 = vmatprep.subr.bf16.mxu1 %v2308_v13 }
 0x51b   :  { %v5919_v44 = vpack.i.bf16 %v5239_v4, %v5103_v52  ;;  %v5929_v60 = vpack.i.bf16 %v5240_v46, %v5104_v56 }
 0x51d   :  { %5915 = vrot.lane.b32.xlu0 %v5914_v30, %s6179_s11  ;;  %5829 = vmatpush3.bf16.msra.mxu1 %v2308_v13 }
 0x51e   :  { %5920 = vrot.lane.b32.xlu1 %v5919_v44, %s6179_s11  ;;  %5830 = vmatprep.subr.bf16.mxu1 %v2309_v53 }
 0x521   :  { %5925 = vrot.lane.b32.xlu0 %v5924_v48, %s6180_s12  ;;  %5831 = vmatpush3.bf16.msra.mxu1 %v2309_v53 }
 0x522   :  { %5930 = vrot.lane.b32.xlu1 %v5929_v60, %s6180_s12  ;;  %5832 = vmatprep.subr.bf16.mxu1 %v2310_v42 }
 0x525   :  { %5833 = vmatpush3.bf16.msra.mxu1 %v2310_v42 }
 0x55d   :  { %v5866_v21 = vpop.permute.xlu1 %5865 }
 0x55e   :  { %v5868_v31 = vunpack.i.h.bf16 %v5866_v21  ;;  %v5867_v20 = vunpack.i.l.bf16 %v5866_v21 }
 0x560   :  { %v5354_v11 = vsel %vm858_vm2, %v4961_v10, %v5868_v31  ;;  %v5353_v15 = vsel %vm858_vm2, %v4825_v14, %v5867_v20 }
 0x564   :  { %v5871_v51 = vpop.permute.xlu0 %5870 }
 0x565   :  { %v5873_v0 = vunpack.i.h.bf16 %v5871_v51  ;;  %v5872_v45 = vunpack.i.l.bf16 %v5871_v51 }
 0x567   :  { %v5355_v3 = vsel %vm858_vm2, %v5097_v37, %v5872_v45  ;;  %v5356_v57 = vsel %vm858_vm2, %v5233_v36, %v5873_v0 }
 0x569   :  { %v5876_v1 = vpop.permute.xlu1 %5875  ;;  %v5886_v27 = vpop.permute.xlu0 %5885 }
 0x56a   :  { %v5878_v47 = vunpack.i.h.bf16 %v5876_v1  ;;  %v5877_v35 = vunpack.i.l.bf16 %v5876_v1  ;;  %v5888_v24 = vunpack.i.h.bf16 %v5886_v27  ;;  %v5887_v62 = vunpack.i.l.bf16 %v5886_v27 }
 0x56c   :  { %v5357_v43 = vsel %vm3080_vm3, %v5353_v15, %v5877_v35  ;;  %v5358_v6 = vsel %vm3080_vm3, %v5354_v11, %v5878_v47  ;;  %v5561_v47 = vld [vmem:[%s7790_s3] ss:$0 sm:$0xff]  ;;  %s6128_s3 = scalar_lea.vmem %s5459_s17, 512 }
 0x56d   :  { %v5363_v14 = vsel %vm5361_vm4, %v5358_v6, %v5888_v24  ;;  %v5362_v10 = vsel %vm5361_vm4, %v5357_v43, %v5887_v62  ;;  %p6129_p10 = scmp.ne.s32.totalorder %s5459_s17, %s6128_s3  ;;  %p6134_p12 = scmp.lt.s32.totalorder %s6128_s3, %s6128_s3 }
 0x56f   :  { %p6135_p13 = por %p6134_p12, %p6133_p11 }
 0x571   :  { %p6136_p0 = pnand %p6135_p13, %p6129_p10 }
 0x578   :  { %v5881_v33 = vpop.permute.xlu1 %5880 }
 0x579   :  { %v5883_v28 = vunpack.i.h.bf16 %v5881_v33  ;;  %v5882_v49 = vunpack.i.l.bf16 %v5881_v33 }
 0x57b   :  { %v5359_v32 = vsel %vm3080_vm3, %v5355_v3, %v5882_v49  ;;  %v5360_v37 = vsel %vm3080_vm3, %v5356_v57, %v5883_v28 }
 0x57c   :  { %v5891_v23 = vpop.permute.xlu1 %5890 }
 0x57d   :  { %v5893_v9 = vunpack.i.h.bf16 %v5891_v23  ;;  %v5892_v58 = vunpack.i.l.bf16 %v5891_v23 }
 0x57f   :  { %v5364_v63 = vsel %vm5361_vm4, %v5359_v32, %v5892_v58  ;;  %v5365_v26 = vsel %vm5361_vm4, %v5360_v37, %v5893_v9 }
 0x587   :  { %v5896_v40 = vpop.permute.xlu0 %5895 }
 0x588   :  { %v5901_v29 = vpop.permute.xlu1 %5900  ;;  %v5898_v25 = vunpack.i.h.bf16 %v5896_v40  ;;  %v5897_v54 = vunpack.i.l.bf16 %v5896_v40 }
 0x589   :  { %v5903_v34 = vunpack.i.h.bf16 %v5901_v29  ;;  %v5902_v38 = vunpack.i.l.bf16 %v5901_v29 }
 0x58a   :  { %v5367_v59 = vsel %vm5366_vm5, %v5362_v10, %v5897_v54  ;;  %v5368_v22 = vsel %vm5366_vm5, %v5363_v14, %v5898_v25 }
 0x58b   :  { %v5906_v55 = vpop.permute.xlu0 %5905  ;;  %v5370_v8 = vsel %vm5366_vm5, %v5365_v26, %v5903_v34  ;;  %v5369_v56 = vsel %vm5366_vm5, %v5364_v63, %v5902_v38 }
 0x58c   :  { %v5911_v61 = vpop.permute.xlu1 %5910  ;;  %v5908_v2 = vunpack.i.h.bf16 %v5906_v55  ;;  %v5907_v12 = vunpack.i.l.bf16 %v5906_v55 }
 0x58d   :  { %v5913_v41 = vunpack.i.h.bf16 %v5911_v61  ;;  %v5912_v16 = vunpack.i.l.bf16 %v5911_v61 }
 0x58e   :  { %v5372_v7 = vsel %vm5371_vm6, %v5367_v59, %v5907_v12  ;;  %v5373_v17 = vsel %vm5371_vm6, %v5368_v22, %v5908_v2 }
 0x58f   :  { %v5916_v19 = vpop.permute.xlu0 %5915  ;;  %v5374_v13 = vsel %vm5371_vm6, %v5369_v56, %v5912_v16  ;;  %v5375_v4 = vsel %vm5371_vm6, %v5370_v8, %v5913_v41 }
 0x590   :  { %v5921_v36 = vpop.permute.xlu1 %5920  ;;  %v5918_v18 = vunpack.i.h.bf16 %v5916_v19  ;;  %v5917_v39 = vunpack.i.l.bf16 %v5916_v19 }
 0x591   :  { %v5923_v30 = vunpack.i.h.bf16 %v5921_v36  ;;  %v5922_v52 = vunpack.i.l.bf16 %v5921_v36 }
 0x592   :  { %v5377_v60 = vsel %vm5376_vm7, %v5372_v7, %v5917_v39  ;;  %v5378_v50 = vsel %vm5376_vm7, %v5373_v17, %v5918_v18 }
 0x593   :  { %v5926_v48 = vpop.permute.xlu0 %5925  ;;  %v5379_v21 = vsel %vm5376_vm7, %v5374_v13, %v5922_v52  ;;  %v5380_v1 = vsel %vm5376_vm7, %v5375_v4, %v5923_v30 }
 0x594   :  { %v5928_v46 = vunpack.i.h.bf16 %v5926_v48  ;;  %v5927_v53 = vunpack.i.l.bf16 %v5926_v48  ;;  %v5931_v44 = vpop.permute.xlu1 %5930 }
 0x595   :  { %v5933_v5 = vunpack.i.h.bf16 %v5931_v44  ;;  %v5932_v42 = vunpack.i.l.bf16 %v5931_v44 }
 0x596   :  { %v5382_v51 = vsel %vm5381_vm8, %v5377_v60, %v5927_v53  ;;  %v5383_v33 = vsel %vm5381_vm8, %v5378_v50, %v5928_v46 }
 0x597   :  { %v5386_v27 = vpack.c.bf16 %v5383_v33, %v5382_v51  ;;  %v5384_v23 = vsel %vm5381_vm8, %v5379_v21, %v5932_v42  ;;  %v5385_v31 = vsel %vm5381_vm8, %v5380_v1, %v5933_v5 }
 0x598   :  { %v5387_v20 = vpack.c.bf16 %v5385_v31, %v5384_v23 }
 0x599   :  { %5834 = vmatprep.mubr.msk.bf16.mxu1 %vm90_vm0, %v5386_v27 }
 0x59a   :  { %5835 = vmatmul.mubr.msk.bf16.vlgmr.msra.gmra.mrb[68].mxu1 %vm90_vm0, %v5387_v20 }
 0x66d   :  { %v5836_v35 = vpop.f32.mrb[68].mxu1 }
 0x66e   :  { %v5443_v40 = vadd.f32 %v5836_v35, %v5561_v47  ;;  %v5434_v29 = vpop.f32.mrb[69].mxu1 }
 0x66f   :  { %v5435_v0 = vadd.f32 %v5561_v47, %v5434_v29  ;;  %v5837_v45 = vpop.f32.mrb[70].mxu1 }
 0x670   :  { %5451 = vst.msk [vmem:[#allocation9 + $0x10] sm:$0xff] %vm90_vm0, %v5443_v40  ;;  %v5446_v11 = vadd.f32 %v5837_v45, %v5561_v47  ;;  %v5437_v15 = vpop.f32.mrb[71].mxu1 }
 0x671   :  { %5449 = vst.msk [vmem:[#allocation9] sm:$0xff] %vm90_vm0, %v5435_v0  ;;  %v5438_v24 = vadd.f32 %v5561_v47, %v5437_v15 }
 0x672   :  { %5452 = vst.msk [vmem:[#allocation9 + $0x18] sm:$0xff] %vm90_vm0, %v5446_v11 }
 0x673   :  { %5450 = vst.msk [vmem:[#allocation9 + $0x8] sm:$0xff] %vm90_vm0, %v5438_v24 }
 0x674   :  { %6139 = shalt.err (!%p6136_p0)
}
 0x675   :  { %s6140_s20 = scalar_lea.hbm %s7791_s4, 512 }
 0x676   :  { %p6141_p1 = scmp.ne.s32.totalorder %s7791_s4, %s6140_s20  ;;  %p6144_p2 = scmp.lt.u32.totalorder %s6140_s20, %s7791_s4 }
 0x678   :  { %p6146_p3 = pnand %p6144_p2, %p6141_p1 }
 0x67a   :  { %6149 = shalt.err (!%p6146_p3)
}
 0x67b   :  { %5464 = dma.vmem_to_hbm [thread:$0]  %s5459_s17, 512, %s7791_s4, [#allocation5], %s6160_s1, %s6160_s1, %s6161_s13  }
 0x67c   :  { %6154 = dma.done.wait [#allocation5], 512  }
 0x67d   :  { %6155 = vsyncadd [#allocation5], 4294966784 }
 0x67e   :  { %5468 = vsyncpa [#allocation4], 1 }
 0x67f   :  { %5469 = vsyncpa [#allocation7], 1 }
 0x680   :  { %5470 = vsyncpa [#allocation5], 1 }

</bundles_post_ra>
